<compile_context>
chip_gen: v7x
topology: tpu7x:2x2x1
jax: 0.10.0
libtpu: 0.0.40
codegen_flags: <defaults>
</compile_context>

<pallas_src>
import functools

import jax
import jax.numpy as jnp
from jax import lax
from jax.experimental import pallas as pl
from jax.experimental.pallas import tpu as pltpu


def _conv_block_kernel(x_ref, w_ref, b_ref, o_ref, row_scratch, *,
                       kh_size, kw_size, stride, pool, h_pool, w_pool, w_out):
    """Per-batch ConvBlock body.

    x_ref:       (1, H_pad, W_pad, C_in)    zero-padded NHWC input image
    w_ref:       (KH, KW, C_in, C_out)      HWIO weights
    b_ref:       (1, C_out)                 bias
    o_ref:       (1, H_pool, W_pool, C_out) pooled NHWC output
    row_scratch: (W_out, C_out) f32         one conv+ReLU output row (VMEM)
    """
    c_out = w_ref.shape[-1]
    bias = b_ref[...]                       # (1, C_out), broadcasts below

    for oph in range(h_pool):               # pooled output row
        pooled = None                       # running (W_pool, C_out) max
        for ph in range(pool):              # conv rows feeding this pooled row
            oh = oph * pool + ph
            acc = jnp.zeros((w_out, c_out), jnp.float32)
            for kh in range(kh_size):       # conv = sum of shifted matmuls
                ih = oh * stride + kh
                for kw in range(kw_size):
                    if stride == 1:
                        patch = x_ref[0, ih, pl.ds(kw, w_out), :]
                    else:
                        patch = x_ref[0, ih, pl.ds(kw, w_out, stride=stride), :]
                    acc = acc + jnp.dot(patch, w_ref[kh, kw],
                                        preferred_element_type=jnp.float32)
            # Fused bias + ReLU, staged through VMEM scratch for the W-pool.
            row_scratch[...] = jnp.maximum(acc + bias, 0.0)
            if pool == 1:
                wmax = row_scratch[...]
            else:
                wmax = row_scratch[pl.ds(0, w_pool, stride=pool), :]
                for pw in range(1, pool):
                    wmax = jnp.maximum(
                        wmax, row_scratch[pl.ds(pw, w_pool, stride=pool), :])
            pooled = wmax if pooled is None else jnp.maximum(pooled, wmax)
        o_ref[0, oph] = pooled.astype(o_ref.dtype)


def conv_block(x_nchw, weight_oihw, bias, *, stride, padding, pool_size):
    """Pallas equivalent of ConvBlock.forward: pool(relu(conv(x)))."""
    B, C_in, H, W = x_nchw.shape
    C_out, c_in_w, KH, KW = weight_oihw.shape
    assert c_in_w == C_in
    H_out = (H + 2 * padding - KH) // stride + 1
    W_out = (W + 2 * padding - KW) // stride + 1
    H_pool, W_pool = H_out // pool_size, W_out // pool_size
    H_pad, W_pad = H + 2 * padding, W + 2 * padding

    # Layout plumbing (free in XLA): NCHW -> NHWC + spatial zero-pad; OIHW -> HWIO.
    x_pad = jnp.pad(jnp.transpose(x_nchw, (0, 2, 3, 1)),
                    ((0, 0), (padding, padding), (padding, padding), (0, 0)))
    w_hwio = jnp.transpose(weight_oihw, (2, 3, 1, 0))
    b2d = bias.reshape(1, C_out)

    kernel = functools.partial(
        _conv_block_kernel, kh_size=KH, kw_size=KW, stride=stride,
        pool=pool_size, h_pool=H_pool, w_pool=W_pool, w_out=W_out)

    out_nhwc = pl.pallas_call(
        kernel,
        out_shape=jax.ShapeDtypeStruct((B, H_pool, W_pool, C_out), x_nchw.dtype),
        grid_spec=pltpu.PrefetchScalarGridSpec(
            num_scalar_prefetch=0,
            grid=(B,),
            in_specs=[
                pl.BlockSpec((1, H_pad, W_pad, C_in), lambda b: (b, 0, 0, 0)),
                pl.BlockSpec((KH, KW, C_in, C_out), lambda b: (0, 0, 0, 0)),
                pl.BlockSpec((1, C_out), lambda b: (0, 0)),
            ],
            out_specs=pl.BlockSpec((1, H_pool, W_pool, C_out),
                                   lambda b: (b, 0, 0, 0)),
            scratch_shapes=[pltpu.VMEM((W_out, C_out), jnp.float32)],
        ),
        compiler_params=pltpu.CompilerParams(
            dimension_semantics=("parallel",),
        ),
    )(x_pad, w_hwio, b2d)

    # Back to PyTorch's NCHW output layout.
    return jnp.transpose(out_nhwc, (0, 3, 1, 2))


def conv_block_ref(x, w, b, *, stride, padding, pool_size):
    """Pure-JAX reference: conv2d + bias + ReLU + max-pool (NCHW)."""
    y = lax.conv_general_dilated(
        x, w, window_strides=(stride, stride),
        padding=((padding, padding), (padding, padding)),
        dimension_numbers=("NCHW", "OIHW", "NCHW"))
    y = jnp.maximum(y + b.reshape(1, -1, 1, 1), 0.0)
    return lax.reduce_window(
        y, -jnp.inf, lax.max,
        window_dimensions=(1, 1, pool_size, pool_size),
        window_strides=(1, 1, pool_size, pool_size),
        padding="VALID")


if __name__ == "__main__":
    key = jax.random.PRNGKey(0)
    k_x, k_w, k_b = jax.random.split(key, 3)

    # Small shapes consistent with the module: B=2, C_in=4, H=W=16,
    # C_out=8, 3x3 conv, padding=1, stride=1, 2x2 max-pool.
    B, C_in, H, W = 2, 4, 16, 16
    C_out, K = 8, 3
    stride, padding, pool_size = 1, 1, 2

    x = jax.random.normal(k_x, (B, C_in, H, W), dtype=jnp.float32)
    weight = jax.random.normal(k_w, (C_out, C_in, K, K), dtype=jnp.float32) * 0.1
    bias = jax.random.normal(k_b, (C_out,), dtype=jnp.float32) * 0.1

    fn = jax.jit(functools.partial(conv_block, stride=stride, padding=padding,
                                   pool_size=pool_size))
    y = fn(x, weight, bias)
    jax.block_until_ready(y)

    ref = conv_block_ref(x, weight, bias, stride=stride, padding=padding,
                         pool_size=pool_size)

    assert y.shape == (B, C_out, H // pool_size, W // pool_size), y.shape
    assert y.dtype == x.dtype
    assert bool(jnp.allclose(y, ref, atol=2e-2, rtol=2e-2)), float(
        jnp.max(jnp.abs(y - ref)))

    print("KERNEL_OK")
</pallas_src>

<mosaic_0001>
module attributes {stable_mosaic.version = 11 : i64} {
  func.func @_conv_block_kernel(%arg0: i32, %arg1: memref<1x18x18x4xf32, #tpu.memory_space<vmem>>, %arg2: memref<3x3x4x8xf32, #tpu.memory_space<vmem>>, %arg3: memref<1x8xf32, #tpu.memory_space<vmem>>, %arg4: memref<1x8x8x8xf32, #tpu.memory_space<vmem>>, %arg5: memref<16x8xf32, #tpu.memory_space<vmem>>) attributes {dimension_semantics = [#tpu.dimension_semantics<parallel>], iteration_bounds = array<i64: 2>, scalar_prefetch = 0 : i64, scratch_operands = 1 : i64, tpu.core_type = #tpu.core_type<tc>, window_params = [{transform_indices = @transform_0, window_bounds = array<i64: 1, 18, 18, 4>}, {pipeline_mode = #tpu.pipeline_mode<synchronous>, transform_indices = @transform_1, window_bounds = array<i64: 3, 3, 4, 8>}, {pipeline_mode = #tpu.pipeline_mode<synchronous>, transform_indices = @transform_2, window_bounds = array<i64: 1, 8>}, {transform_indices = @transform_3, window_bounds = array<i64: 1, 8, 8, 8>}]} {
    %c0 = arith.constant 0 : index
    %c0_0 = arith.constant 0 : index
    %0 = vector.load %arg3[%c0, %c0_0] : memref<1x8xf32, #tpu.memory_space<vmem>>, vector<1x8xf32>
    %cst = arith.constant 0.000000e+00 : f32
    %1 = vector.broadcast %cst : f32 to vector<16x8xf32>
    %c0_1 = arith.constant 0 : index
    %c0_2 = arith.constant 0 : index
    %c0_3 = arith.constant 0 : index
    %c0_4 = arith.constant 0 : index
    %2 = vector.load %arg1[%c0_1, %c0_2, %c0_3, %c0_4] : memref<1x18x18x4xf32, #tpu.memory_space<vmem>>, vector<1x1x16x4xf32>
    %3 = vector.shape_cast %2 : vector<1x1x16x4xf32> to vector<16x4xf32>
    %c0_5 = arith.constant 0 : index
    %c0_6 = arith.constant 0 : index
    %c0_7 = arith.constant 0 : index
    %c0_8 = arith.constant 0 : index
    %4 = vector.load %arg2[%c0_5, %c0_6, %c0_7, %c0_8] : memref<3x3x4x8xf32, #tpu.memory_space<vmem>>, vector<1x1x4x8xf32>
    %5 = vector.shape_cast %4 : vector<1x1x4x8xf32> to vector<4x8xf32>
    %cst_9 = arith.constant dense<0.000000e+00> : vector<16x8xf32>
    %6 = tpu.matmul %3, %5, %cst_9 {dimension_numbers = #tpu.dot_dimension_numbers<[1], [0], [0], [1], [0, 0, 1, 1], [], []>} : vector<16x4xf32>, vector<4x8xf32>, vector<16x8xf32> -> vector<16x8xf32>
    %7 = arith.addf %1, %6 : vector<16x8xf32>
    %c0_10 = arith.constant 0 : index
    %c0_11 = arith.constant 0 : index
    %c1 = arith.constant 1 : index
    %c0_12 = arith.constant 0 : index
    %8 = vector.load %arg1[%c0_10, %c0_11, %c1, %c0_12] : memref<1x18x18x4xf32, #tpu.memory_space<vmem>>, vector<1x1x16x4xf32>
    %9 = vector.shape_cast %8 : vector<1x1x16x4xf32> to vector<16x4xf32>
    %c0_13 = arith.constant 0 : index
    %c1_14 = arith.constant 1 : index
    %c0_15 = arith.constant 0 : index
    %c0_16 = arith.constant 0 : index
    %10 = vector.load %arg2[%c0_13, %c1_14, %c0_15, %c0_16] : memref<3x3x4x8xf32, #tpu.memory_space<vmem>>, vector<1x1x4x8xf32>
    %11 = vector.shape_cast %10 : vector<1x1x4x8xf32> to vector<4x8xf32>
    %cst_17 = arith.constant dense<0.000000e+00> : vector<16x8xf32>
    %12 = tpu.matmul %9, %11, %cst_17 {dimension_numbers = #tpu.dot_dimension_numbers<[1], [0], [0], [1], [0, 0, 1, 1], [], []>} : vector<16x4xf32>, vector<4x8xf32>, vector<16x8xf32> -> vector<16x8xf32>
    %13 = arith.addf %7, %12 : vector<16x8xf32>
    %c0_18 = arith.constant 0 : index
    %c0_19 = arith.constant 0 : index
    %c2 = arith.constant 2 : index
    %c0_20 = arith.constant 0 : index
    %14 = vector.load %arg1[%c0_18, %c0_19, %c2, %c0_20] : memref<1x18x18x4xf32, #tpu.memory_space<vmem>>, vector<1x1x16x4xf32>
    %15 = vector.shape_cast %14 : vector<1x1x16x4xf32> to vector<16x4xf32>
    %c0_21 = arith.constant 0 : index
    %c2_22 = arith.constant 2 : index
    %c0_23 = arith.constant 0 : index
    %c0_24 = arith.constant 0 : index
    %16 = vector.load %arg2[%c0_21, %c2_22, %c0_23, %c0_24] : memref<3x3x4x8xf32, #tpu.memory_space<vmem>>, vector<1x1x4x8xf32>
    %17 = vector.shape_cast %16 : vector<1x1x4x8xf32> to vector<4x8xf32>
    %cst_25 = arith.constant dense<0.000000e+00> : vector<16x8xf32>
    %18 = tpu.matmul %15, %17, %cst_25 {dimension_numbers = #tpu.dot_dimension_numbers<[1], [0], [0], [1], [0, 0, 1, 1], [], []>} : vector<16x4xf32>, vector<4x8xf32>, vector<16x8xf32> -> vector<16x8xf32>
    %19 = arith.addf %13, %18 : vector<16x8xf32>
    %c0_26 = arith.constant 0 : index
    %c1_27 = arith.constant 1 : index
    %c0_28 = arith.constant 0 : index
    %c0_29 = arith.constant 0 : index
    %20 = vector.load %arg1[%c0_26, %c1_27, %c0_28, %c0_29] : memref<1x18x18x4xf32, #tpu.memory_space<vmem>>, vector<1x1x16x4xf32>
    %21 = vector.shape_cast %20 : vector<1x1x16x4xf32> to vector<16x4xf32>
    %c1_30 = arith.constant 1 : index
    %c0_31 = arith.constant 0 : index
    %c0_32 = arith.constant 0 : index
    %c0_33 = arith.constant 0 : index
    %22 = vector.load %arg2[%c1_30, %c0_31, %c0_32, %c0_33] : memref<3x3x4x8xf32, #tpu.memory_space<vmem>>, vector<1x1x4x8xf32>
    %23 = vector.shape_cast %22 : vector<1x1x4x8xf32> to vector<4x8xf32>
    %cst_34 = arith.constant dense<0.000000e+00> : vector<16x8xf32>
    %24 = tpu.matmul %21, %23, %cst_34 {dimension_numbers = #tpu.dot_dimension_numbers<[1], [0], [0], [1], [0, 0, 1, 1], [], []>} : vector<16x4xf32>, vector<4x8xf32>, vector<16x8xf32> -> vector<16x8xf32>
    %25 = arith.addf %19, %24 : vector<16x8xf32>
    %c0_35 = arith.constant 0 : index
    %c1_36 = arith.constant 1 : index
    %c1_37 = arith.constant 1 : index
    %c0_38 = arith.constant 0 : index
    %26 = vector.load %arg1[%c0_35, %c1_36, %c1_37, %c0_38] : memref<1x18x18x4xf32, #tpu.memory_space<vmem>>, vector<1x1x16x4xf32>
    %27 = vector.shape_cast %26 : vector<1x1x16x4xf32> to vector<16x4xf32>
    %c1_39 = arith.constant 1 : index
    %c1_40 = arith.constant 1 : index
    %c0_41 = arith.constant 0 : index
    %c0_42 = arith.constant 0 : index
    %28 = vector.load %arg2[%c1_39, %c1_40, %c0_41, %c0_42] : memref<3x3x4x8xf32, #tpu.memory_space<vmem>>, vector<1x1x4x8xf32>
    %29 = vector.shape_cast %28 : vector<1x1x4x8xf32> to vector<4x8xf32>
    %cst_43 = arith.constant dense<0.000000e+00> : vector<16x8xf32>
    %30 = tpu.matmul %27, %29, %cst_43 {dimension_numbers = #tpu.dot_dimension_numbers<[1], [0], [0], [1], [0, 0, 1, 1], [], []>} : vector<16x4xf32>, vector<4x8xf32>, vector<16x8xf32> -> vector<16x8xf32>
    %31 = arith.addf %25, %30 : vector<16x8xf32>
    %c0_44 = arith.constant 0 : index
    %c1_45 = arith.constant 1 : index
    %c2_46 = arith.constant 2 : index
    %c0_47 = arith.constant 0 : index
    %32 = vector.load %arg1[%c0_44, %c1_45, %c2_46, %c0_47] : memref<1x18x18x4xf32, #tpu.memory_space<vmem>>, vector<1x1x16x4xf32>
    %33 = vector.shape_cast %32 : vector<1x1x16x4xf32> to vector<16x4xf32>
    %c1_48 = arith.constant 1 : index
    %c2_49 = arith.constant 2 : index
    %c0_50 = arith.constant 0 : index
    %c0_51 = arith.constant 0 : index
    %34 = vector.load %arg2[%c1_48, %c2_49, %c0_50, %c0_51] : memref<3x3x4x8xf32, #tpu.memory_space<vmem>>, vector<1x1x4x8xf32>
    %35 = vector.shape_cast %34 : vector<1x1x4x8xf32> to vector<4x8xf32>
    %cst_52 = arith.constant dense<0.000000e+00> : vector<16x8xf32>
    %36 = tpu.matmul %33, %35, %cst_52 {dimension_numbers = #tpu.dot_dimension_numbers<[1], [0], [0], [1], [0, 0, 1, 1], [], []>} : vector<16x4xf32>, vector<4x8xf32>, vector<16x8xf32> -> vector<16x8xf32>
    %37 = arith.addf %31, %36 : vector<16x8xf32>
    %c0_53 = arith.constant 0 : index
    %c2_54 = arith.constant 2 : index
    %c0_55 = arith.constant 0 : index
    %c0_56 = arith.constant 0 : index
    %38 = vector.load %arg1[%c0_53, %c2_54, %c0_55, %c0_56] : memref<1x18x18x4xf32, #tpu.memory_space<vmem>>, vector<1x1x16x4xf32>
    %39 = vector.shape_cast %38 : vector<1x1x16x4xf32> to vector<16x4xf32>
    %c2_57 = arith.constant 2 : index
    %c0_58 = arith.constant 0 : index
    %c0_59 = arith.constant 0 : index
    %c0_60 = arith.constant 0 : index
    %40 = vector.load %arg2[%c2_57, %c0_58, %c0_59, %c0_60] : memref<3x3x4x8xf32, #tpu.memory_space<vmem>>, vector<1x1x4x8xf32>
    %41 = vector.shape_cast %40 : vector<1x1x4x8xf32> to vector<4x8xf32>
    %cst_61 = arith.constant dense<0.000000e+00> : vector<16x8xf32>
    %42 = tpu.matmul %39, %41, %cst_61 {dimension_numbers = #tpu.dot_dimension_numbers<[1], [0], [0], [1], [0, 0, 1, 1], [], []>} : vector<16x4xf32>, vector<4x8xf32>, vector<16x8xf32> -> vector<16x8xf32>
    %43 = arith.addf %37, %42 : vector<16x8xf32>
    %c0_62 = arith.constant 0 : index
    %c2_63 = arith.constant 2 : index
    %c1_64 = arith.constant 1 : index
    %c0_65 = arith.constant 0 : index
    %44 = vector.load %arg1[%c0_62, %c2_63, %c1_64, %c0_65] : memref<1x18x18x4xf32, #tpu.memory_space<vmem>>, vector<1x1x16x4xf32>
    %45 = vector.shape_cast %44 : vector<1x1x16x4xf32> to vector<16x4xf32>
    %c2_66 = arith.constant 2 : index
    %c1_67 = arith.constant 1 : index
    %c0_68 = arith.constant 0 : index
    %c0_69 = arith.constant 0 : index
    %46 = vector.load %arg2[%c2_66, %c1_67, %c0_68, %c0_69] : memref<3x3x4x8xf32, #tpu.memory_space<vmem>>, vector<1x1x4x8xf32>
    %47 = vector.shape_cast %46 : vector<1x1x4x8xf32> to vector<4x8xf32>
    %cst_70 = arith.constant dense<0.000000e+00> : vector<16x8xf32>
    %48 = tpu.matmul %45, %47, %cst_70 {dimension_numbers = #tpu.dot_dimension_numbers<[1], [0], [0], [1], [0, 0, 1, 1], [], []>} : vector<16x4xf32>, vector<4x8xf32>, vector<16x8xf32> -> vector<16x8xf32>
    %49 = arith.addf %43, %48 : vector<16x8xf32>
    %c0_71 = arith.constant 0 : index
    %c2_72 = arith.constant 2 : index
    %c2_73 = arith.constant 2 : index
    %c0_74 = arith.constant 0 : index
    %50 = vector.load %arg1[%c0_71, %c2_72, %c2_73, %c0_74] : memref<1x18x18x4xf32, #tpu.memory_space<vmem>>, vector<1x1x16x4xf32>
    %51 = vector.shape_cast %50 : vector<1x1x16x4xf32> to vector<16x4xf32>
    %c2_75 = arith.constant 2 : index
    %c2_76 = arith.constant 2 : index
    %c0_77 = arith.constant 0 : index
    %c0_78 = arith.constant 0 : index
    %52 = vector.load %arg2[%c2_75, %c2_76, %c0_77, %c0_78] : memref<3x3x4x8xf32, #tpu.memory_space<vmem>>, vector<1x1x4x8xf32>
    %53 = vector.shape_cast %52 : vector<1x1x4x8xf32> to vector<4x8xf32>
    %cst_79 = arith.constant dense<0.000000e+00> : vector<16x8xf32>
    %54 = tpu.matmul %51, %53, %cst_79 {dimension_numbers = #tpu.dot_dimension_numbers<[1], [0], [0], [1], [0, 0, 1, 1], [], []>} : vector<16x4xf32>, vector<4x8xf32>, vector<16x8xf32> -> vector<16x8xf32>
    %55 = arith.addf %49, %54 : vector<16x8xf32>
    %56 = vector.broadcast %0 : vector<1x8xf32> to vector<16x8xf32>
    %57 = arith.addf %55, %56 : vector<16x8xf32>
    %cst_80 = arith.constant 0.000000e+00 : f32
    %58 = vector.broadcast %cst_80 : f32 to vector<16x8xf32>
    %59 = arith.maximumf %57, %58 : vector<16x8xf32>
    %c0_81 = arith.constant 0 : index
    %c0_82 = arith.constant 0 : index
    %60 = vector.load %arg5[%c0_81, %c0_82] : memref<16x8xf32, #tpu.memory_space<vmem>>, vector<16x8xf32>
    tpu.vector_store %arg5[%c0_81, %c0_82], %59 {strides = array<i32>} : memref<16x8xf32, #tpu.memory_space<vmem>>, vector<16x8xf32>,
    %c0_83 = arith.constant 0 : index
    %c0_84 = arith.constant 0 : index
    %61 = tpu.strided_load %arg5[%c0_83, %c0_84] {strides = array<i32: 2, 1>} : memref<16x8xf32, #tpu.memory_space<vmem>>, vector<8x8xf32>
    %c1_85 = arith.constant 1 : index
    %c0_86 = arith.constant 0 : index
    %62 = tpu.strided_load %arg5[%c1_85, %c0_86] {strides = array<i32: 2, 1>} : memref<16x8xf32, #tpu.memory_space<vmem>>, vector<8x8xf32>
    %63 = arith.maximumf %61, %62 : vector<8x8xf32>
    %cst_87 = arith.constant 0.000000e+00 : f32
    %64 = vector.broadcast %cst_87 : f32 to vector<16x8xf32>
    %c0_88 = arith.constant 0 : index
    %c1_89 = arith.constant 1 : index
    %c0_90 = arith.constant 0 : index
    %c0_91 = arith.constant 0 : index
    %65 = vector.load %arg1[%c0_88, %c1_89, %c0_90, %c0_91] : memref<1x18x18x4xf32, #tpu.memory_space<vmem>>, vector<1x1x16x4xf32>
    %66 = vector.shape_cast %65 : vector<1x1x16x4xf32> to vector<16x4xf32>
    %c0_92 = arith.constant 0 : index
    %c0_93 = arith.constant 0 : index
    %c0_94 = arith.constant 0 : index
    %c0_95 = arith.constant 0 : index
    %67 = vector.load %arg2[%c0_92, %c0_93, %c0_94, %c0_95] : memref<3x3x4x8xf32, #tpu.memory_space<vmem>>, vector<1x1x4x8xf32>
    %68 = vector.shape_cast %67 : vector<1x1x4x8xf32> to vector<4x8xf32>
    %cst_96 = arith.constant dense<0.000000e+00> : vector<16x8xf32>
    %69 = tpu.matmul %66, %68, %cst_96 {dimension_numbers = #tpu.dot_dimension_numbers<[1], [0], [0], [1], [0, 0, 1, 1], [], []>} : vector<16x4xf32>, vector<4x8xf32>, vector<16x8xf32> -> vector<16x8xf32>
    %70 = arith.addf %64, %69 : vector<16x8xf32>
    %c0_97 = arith.constant 0 : index
    %c1_98 = arith.constant 1 : index
    %c1_99 = arith.constant 1 : index
    %c0_100 = arith.constant 0 : index
    %71 = vector.load %arg1[%c0_97, %c1_98, %c1_99, %c0_100] : memref<1x18x18x4xf32, #tpu.memory_space<vmem>>, vector<1x1x16x4xf32>
    %72 = vector.shape_cast %71 : vector<1x1x16x4xf32> to vector<16x4xf32>
    %c0_101 = arith.constant 0 : index
    %c1_102 = arith.constant 1 : index
    %c0_103 = arith.constant 0 : index
    %c0_104 = arith.constant 0 : index
    %73 = vector.load %arg2[%c0_101, %c1_102, %c0_103, %c0_104] : memref<3x3x4x8xf32, #tpu.memory_space<vmem>>, vector<1x1x4x8xf32>
    %74 = vector.shape_cast %73 : vector<1x1x4x8xf32> to vector<4x8xf32>
    %cst_105 = arith.constant dense<0.000000e+00> : vector<16x8xf32>
    %75 = tpu.matmul %72, %74, %cst_105 {dimension_numbers = #tpu.dot_dimension_numbers<[1], [0], [0], [1], [0, 0, 1, 1], [], []>} : vector<16x4xf32>, vector<4x8xf32>, vector<16x8xf32> -> vector<16x8xf32>
    %76 = arith.addf %70, %75 : vector<16x8xf32>
    %c0_106 = arith.constant 0 : index
    %c1_107 = arith.constant 1 : index
    %c2_108 = arith.constant 2 : index
    %c0_109 = arith.constant 0 : index
    %77 = vector.load %arg1[%c0_106, %c1_107, %c2_108, %c0_109] : memref<1x18x18x4xf32, #tpu.memory_space<vmem>>, vector<1x1x16x4xf32>
    %78 = vector.shape_cast %77 : vector<1x1x16x4xf32> to vector<16x4xf32>
    %c0_110 = arith.constant 0 : index
    %c2_111 = arith.constant 2 : index
    %c0_112 = arith.constant 0 : index
    %c0_113 = arith.constant 0 : index
    %79 = vector.load %arg2[%c0_110, %c2_111, %c0_112, %c0_113] : memref<3x3x4x8xf32, #tpu.memory_space<vmem>>, vector<1x1x4x8xf32>
    %80 = vector.shape_cast %79 : vector<1x1x4x8xf32> to vector<4x8xf32>
    %cst_114 = arith.constant dense<0.000000e+00> : vector<16x8xf32>
    %81 = tpu.matmul %78, %80, %cst_114 {dimension_numbers = #tpu.dot_dimension_numbers<[1], [0], [0], [1], [0, 0, 1, 1], [], []>} : vector<16x4xf32>, vector<4x8xf32>, vector<16x8xf32> -> vector<16x8xf32>
    %82 = arith.addf %76, %81 : vector<16x8xf32>
    %c0_115 = arith.constant 0 : index
    %c2_116 = arith.constant 2 : index
    %c0_117 = arith.constant 0 : index
    %c0_118 = arith.constant 0 : index
    %83 = vector.load %arg1[%c0_115, %c2_116, %c0_117, %c0_118] : memref<1x18x18x4xf32, #tpu.memory_space<vmem>>, vector<1x1x16x4xf32>
    %84 = vector.shape_cast %83 : vector<1x1x16x4xf32> to vector<16x4xf32>
    %c1_119 = arith.constant 1 : index
    %c0_120 = arith.constant 0 : index
    %c0_121 = arith.constant 0 : index
    %c0_122 = arith.constant 0 : index
    %85 = vector.load %arg2[%c1_119, %c0_120, %c0_121, %c0_122] : memref<3x3x4x8xf32, #tpu.memory_space<vmem>>, vector<1x1x4x8xf32>
    %86 = vector.shape_cast %85 : vector<1x1x4x8xf32> to vector<4x8xf32>
    %cst_123 = arith.constant dense<0.000000e+00> : vector<16x8xf32>
    %87 = tpu.matmul %84, %86, %cst_123 {dimension_numbers = #tpu.dot_dimension_numbers<[1], [0], [0], [1], [0, 0, 1, 1], [], []>} : vector<16x4xf32>, vector<4x8xf32>, vector<16x8xf32> -> vector<16x8xf32>
    %88 = arith.addf %82, %87 : vector<16x8xf32>
    %c0_124 = arith.constant 0 : index
    %c2_125 = arith.constant 2 : index
    %c1_126 = arith.constant 1 : index
    %c0_127 = arith.constant 0 : index
    %89 = vector.load %arg1[%c0_124, %c2_125, %c1_126, %c0_127] : memref<1x18x18x4xf32, #tpu.memory_space<vmem>>, vector<1x1x16x4xf32>
    %90 = vector.shape_cast %89 : vector<1x1x16x4xf32> to vector<16x4xf32>
    %c1_128 = arith.constant 1 : index
    %c1_129 = arith.constant 1 : index
    %c0_130 = arith.constant 0 : index
    %c0_131 = arith.constant 0 : index
    %91 = vector.load %arg2[%c1_128, %c1_129, %c0_130, %c0_131] : memref<3x3x4x8xf32, #tpu.memory_space<vmem>>, vector<1x1x4x8xf32>
    %92 = vector.shape_cast %91 : vector<1x1x4x8xf32> to vector<4x8xf32>
    %cst_132 = arith.constant dense<0.000000e+00> : vector<16x8xf32>
    %93 = tpu.matmul %90, %92, %cst_132 {dimension_numbers = #tpu.dot_dimension_numbers<[1], [0], [0], [1], [0, 0, 1, 1], [], []>} : vector<16x4xf32>, vector<4x8xf32>, vector<16x8xf32> -> vector<16x8xf32>
    %94 = arith.addf %88, %93 : vector<16x8xf32>
    %c0_133 = arith.constant 0 : index
    %c2_134 = arith.constant 2 : index
    %c2_135 = arith.constant 2 : index
    %c0_136 = arith.constant 0 : index
    %95 = vector.load %arg1[%c0_133, %c2_134, %c2_135, %c0_136] : memref<1x18x18x4xf32, #tpu.memory_space<vmem>>, vector<1x1x16x4xf32>
    %96 = vector.shape_cast %95 : vector<1x1x16x4xf32> to vector<16x4xf32>
    %c1_137 = arith.constant 1 : index
    %c2_138 = arith.constant 2 : index
    %c0_139 = arith.constant 0 : index
    %c0_140 = arith.constant 0 : index
    %97 = vector.load %arg2[%c1_137, %c2_138, %c0_139, %c0_140] : memref<3x3x4x8xf32, #tpu.memory_space<vmem>>, vector<1x1x4x8xf32>
    %98 = vector.shape_cast %97 : vector<1x1x4x8xf32> to vector<4x8xf32>
    %cst_141 = arith.constant dense<0.000000e+00> : vector<16x8xf32>
    %99 = tpu.matmul %96, %98, %cst_141 {dimension_numbers = #tpu.dot_dimension_numbers<[1], [0], [0], [1], [0, 0, 1, 1], [], []>} : vector<16x4xf32>, vector<4x8xf32>, vector<16x8xf32> -> vector<16x8xf32>
    %100 = arith.addf %94, %99 : vector<16x8xf32>
    %c0_142 = arith.constant 0 : index
    %c3 = arith.constant 3 : index
    %c0_143 = arith.constant 0 : index
    %c0_144 = arith.constant 0 : index
    %101 = vector.load %arg1[%c0_142, %c3, %c0_143, %c0_144] : memref<1x18x18x4xf32, #tpu.memory_space<vmem>>, vector<1x1x16x4xf32>
    %102 = vector.shape_cast %101 : vector<1x1x16x4xf32> to vector<16x4xf32>
    %c2_145 = arith.constant 2 : index
    %c0_146 = arith.constant 0 : index
    %c0_147 = arith.constant 0 : index
    %c0_148 = arith.constant 0 : index
    %103 = vector.load %arg2[%c2_145, %c0_146, %c0_147, %c0_148] : memref<3x3x4x8xf32, #tpu.memory_space<vmem>>, vector<1x1x4x8xf32>
    %104 = vector.shape_cast %103 : vector<1x1x4x8xf32> to vector<4x8xf32>
    %cst_149 = arith.constant dense<0.000000e+00> : vector<16x8xf32>
    %105 = tpu.matmul %102, %104, %cst_149 {dimension_numbers = #tpu.dot_dimension_numbers<[1], [0], [0], [1], [0, 0, 1, 1], [], []>} : vector<16x4xf32>, vector<4x8xf32>, vector<16x8xf32> -> vector<16x8xf32>
    %106 = arith.addf %100, %105 : vector<16x8xf32>
    %c0_150 = arith.constant 0 : index
    %c3_151 = arith.constant 3 : index
    %c1_152 = arith.constant 1 : index
    %c0_153 = arith.constant 0 : index
    %107 = vector.load %arg1[%c0_150, %c3_151, %c1_152, %c0_153] : memref<1x18x18x4xf32, #tpu.memory_space<vmem>>, vector<1x1x16x4xf32>
    %108 = vector.shape_cast %107 : vector<1x1x16x4xf32> to vector<16x4xf32>
    %c2_154 = arith.constant 2 : index
    %c1_155 = arith.constant 1 : index
    %c0_156 = arith.constant 0 : index
    %c0_157 = arith.constant 0 : index
    %109 = vector.load %arg2[%c2_154, %c1_155, %c0_156, %c0_157] : memref<3x3x4x8xf32, #tpu.memory_space<vmem>>, vector<1x1x4x8xf32>
    %110 = vector.shape_cast %109 : vector<1x1x4x8xf32> to vector<4x8xf32>
    %cst_158 = arith.constant dense<0.000000e+00> : vector<16x8xf32>
    %111 = tpu.matmul %108, %110, %cst_158 {dimension_numbers = #tpu.dot_dimension_numbers<[1], [0], [0], [1], [0, 0, 1, 1], [], []>} : vector<16x4xf32>, vector<4x8xf32>, vector<16x8xf32> -> vector<16x8xf32>
    %112 = arith.addf %106, %111 : vector<16x8xf32>
    %c0_159 = arith.constant 0 : index
    %c3_160 = arith.constant 3 : index
    %c2_161 = arith.constant 2 : index
    %c0_162 = arith.constant 0 : index
    %113 = vector.load %arg1[%c0_159, %c3_160, %c2_161, %c0_162] : memref<1x18x18x4xf32, #tpu.memory_space<vmem>>, vector<1x1x16x4xf32>
    %114 = vector.shape_cast %113 : vector<1x1x16x4xf32> to vector<16x4xf32>
    %c2_163 = arith.constant 2 : index
    %c2_164 = arith.constant 2 : index
    %c0_165 = arith.constant 0 : index
    %c0_166 = arith.constant 0 : index
    %115 = vector.load %arg2[%c2_163, %c2_164, %c0_165, %c0_166] : memref<3x3x4x8xf32, #tpu.memory_space<vmem>>, vector<1x1x4x8xf32>
    %116 = vector.shape_cast %115 : vector<1x1x4x8xf32> to vector<4x8xf32>
    %cst_167 = arith.constant dense<0.000000e+00> : vector<16x8xf32>
    %117 = tpu.matmul %114, %116, %cst_167 {dimension_numbers = #tpu.dot_dimension_numbers<[1], [0], [0], [1], [0, 0, 1, 1], [], []>} : vector<16x4xf32>, vector<4x8xf32>, vector<16x8xf32> -> vector<16x8xf32>
    %118 = arith.addf %112, %117 : vector<16x8xf32>
    %119 = vector.broadcast %0 : vector<1x8xf32> to vector<16x8xf32>
    %120 = arith.addf %118, %119 : vector<16x8xf32>
    %cst_168 = arith.constant 0.000000e+00 : f32
    %121 = vector.broadcast %cst_168 : f32 to vector<16x8xf32>
    %122 = arith.maximumf %120, %121 : vector<16x8xf32>
    %c0_169 = arith.constant 0 : index
    %c0_170 = arith.constant 0 : index
    %123 = vector.load %arg5[%c0_169, %c0_170] : memref<16x8xf32, #tpu.memory_space<vmem>>, vector<16x8xf32>
    tpu.vector_store %arg5[%c0_169, %c0_170], %122 {strides = array<i32>} : memref<16x8xf32, #tpu.memory_space<vmem>>, vector<16x8xf32>,
    %c0_171 = arith.constant 0 : index
    %c0_172 = arith.constant 0 : index
    %124 = tpu.strided_load %arg5[%c0_171, %c0_172] {strides = array<i32: 2, 1>} : memref<16x8xf32, #tpu.memory_space<vmem>>, vector<8x8xf32>
    %c1_173 = arith.constant 1 : index
    %c0_174 = arith.constant 0 : index
    %125 = tpu.strided_load %arg5[%c1_173, %c0_174] {strides = array<i32: 2, 1>} : memref<16x8xf32, #tpu.memory_space<vmem>>, vector<8x8xf32>
    %126 = arith.maximumf %124, %125 : vector<8x8xf32>
    %127 = arith.maximumf %63, %126 : vector<8x8xf32>
    %c0_175 = arith.constant 0 : index
    %c0_176 = arith.constant 0 : index
    %c0_177 = arith.constant 0 : index
    %c0_178 = arith.constant 0 : index
    %128 = vector.load %arg4[%c0_175, %c0_176, %c0_177, %c0_178] : memref<1x8x8x8xf32, #tpu.memory_space<vmem>>, vector<1x1x8x8xf32>
    %129 = vector.shape_cast %128 : vector<1x1x8x8xf32> to vector<8x8xf32>
    %130 = vector.shape_cast %127 : vector<8x8xf32> to vector<1x1x8x8xf32>
    tpu.vector_store %arg4[%c0_175, %c0_176, %c0_177, %c0_178], %130 {strides = array<i32>} : memref<1x8x8x8xf32, #tpu.memory_space<vmem>>, vector<1x1x8x8xf32>,
    %cst_179 = arith.constant 0.000000e+00 : f32
    %131 = vector.broadcast %cst_179 : f32 to vector<16x8xf32>
    %c0_180 = arith.constant 0 : index
    %c2_181 = arith.constant 2 : index
    %c0_182 = arith.constant 0 : index
    %c0_183 = arith.constant 0 : index
    %132 = vector.load %arg1[%c0_180, %c2_181, %c0_182, %c0_183] : memref<1x18x18x4xf32, #tpu.memory_space<vmem>>, vector<1x1x16x4xf32>
    %133 = vector.shape_cast %132 : vector<1x1x16x4xf32> to vector<16x4xf32>
    %c0_184 = arith.constant 0 : index
    %c0_185 = arith.constant 0 : index
    %c0_186 = arith.constant 0 : index
    %c0_187 = arith.constant 0 : index
    %134 = vector.load %arg2[%c0_184, %c0_185, %c0_186, %c0_187] : memref<3x3x4x8xf32, #tpu.memory_space<vmem>>, vector<1x1x4x8xf32>
    %135 = vector.shape_cast %134 : vector<1x1x4x8xf32> to vector<4x8xf32>
    %cst_188 = arith.constant dense<0.000000e+00> : vector<16x8xf32>
    %136 = tpu.matmul %133, %135, %cst_188 {dimension_numbers = #tpu.dot_dimension_numbers<[1], [0], [0], [1], [0, 0, 1, 1], [], []>} : vector<16x4xf32>, vector<4x8xf32>, vector<16x8xf32> -> vector<16x8xf32>
    %137 = arith.addf %131, %136 : vector<16x8xf32>
    %c0_189 = arith.constant 0 : index
    %c2_190 = arith.constant 2 : index
    %c1_191 = arith.constant 1 : index
    %c0_192 = arith.constant 0 : index
    %138 = vector.load %arg1[%c0_189, %c2_190, %c1_191, %c0_192] : memref<1x18x18x4xf32, #tpu.memory_space<vmem>>, vector<1x1x16x4xf32>
    %139 = vector.shape_cast %138 : vector<1x1x16x4xf32> to vector<16x4xf32>
    %c0_193 = arith.constant 0 : index
    %c1_194 = arith.constant 1 : index
    %c0_195 = arith.constant 0 : index
    %c0_196 = arith.constant 0 : index
    %140 = vector.load %arg2[%c0_193, %c1_194, %c0_195, %c0_196] : memref<3x3x4x8xf32, #tpu.memory_space<vmem>>, vector<1x1x4x8xf32>
    %141 = vector.shape_cast %140 : vector<1x1x4x8xf32> to vector<4x8xf32>
    %cst_197 = arith.constant dense<0.000000e+00> : vector<16x8xf32>
    %142 = tpu.matmul %139, %141, %cst_197 {dimension_numbers = #tpu.dot_dimension_numbers<[1], [0], [0], [1], [0, 0, 1, 1], [], []>} : vector<16x4xf32>, vector<4x8xf32>, vector<16x8xf32> -> vector<16x8xf32>
    %143 = arith.addf %137, %142 : vector<16x8xf32>
    %c0_198 = arith.constant 0 : index
    %c2_199 = arith.constant 2 : index
    %c2_200 = arith.constant 2 : index
    %c0_201 = arith.constant 0 : index
    %144 = vector.load %arg1[%c0_198, %c2_199, %c2_200, %c0_201] : memref<1x18x18x4xf32, #tpu.memory_space<vmem>>, vector<1x1x16x4xf32>
    %145 = vector.shape_cast %144 : vector<1x1x16x4xf32> to vector<16x4xf32>
    %c0_202 = arith.constant 0 : index
    %c2_203 = arith.constant 2 : index
    %c0_204 = arith.constant 0 : index
    %c0_205 = arith.constant 0 : index
    %146 = vector.load %arg2[%c0_202, %c2_203, %c0_204, %c0_205] : memref<3x3x4x8xf32, #tpu.memory_space<vmem>>, vector<1x1x4x8xf32>
    %147 = vector.shape_cast %146 : vector<1x1x4x8xf32> to vector<4x8xf32>
    %cst_206 = arith.constant dense<0.000000e+00> : vector<16x8xf32>
    %148 = tpu.matmul %145, %147, %cst_206 {dimension_numbers = #tpu.dot_dimension_numbers<[1], [0], [0], [1], [0, 0, 1, 1], [], []>} : vector<16x4xf32>, vector<4x8xf32>, vector<16x8xf32> -> vector<16x8xf32>
    %149 = arith.addf %143, %148 : vector<16x8xf32>
    %c0_207 = arith.constant 0 : index
    %c3_208 = arith.constant 3 : index
    %c0_209 = arith.constant 0 : index
    %c0_210 = arith.constant 0 : index
    %150 = vector.load %arg1[%c0_207, %c3_208, %c0_209, %c0_210] : memref<1x18x18x4xf32, #tpu.memory_space<vmem>>, vector<1x1x16x4xf32>
    %151 = vector.shape_cast %150 : vector<1x1x16x4xf32> to vector<16x4xf32>
    %c1_211 = arith.constant 1 : index
    %c0_212 = arith.constant 0 : index
    %c0_213 = arith.constant 0 : index
    %c0_214 = arith.constant 0 : index
    %152 = vector.load %arg2[%c1_211, %c0_212, %c0_213, %c0_214] : memref<3x3x4x8xf32, #tpu.memory_space<vmem>>, vector<1x1x4x8xf32>
    %153 = vector.shape_cast %152 : vector<1x1x4x8xf32> to vector<4x8xf32>
    %cst_215 = arith.constant dense<0.000000e+00> : vector<16x8xf32>
    %154 = tpu.matmul %151, %153, %cst_215 {dimension_numbers = #tpu.dot_dimension_numbers<[1], [0], [0], [1], [0, 0, 1, 1], [], []>} : vector<16x4xf32>, vector<4x8xf32>, vector<16x8xf32> -> vector<16x8xf32>
    %155 = arith.addf %149, %154 : vector<16x8xf32>
    %c0_216 = arith.constant 0 : index
    %c3_217 = arith.constant 3 : index
    %c1_218 = arith.constant 1 : index
    %c0_219 = arith.constant 0 : index
    %156 = vector.load %arg1[%c0_216, %c3_217, %c1_218, %c0_219] : memref<1x18x18x4xf32, #tpu.memory_space<vmem>>, vector<1x1x16x4xf32>
    %157 = vector.shape_cast %156 : vector<1x1x16x4xf32> to vector<16x4xf32>
    %c1_220 = arith.constant 1 : index
    %c1_221 = arith.constant 1 : index
    %c0_222 = arith.constant 0 : index
    %c0_223 = arith.constant 0 : index
    %158 = vector.load %arg2[%c1_220, %c1_221, %c0_222, %c0_223] : memref<3x3x4x8xf32, #tpu.memory_space<vmem>>, vector<1x1x4x8xf32>
    %159 = vector.shape_cast %158 : vector<1x1x4x8xf32> to vector<4x8xf32>
    %cst_224 = arith.constant dense<0.000000e+00> : vector<16x8xf32>
    %160 = tpu.matmul %157, %159, %cst_224 {dimension_numbers = #tpu.dot_dimension_numbers<[1], [0], [0], [1], [0, 0, 1, 1], [], []>} : vector<16x4xf32>, vector<4x8xf32>, vector<16x8xf32> -> vector<16x8xf32>
    %161 = arith.addf %155, %160 : vector<16x8xf32>
    %c0_225 = arith.constant 0 : index
    %c3_226 = arith.constant 3 : index
    %c2_227 = arith.constant 2 : index
    %c0_228 = arith.constant 0 : index
    %162 = vector.load %arg1[%c0_225, %c3_226, %c2_227, %c0_228] : memref<1x18x18x4xf32, #tpu.memory_space<vmem>>, vector<1x1x16x4xf32>
    %163 = vector.shape_cast %162 : vector<1x1x16x4xf32> to vector<16x4xf32>
    %c1_229 = arith.constant 1 : index
    %c2_230 = arith.constant 2 : index
    %c0_231 = arith.constant 0 : index
    %c0_232 = arith.constant 0 : index
    %164 = vector.load %arg2[%c1_229, %c2_230, %c0_231, %c0_232] : memref<3x3x4x8xf32, #tpu.memory_space<vmem>>, vector<1x1x4x8xf32>
    %165 = vector.shape_cast %164 : vector<1x1x4x8xf32> to vector<4x8xf32>
    %cst_233 = arith.constant dense<0.000000e+00> : vector<16x8xf32>
    %166 = tpu.matmul %163, %165, %cst_233 {dimension_numbers = #tpu.dot_dimension_numbers<[1], [0], [0], [1], [0, 0, 1, 1], [], []>} : vector<16x4xf32>, vector<4x8xf32>, vector<16x8xf32> -> vector<16x8xf32>
    %167 = arith.addf %161, %166 : vector<16x8xf32>
    %c0_234 = arith.constant 0 : index
    %c4 = arith.constant 4 : index
    %c0_235 = arith.constant 0 : index
    %c0_236 = arith.constant 0 : index
    %168 = vector.load %arg1[%c0_234, %c4, %c0_235, %c0_236] : memref<1x18x18x4xf32, #tpu.memory_space<vmem>>, vector<1x1x16x4xf32>
    %169 = vector.shape_cast %168 : vector<1x1x16x4xf32> to vector<16x4xf32>
    %c2_237 = arith.constant 2 : index
    %c0_238 = arith.constant 0 : index
    %c0_239 = arith.constant 0 : index
    %c0_240 = arith.constant 0 : index
    %170 = vector.load %arg2[%c2_237, %c0_238, %c0_239, %c0_240] : memref<3x3x4x8xf32, #tpu.memory_space<vmem>>, vector<1x1x4x8xf32>
    %171 = vector.shape_cast %170 : vector<1x1x4x8xf32> to vector<4x8xf32>
    %cst_241 = arith.constant dense<0.000000e+00> : vector<16x8xf32>
    %172 = tpu.matmul %169, %171, %cst_241 {dimension_numbers = #tpu.dot_dimension_numbers<[1], [0], [0], [1], [0, 0, 1, 1], [], []>} : vector<16x4xf32>, vector<4x8xf32>, vector<16x8xf32> -> vector<16x8xf32>
    %173 = arith.addf %167, %172 : vector<16x8xf32>
    %c0_242 = arith.constant 0 : index
    %c4_243 = arith.constant 4 : index
    %c1_244 = arith.constant 1 : index
    %c0_245 = arith.constant 0 : index
    %174 = vector.load %arg1[%c0_242, %c4_243, %c1_244, %c0_245] : memref<1x18x18x4xf32, #tpu.memory_space<vmem>>, vector<1x1x16x4xf32>
    %175 = vector.shape_cast %174 : vector<1x1x16x4xf32> to vector<16x4xf32>
    %c2_246 = arith.constant 2 : index
    %c1_247 = arith.constant 1 : index
    %c0_248 = arith.constant 0 : index
    %c0_249 = arith.constant 0 : index
    %176 = vector.load %arg2[%c2_246, %c1_247, %c0_248, %c0_249] : memref<3x3x4x8xf32, #tpu.memory_space<vmem>>, vector<1x1x4x8xf32>
    %177 = vector.shape_cast %176 : vector<1x1x4x8xf32> to vector<4x8xf32>
    %cst_250 = arith.constant dense<0.000000e+00> : vector<16x8xf32>
    %178 = tpu.matmul %175, %177, %cst_250 {dimension_numbers = #tpu.dot_dimension_numbers<[1], [0], [0], [1], [0, 0, 1, 1], [], []>} : vector<16x4xf32>, vector<4x8xf32>, vector<16x8xf32> -> vector<16x8xf32>
    %179 = arith.addf %173, %178 : vector<16x8xf32>
    %c0_251 = arith.constant 0 : index
    %c4_252 = arith.constant 4 : index
    %c2_253 = arith.constant 2 : index
    %c0_254 = arith.constant 0 : index
    %180 = vector.load %arg1[%c0_251, %c4_252, %c2_253, %c0_254] : memref<1x18x18x4xf32, #tpu.memory_space<vmem>>, vector<1x1x16x4xf32>
    %181 = vector.shape_cast %180 : vector<1x1x16x4xf32> to vector<16x4xf32>
    %c2_255 = arith.constant 2 : index
    %c2_256 = arith.constant 2 : index
    %c0_257 = arith.constant 0 : index
    %c0_258 = arith.constant 0 : index
    %182 = vector.load %arg2[%c2_255, %c2_256, %c0_257, %c0_258] : memref<3x3x4x8xf32, #tpu.memory_space<vmem>>, vector<1x1x4x8xf32>
    %183 = vector.shape_cast %182 : vector<1x1x4x8xf32> to vector<4x8xf32>
    %cst_259 = arith.constant dense<0.000000e+00> : vector<16x8xf32>
    %184 = tpu.matmul %181, %183, %cst_259 {dimension_numbers = #tpu.dot_dimension_numbers<[1], [0], [0], [1], [0, 0, 1, 1], [], []>} : vector<16x4xf32>, vector<4x8xf32>, vector<16x8xf32> -> vector<16x8xf32>
    %185 = arith.addf %179, %184 : vector<16x8xf32>
    %186 = vector.broadcast %0 : vector<1x8xf32> to vector<16x8xf32>
    %187 = arith.addf %185, %186 : vector<16x8xf32>
    %cst_260 = arith.constant 0.000000e+00 : f32
    %188 = vector.broadcast %cst_260 : f32 to vector<16x8xf32>
    %189 = arith.maximumf %187, %188 : vector<16x8xf32>
    %c0_261 = arith.constant 0 : index
    %c0_262 = arith.constant 0 : index
    %190 = vector.load %arg5[%c0_261, %c0_262] : memref<16x8xf32, #tpu.memory_space<vmem>>, vector<16x8xf32>
    tpu.vector_store %arg5[%c0_261, %c0_262], %189 {strides = array<i32>} : memref<16x8xf32, #tpu.memory_space<vmem>>, vector<16x8xf32>,
    %c0_263 = arith.constant 0 : index
    %c0_264 = arith.constant 0 : index
    %191 = tpu.strided_load %arg5[%c0_263, %c0_264] {strides = array<i32: 2, 1>} : memref<16x8xf32, #tpu.memory_space<vmem>>, vector<8x8xf32>
    %c1_265 = arith.constant 1 : index
    %c0_266 = arith.constant 0 : index
    %192 = tpu.strided_load %arg5[%c1_265, %c0_266] {strides = array<i32: 2, 1>} : memref<16x8xf32, #tpu.memory_space<vmem>>, vector<8x8xf32>
    %193 = arith.maximumf %191, %192 : vector<8x8xf32>
    %cst_267 = arith.constant 0.000000e+00 : f32
    %194 = vector.broadcast %cst_267 : f32 to vector<16x8xf32>
    %c0_268 = arith.constant 0 : index
    %c3_269 = arith.constant 3 : index
    %c0_270 = arith.constant 0 : index
    %c0_271 = arith.constant 0 : index
    %195 = vector.load %arg1[%c0_268, %c3_269, %c0_270, %c0_271] : memref<1x18x18x4xf32, #tpu.memory_space<vmem>>, vector<1x1x16x4xf32>
    %196 = vector.shape_cast %195 : vector<1x1x16x4xf32> to vector<16x4xf32>
    %c0_272 = arith.constant 0 : index
    %c0_273 = arith.constant 0 : index
    %c0_274 = arith.constant 0 : index
    %c0_275 = arith.constant 0 : index
    %197 = vector.load %arg2[%c0_272, %c0_273, %c0_274, %c0_275] : memref<3x3x4x8xf32, #tpu.memory_space<vmem>>, vector<1x1x4x8xf32>
    %198 = vector.shape_cast %197 : vector<1x1x4x8xf32> to vector<4x8xf32>
    %cst_276 = arith.constant dense<0.000000e+00> : vector<16x8xf32>
    %199 = tpu.matmul %196, %198, %cst_276 {dimension_numbers = #tpu.dot_dimension_numbers<[1], [0], [0], [1], [0, 0, 1, 1], [], []>} : vector<16x4xf32>, vector<4x8xf32>, vector<16x8xf32> -> vector<16x8xf32>
    %200 = arith.addf %194, %199 : vector<16x8xf32>
    %c0_277 = arith.constant 0 : index
    %c3_278 = arith.constant 3 : index
    %c1_279 = arith.constant 1 : index
    %c0_280 = arith.constant 0 : index
    %201 = vector.load %arg1[%c0_277, %c3_278, %c1_279, %c0_280] : memref<1x18x18x4xf32, #tpu.memory_space<vmem>>, vector<1x1x16x4xf32>
    %202 = vector.shape_cast %201 : vector<1x1x16x4xf32> to vector<16x4xf32>
    %c0_281 = arith.constant 0 : index
    %c1_282 = arith.constant 1 : index
    %c0_283 = arith.constant 0 : index
    %c0_284 = arith.constant 0 : index
    %203 = vector.load %arg2[%c0_281, %c1_282, %c0_283, %c0_284] : memref<3x3x4x8xf32, #tpu.memory_space<vmem>>, vector<1x1x4x8xf32>
    %204 = vector.shape_cast %203 : vector<1x1x4x8xf32> to vector<4x8xf32>
    %cst_285 = arith.constant dense<0.000000e+00> : vector<16x8xf32>
    %205 = tpu.matmul %202, %204, %cst_285 {dimension_numbers = #tpu.dot_dimension_numbers<[1], [0], [0], [1], [0, 0, 1, 1], [], []>} : vector<16x4xf32>, vector<4x8xf32>, vector<16x8xf32> -> vector<16x8xf32>
    %206 = arith.addf %200, %205 : vector<16x8xf32>
    %c0_286 = arith.constant 0 : index
    %c3_287 = arith.constant 3 : index
    %c2_288 = arith.constant 2 : index
    %c0_289 = arith.constant 0 : index
    %207 = vector.load %arg1[%c0_286, %c3_287, %c2_288, %c0_289] : memref<1x18x18x4xf32, #tpu.memory_space<vmem>>, vector<1x1x16x4xf32>
    %208 = vector.shape_cast %207 : vector<1x1x16x4xf32> to vector<16x4xf32>
    %c0_290 = arith.constant 0 : index
    %c2_291 = arith.constant 2 : index
    %c0_292 = arith.constant 0 : index
    %c0_293 = arith.constant 0 : index
    %209 = vector.load %arg2[%c0_290, %c2_291, %c0_292, %c0_293] : memref<3x3x4x8xf32, #tpu.memory_space<vmem>>, vector<1x1x4x8xf32>
    %210 = vector.shape_cast %209 : vector<1x1x4x8xf32> to vector<4x8xf32>
    %cst_294 = arith.constant dense<0.000000e+00> : vector<16x8xf32>
    %211 = tpu.matmul %208, %210, %cst_294 {dimension_numbers = #tpu.dot_dimension_numbers<[1], [0], [0], [1], [0, 0, 1, 1], [], []>} : vector<16x4xf32>, vector<4x8xf32>, vector<16x8xf32> -> vector<16x8xf32>
    %212 = arith.addf %206, %211 : vector<16x8xf32>
    %c0_295 = arith.constant 0 : index
    %c4_296 = arith.constant 4 : index
    %c0_297 = arith.constant 0 : index
    %c0_298 = arith.constant 0 : index
    %213 = vector.load %arg1[%c0_295, %c4_296, %c0_297, %c0_298] : memref<1x18x18x4xf32, #tpu.memory_space<vmem>>, vector<1x1x16x4xf32>
    %214 = vector.shape_cast %213 : vector<1x1x16x4xf32> to vector<16x4xf32>
    %c1_299 = arith.constant 1 : index
    %c0_300 = arith.constant 0 : index
    %c0_301 = arith.constant 0 : index
    %c0_302 = arith.constant 0 : index
    %215 = vector.load %arg2[%c1_299, %c0_300, %c0_301, %c0_302] : memref<3x3x4x8xf32, #tpu.memory_space<vmem>>, vector<1x1x4x8xf32>
    %216 = vector.shape_cast %215 : vector<1x1x4x8xf32> to vector<4x8xf32>
    %cst_303 = arith.constant dense<0.000000e+00> : vector<16x8xf32>
    %217 = tpu.matmul %214, %216, %cst_303 {dimension_numbers = #tpu.dot_dimension_numbers<[1], [0], [0], [1], [0, 0, 1, 1], [], []>} : vector<16x4xf32>, vector<4x8xf32>, vector<16x8xf32> -> vector<16x8xf32>
    %218 = arith.addf %212, %217 : vector<16x8xf32>
    %c0_304 = arith.constant 0 : index
    %c4_305 = arith.constant 4 : index
    %c1_306 = arith.constant 1 : index
    %c0_307 = arith.constant 0 : index
    %219 = vector.load %arg1[%c0_304, %c4_305, %c1_306, %c0_307] : memref<1x18x18x4xf32, #tpu.memory_space<vmem>>, vector<1x1x16x4xf32>
    %220 = vector.shape_cast %219 : vector<1x1x16x4xf32> to vector<16x4xf32>
    %c1_308 = arith.constant 1 : index
    %c1_309 = arith.constant 1 : index
    %c0_310 = arith.constant 0 : index
    %c0_311 = arith.constant 0 : index
    %221 = vector.load %arg2[%c1_308, %c1_309, %c0_310, %c0_311] : memref<3x3x4x8xf32, #tpu.memory_space<vmem>>, vector<1x1x4x8xf32>
    %222 = vector.shape_cast %221 : vector<1x1x4x8xf32> to vector<4x8xf32>
    %cst_312 = arith.constant dense<0.000000e+00> : vector<16x8xf32>
    %223 = tpu.matmul %220, %222, %cst_312 {dimension_numbers = #tpu.dot_dimension_numbers<[1], [0], [0], [1], [0, 0, 1, 1], [], []>} : vector<16x4xf32>, vector<4x8xf32>, vector<16x8xf32> -> vector<16x8xf32>
    %224 = arith.addf %218, %223 : vector<16x8xf32>
    %c0_313 = arith.constant 0 : index
    %c4_314 = arith.constant 4 : index
    %c2_315 = arith.constant 2 : index
    %c0_316 = arith.constant 0 : index
    %225 = vector.load %arg1[%c0_313, %c4_314, %c2_315, %c0_316] : memref<1x18x18x4xf32, #tpu.memory_space<vmem>>, vector<1x1x16x4xf32>
    %226 = vector.shape_cast %225 : vector<1x1x16x4xf32> to vector<16x4xf32>
    %c1_317 = arith.constant 1 : index
    %c2_318 = arith.constant 2 : index
    %c0_319 = arith.constant 0 : index
    %c0_320 = arith.constant 0 : index
    %227 = vector.load %arg2[%c1_317, %c2_318, %c0_319, %c0_320] : memref<3x3x4x8xf32, #tpu.memory_space<vmem>>, vector<1x1x4x8xf32>
    %228 = vector.shape_cast %227 : vector<1x1x4x8xf32> to vector<4x8xf32>
    %cst_321 = arith.constant dense<0.000000e+00> : vector<16x8xf32>
    %229 = tpu.matmul %226, %228, %cst_321 {dimension_numbers = #tpu.dot_dimension_numbers<[1], [0], [0], [1], [0, 0, 1, 1], [], []>} : vector<16x4xf32>, vector<4x8xf32>, vector<16x8xf32> -> vector<16x8xf32>
    %230 = arith.addf %224, %229 : vector<16x8xf32>
    %c0_322 = arith.constant 0 : index
    %c5 = arith.constant 5 : index
    %c0_323 = arith.constant 0 : index
    %c0_324 = arith.constant 0 : index
    %231 = vector.load %arg1[%c0_322, %c5, %c0_323, %c0_324] : memref<1x18x18x4xf32, #tpu.memory_space<vmem>>, vector<1x1x16x4xf32>
    %232 = vector.shape_cast %231 : vector<1x1x16x4xf32> to vector<16x4xf32>
    %c2_325 = arith.constant 2 : index
    %c0_326 = arith.constant 0 : index
    %c0_327 = arith.constant 0 : index
    %c0_328 = arith.constant 0 : index
    %233 = vector.load %arg2[%c2_325, %c0_326, %c0_327, %c0_328] : memref<3x3x4x8xf32, #tpu.memory_space<vmem>>, vector<1x1x4x8xf32>
    %234 = vector.shape_cast %233 : vector<1x1x4x8xf32> to vector<4x8xf32>
    %cst_329 = arith.constant dense<0.000000e+00> : vector<16x8xf32>
    %235 = tpu.matmul %232, %234, %cst_329 {dimension_numbers = #tpu.dot_dimension_numbers<[1], [0], [0], [1], [0, 0, 1, 1], [], []>} : vector<16x4xf32>, vector<4x8xf32>, vector<16x8xf32> -> vector<16x8xf32>
    %236 = arith.addf %230, %235 : vector<16x8xf32>
    %c0_330 = arith.constant 0 : index
    %c5_331 = arith.constant 5 : index
    %c1_332 = arith.constant 1 : index
    %c0_333 = arith.constant 0 : index
    %237 = vector.load %arg1[%c0_330, %c5_331, %c1_332, %c0_333] : memref<1x18x18x4xf32, #tpu.memory_space<vmem>>, vector<1x1x16x4xf32>
    %238 = vector.shape_cast %237 : vector<1x1x16x4xf32> to vector<16x4xf32>
    %c2_334 = arith.constant 2 : index
    %c1_335 = arith.constant 1 : index
    %c0_336 = arith.constant 0 : index
    %c0_337 = arith.constant 0 : index
    %239 = vector.load %arg2[%c2_334, %c1_335, %c0_336, %c0_337] : memref<3x3x4x8xf32, #tpu.memory_space<vmem>>, vector<1x1x4x8xf32>
    %240 = vector.shape_cast %239 : vector<1x1x4x8xf32> to vector<4x8xf32>
    %cst_338 = arith.constant dense<0.000000e+00> : vector<16x8xf32>
    %241 = tpu.matmul %238, %240, %cst_338 {dimension_numbers = #tpu.dot_dimension_numbers<[1], [0], [0], [1], [0, 0, 1, 1], [], []>} : vector<16x4xf32>, vector<4x8xf32>, vector<16x8xf32> -> vector<16x8xf32>
    %242 = arith.addf %236, %241 : vector<16x8xf32>
    %c0_339 = arith.constant 0 : index
    %c5_340 = arith.constant 5 : index
    %c2_341 = arith.constant 2 : index
    %c0_342 = arith.constant 0 : index
    %243 = vector.load %arg1[%c0_339, %c5_340, %c2_341, %c0_342] : memref<1x18x18x4xf32, #tpu.memory_space<vmem>>, vector<1x1x16x4xf32>
    %244 = vector.shape_cast %243 : vector<1x1x16x4xf32> to vector<16x4xf32>
    %c2_343 = arith.constant 2 : index
    %c2_344 = arith.constant 2 : index
    %c0_345 = arith.constant 0 : index
    %c0_346 = arith.constant 0 : index
    %245 = vector.load %arg2[%c2_343, %c2_344, %c0_345, %c0_346] : memref<3x3x4x8xf32, #tpu.memory_space<vmem>>, vector<1x1x4x8xf32>
    %246 = vector.shape_cast %245 : vector<1x1x4x8xf32> to vector<4x8xf32>
    %cst_347 = arith.constant dense<0.000000e+00> : vector<16x8xf32>
    %247 = tpu.matmul %244, %246, %cst_347 {dimension_numbers = #tpu.dot_dimension_numbers<[1], [0], [0], [1], [0, 0, 1, 1], [], []>} : vector<16x4xf32>, vector<4x8xf32>, vector<16x8xf32> -> vector<16x8xf32>
    %248 = arith.addf %242, %247 : vector<16x8xf32>
    %249 = vector.broadcast %0 : vector<1x8xf32> to vector<16x8xf32>
    %250 = arith.addf %248, %249 : vector<16x8xf32>
    %cst_348 = arith.constant 0.000000e+00 : f32
    %251 = vector.broadcast %cst_348 : f32 to vector<16x8xf32>
    %252 = arith.maximumf %250, %251 : vector<16x8xf32>
    %c0_349 = arith.constant 0 : index
    %c0_350 = arith.constant 0 : index
    %253 = vector.load %arg5[%c0_349, %c0_350] : memref<16x8xf32, #tpu.memory_space<vmem>>, vector<16x8xf32>
    tpu.vector_store %arg5[%c0_349, %c0_350], %252 {strides = array<i32>} : memref<16x8xf32, #tpu.memory_space<vmem>>, vector<16x8xf32>,
    %c0_351 = arith.constant 0 : index
    %c0_352 = arith.constant 0 : index
    %254 = tpu.strided_load %arg5[%c0_351, %c0_352] {strides = array<i32: 2, 1>} : memref<16x8xf32, #tpu.memory_space<vmem>>, vector<8x8xf32>
    %c1_353 = arith.constant 1 : index
    %c0_354 = arith.constant 0 : index
    %255 = tpu.strided_load %arg5[%c1_353, %c0_354] {strides = array<i32: 2, 1>} : memref<16x8xf32, #tpu.memory_space<vmem>>, vector<8x8xf32>
    %256 = arith.maximumf %254, %255 : vector<8x8xf32>
    %257 = arith.maximumf %193, %256 : vector<8x8xf32>
    %c0_355 = arith.constant 0 : index
    %c1_356 = arith.constant 1 : index
    %c0_357 = arith.constant 0 : index
    %c0_358 = arith.constant 0 : index
    %258 = vector.load %arg4[%c0_355, %c1_356, %c0_357, %c0_358] : memref<1x8x8x8xf32, #tpu.memory_space<vmem>>, vector<1x1x8x8xf32>
    %259 = vector.shape_cast %258 : vector<1x1x8x8xf32> to vector<8x8xf32>
    %260 = vector.shape_cast %257 : vector<8x8xf32> to vector<1x1x8x8xf32>
    tpu.vector_store %arg4[%c0_355, %c1_356, %c0_357, %c0_358], %260 {strides = array<i32>} : memref<1x8x8x8xf32, #tpu.memory_space<vmem>>, vector<1x1x8x8xf32>,
    %cst_359 = arith.constant 0.000000e+00 : f32
    %261 = vector.broadcast %cst_359 : f32 to vector<16x8xf32>
    %c0_360 = arith.constant 0 : index
    %c4_361 = arith.constant 4 : index
    %c0_362 = arith.constant 0 : index
    %c0_363 = arith.constant 0 : index
    %262 = vector.load %arg1[%c0_360, %c4_361, %c0_362, %c0_363] : memref<1x18x18x4xf32, #tpu.memory_space<vmem>>, vector<1x1x16x4xf32>
    %263 = vector.shape_cast %262 : vector<1x1x16x4xf32> to vector<16x4xf32>
    %c0_364 = arith.constant 0 : index
    %c0_365 = arith.constant 0 : index
    %c0_366 = arith.constant 0 : index
    %c0_367 = arith.constant 0 : index
    %264 = vector.load %arg2[%c0_364, %c0_365, %c0_366, %c0_367] : memref<3x3x4x8xf32, #tpu.memory_space<vmem>>, vector<1x1x4x8xf32>
    %265 = vector.shape_cast %264 : vector<1x1x4x8xf32> to vector<4x8xf32>
    %cst_368 = arith.constant dense<0.000000e+00> : vector<16x8xf32>
    %266 = tpu.matmul %263, %265, %cst_368 {dimension_numbers = #tpu.dot_dimension_numbers<[1], [0], [0], [1], [0, 0, 1, 1], [], []>} : vector<16x4xf32>, vector<4x8xf32>, vector<16x8xf32> -> vector<16x8xf32>
    %267 = arith.addf %261, %266 : vector<16x8xf32>
    %c0_369 = arith.constant 0 : index
    %c4_370 = arith.constant 4 : index
    %c1_371 = arith.constant 1 : index
    %c0_372 = arith.constant 0 : index
    %268 = vector.load %arg1[%c0_369, %c4_370, %c1_371, %c0_372] : memref<1x18x18x4xf32, #tpu.memory_space<vmem>>, vector<1x1x16x4xf32>
    %269 = vector.shape_cast %268 : vector<1x1x16x4xf32> to vector<16x4xf32>
    %c0_373 = arith.constant 0 : index
    %c1_374 = arith.constant 1 : index
    %c0_375 = arith.constant 0 : index
    %c0_376 = arith.constant 0 : index
    %270 = vector.load %arg2[%c0_373, %c1_374, %c0_375, %c0_376] : memref<3x3x4x8xf32, #tpu.memory_space<vmem>>, vector<1x1x4x8xf32>
    %271 = vector.shape_cast %270 : vector<1x1x4x8xf32> to vector<4x8xf32>
    %cst_377 = arith.constant dense<0.000000e+00> : vector<16x8xf32>
    %272 = tpu.matmul %269, %271, %cst_377 {dimension_numbers = #tpu.dot_dimension_numbers<[1], [0], [0], [1], [0, 0, 1, 1], [], []>} : vector<16x4xf32>, vector<4x8xf32>, vector<16x8xf32> -> vector<16x8xf32>
    %273 = arith.addf %267, %272 : vector<16x8xf32>
    %c0_378 = arith.constant 0 : index
    %c4_379 = arith.constant 4 : index
    %c2_380 = arith.constant 2 : index
    %c0_381 = arith.constant 0 : index
    %274 = vector.load %arg1[%c0_378, %c4_379, %c2_380, %c0_381] : memref<1x18x18x4xf32, #tpu.memory_space<vmem>>, vector<1x1x16x4xf32>
    %275 = vector.shape_cast %274 : vector<1x1x16x4xf32> to vector<16x4xf32>
    %c0_382 = arith.constant 0 : index
    %c2_383 = arith.constant 2 : index
    %c0_384 = arith.constant 0 : index
    %c0_385 = arith.constant 0 : index
    %276 = vector.load %arg2[%c0_382, %c2_383, %c0_384, %c0_385] : memref<3x3x4x8xf32, #tpu.memory_space<vmem>>, vector<1x1x4x8xf32>
    %277 = vector.shape_cast %276 : vector<1x1x4x8xf32> to vector<4x8xf32>
    %cst_386 = arith.constant dense<0.000000e+00> : vector<16x8xf32>
    %278 = tpu.matmul %275, %277, %cst_386 {dimension_numbers = #tpu.dot_dimension_numbers<[1], [0], [0], [1], [0, 0, 1, 1], [], []>} : vector<16x4xf32>, vector<4x8xf32>, vector<16x8xf32> -> vector<16x8xf32>
    %279 = arith.addf %273, %278 : vector<16x8xf32>
    %c0_387 = arith.constant 0 : index
    %c5_388 = arith.constant 5 : index
    %c0_389 = arith.constant 0 : index
    %c0_390 = arith.constant 0 : index
    %280 = vector.load %arg1[%c0_387, %c5_388, %c0_389, %c0_390] : memref<1x18x18x4xf32, #tpu.memory_space<vmem>>, vector<1x1x16x4xf32>
    %281 = vector.shape_cast %280 : vector<1x1x16x4xf32> to vector<16x4xf32>
    %c1_391 = arith.constant 1 : index
    %c0_392 = arith.constant 0 : index
    %c0_393 = arith.constant 0 : index
    %c0_394 = arith.constant 0 : index
    %282 = vector.load %arg2[%c1_391, %c0_392, %c0_393, %c0_394] : memref<3x3x4x8xf32, #tpu.memory_space<vmem>>, vector<1x1x4x8xf32>
    %283 = vector.shape_cast %282 : vector<1x1x4x8xf32> to vector<4x8xf32>
    %cst_395 = arith.constant dense<0.000000e+00> : vector<16x8xf32>
    %284 = tpu.matmul %281, %283, %cst_395 {dimension_numbers = #tpu.dot_dimension_numbers<[1], [0], [0], [1], [0, 0, 1, 1], [], []>} : vector<16x4xf32>, vector<4x8xf32>, vector<16x8xf32> -> vector<16x8xf32>
    %285 = arith.addf %279, %284 : vector<16x8xf32>
    %c0_396 = arith.constant 0 : index
    %c5_397 = arith.constant 5 : index
    %c1_398 = arith.constant 1 : index
    %c0_399 = arith.constant 0 : index
    %286 = vector.load %arg1[%c0_396, %c5_397, %c1_398, %c0_399] : memref<1x18x18x4xf32, #tpu.memory_space<vmem>>, vector<1x1x16x4xf32>
    %287 = vector.shape_cast %286 : vector<1x1x16x4xf32> to vector<16x4xf32>
    %c1_400 = arith.constant 1 : index
    %c1_401 = arith.constant 1 : index
    %c0_402 = arith.constant 0 : index
    %c0_403 = arith.constant 0 : index
    %288 = vector.load %arg2[%c1_400, %c1_401, %c0_402, %c0_403] : memref<3x3x4x8xf32, #tpu.memory_space<vmem>>, vector<1x1x4x8xf32>
    %289 = vector.shape_cast %288 : vector<1x1x4x8xf32> to vector<4x8xf32>
    %cst_404 = arith.constant dense<0.000000e+00> : vector<16x8xf32>
    %290 = tpu.matmul %287, %289, %cst_404 {dimension_numbers = #tpu.dot_dimension_numbers<[1], [0], [0], [1], [0, 0, 1, 1], [], []>} : vector<16x4xf32>, vector<4x8xf32>, vector<16x8xf32> -> vector<16x8xf32>
    %291 = arith.addf %285, %290 : vector<16x8xf32>
    %c0_405 = arith.constant 0 : index
    %c5_406 = arith.constant 5 : index
    %c2_407 = arith.constant 2 : index
    %c0_408 = arith.constant 0 : index
    %292 = vector.load %arg1[%c0_405, %c5_406, %c2_407, %c0_408] : memref<1x18x18x4xf32, #tpu.memory_space<vmem>>, vector<1x1x16x4xf32>
    %293 = vector.shape_cast %292 : vector<1x1x16x4xf32> to vector<16x4xf32>
    %c1_409 = arith.constant 1 : index
    %c2_410 = arith.constant 2 : index
    %c0_411 = arith.constant 0 : index
    %c0_412 = arith.constant 0 : index
    %294 = vector.load %arg2[%c1_409, %c2_410, %c0_411, %c0_412] : memref<3x3x4x8xf32, #tpu.memory_space<vmem>>, vector<1x1x4x8xf32>
    %295 = vector.shape_cast %294 : vector<1x1x4x8xf32> to vector<4x8xf32>
    %cst_413 = arith.constant dense<0.000000e+00> : vector<16x8xf32>
    %296 = tpu.matmul %293, %295, %cst_413 {dimension_numbers = #tpu.dot_dimension_numbers<[1], [0], [0], [1], [0, 0, 1, 1], [], []>} : vector<16x4xf32>, vector<4x8xf32>, vector<16x8xf32> -> vector<16x8xf32>
    %297 = arith.addf %291, %296 : vector<16x8xf32>
    %c0_414 = arith.constant 0 : index
    %c6 = arith.constant 6 : index
    %c0_415 = arith.constant 0 : index
    %c0_416 = arith.constant 0 : index
    %298 = vector.load %arg1[%c0_414, %c6, %c0_415, %c0_416] : memref<1x18x18x4xf32, #tpu.memory_space<vmem>>, vector<1x1x16x4xf32>
    %299 = vector.shape_cast %298 : vector<1x1x16x4xf32> to vector<16x4xf32>
    %c2_417 = arith.constant 2 : index
    %c0_418 = arith.constant 0 : index
    %c0_419 = arith.constant 0 : index
    %c0_420 = arith.constant 0 : index
    %300 = vector.load %arg2[%c2_417, %c0_418, %c0_419, %c0_420] : memref<3x3x4x8xf32, #tpu.memory_space<vmem>>, vector<1x1x4x8xf32>
    %301 = vector.shape_cast %300 : vector<1x1x4x8xf32> to vector<4x8xf32>
    %cst_421 = arith.constant dense<0.000000e+00> : vector<16x8xf32>
    %302 = tpu.matmul %299, %301, %cst_421 {dimension_numbers = #tpu.dot_dimension_numbers<[1], [0], [0], [1], [0, 0, 1, 1], [], []>} : vector<16x4xf32>, vector<4x8xf32>, vector<16x8xf32> -> vector<16x8xf32>
    %303 = arith.addf %297, %302 : vector<16x8xf32>
    %c0_422 = arith.constant 0 : index
    %c6_423 = arith.constant 6 : index
    %c1_424 = arith.constant 1 : index
    %c0_425 = arith.constant 0 : index
    %304 = vector.load %arg1[%c0_422, %c6_423, %c1_424, %c0_425] : memref<1x18x18x4xf32, #tpu.memory_space<vmem>>, vector<1x1x16x4xf32>
    %305 = vector.shape_cast %304 : vector<1x1x16x4xf32> to vector<16x4xf32>
    %c2_426 = arith.constant 2 : index
    %c1_427 = arith.constant 1 : index
    %c0_428 = arith.constant 0 : index
    %c0_429 = arith.constant 0 : index
    %306 = vector.load %arg2[%c2_426, %c1_427, %c0_428, %c0_429] : memref<3x3x4x8xf32, #tpu.memory_space<vmem>>, vector<1x1x4x8xf32>
    %307 = vector.shape_cast %306 : vector<1x1x4x8xf32> to vector<4x8xf32>
    %cst_430 = arith.constant dense<0.000000e+00> : vector<16x8xf32>
    %308 = tpu.matmul %305, %307, %cst_430 {dimension_numbers = #tpu.dot_dimension_numbers<[1], [0], [0], [1], [0, 0, 1, 1], [], []>} : vector<16x4xf32>, vector<4x8xf32>, vector<16x8xf32> -> vector<16x8xf32>
    %309 = arith.addf %303, %308 : vector<16x8xf32>
    %c0_431 = arith.constant 0 : index
    %c6_432 = arith.constant 6 : index
    %c2_433 = arith.constant 2 : index
    %c0_434 = arith.constant 0 : index
    %310 = vector.load %arg1[%c0_431, %c6_432, %c2_433, %c0_434] : memref<1x18x18x4xf32, #tpu.memory_space<vmem>>, vector<1x1x16x4xf32>
    %311 = vector.shape_cast %310 : vector<1x1x16x4xf32> to vector<16x4xf32>
    %c2_435 = arith.constant 2 : index
    %c2_436 = arith.constant 2 : index
    %c0_437 = arith.constant 0 : index
    %c0_438 = arith.constant 0 : index
    %312 = vector.load %arg2[%c2_435, %c2_436, %c0_437, %c0_438] : memref<3x3x4x8xf32, #tpu.memory_space<vmem>>, vector<1x1x4x8xf32>
    %313 = vector.shape_cast %312 : vector<1x1x4x8xf32> to vector<4x8xf32>
    %cst_439 = arith.constant dense<0.000000e+00> : vector<16x8xf32>
    %314 = tpu.matmul %311, %313, %cst_439 {dimension_numbers = #tpu.dot_dimension_numbers<[1], [0], [0], [1], [0, 0, 1, 1], [], []>} : vector<16x4xf32>, vector<4x8xf32>, vector<16x8xf32> -> vector<16x8xf32>
    %315 = arith.addf %309, %314 : vector<16x8xf32>
    %316 = vector.broadcast %0 : vector<1x8xf32> to vector<16x8xf32>
    %317 = arith.addf %315, %316 : vector<16x8xf32>
    %cst_440 = arith.constant 0.000000e+00 : f32
    %318 = vector.broadcast %cst_440 : f32 to vector<16x8xf32>
    %319 = arith.maximumf %317, %318 : vector<16x8xf32>
    %c0_441 = arith.constant 0 : index
    %c0_442 = arith.constant 0 : index
    %320 = vector.load %arg5[%c0_441, %c0_442] : memref<16x8xf32, #tpu.memory_space<vmem>>, vector<16x8xf32>
    tpu.vector_store %arg5[%c0_441, %c0_442], %319 {strides = array<i32>} : memref<16x8xf32, #tpu.memory_space<vmem>>, vector<16x8xf32>,
    %c0_443 = arith.constant 0 : index
    %c0_444 = arith.constant 0 : index
    %321 = tpu.strided_load %arg5[%c0_443, %c0_444] {strides = array<i32: 2, 1>} : memref<16x8xf32, #tpu.memory_space<vmem>>, vector<8x8xf32>
    %c1_445 = arith.constant 1 : index
    %c0_446 = arith.constant 0 : index
    %322 = tpu.strided_load %arg5[%c1_445, %c0_446] {strides = array<i32: 2, 1>} : memref<16x8xf32, #tpu.memory_space<vmem>>, vector<8x8xf32>
    %323 = arith.maximumf %321, %322 : vector<8x8xf32>
    %cst_447 = arith.constant 0.000000e+00 : f32
    %324 = vector.broadcast %cst_447 : f32 to vector<16x8xf32>
    %c0_448 = arith.constant 0 : index
    %c5_449 = arith.constant 5 : index
    %c0_450 = arith.constant 0 : index
    %c0_451 = arith.constant 0 : index
    %325 = vector.load %arg1[%c0_448, %c5_449, %c0_450, %c0_451] : memref<1x18x18x4xf32, #tpu.memory_space<vmem>>, vector<1x1x16x4xf32>
    %326 = vector.shape_cast %325 : vector<1x1x16x4xf32> to vector<16x4xf32>
    %c0_452 = arith.constant 0 : index
    %c0_453 = arith.constant 0 : index
    %c0_454 = arith.constant 0 : index
    %c0_455 = arith.constant 0 : index
    %327 = vector.load %arg2[%c0_452, %c0_453, %c0_454, %c0_455] : memref<3x3x4x8xf32, #tpu.memory_space<vmem>>, vector<1x1x4x8xf32>
    %328 = vector.shape_cast %327 : vector<1x1x4x8xf32> to vector<4x8xf32>
    %cst_456 = arith.constant dense<0.000000e+00> : vector<16x8xf32>
    %329 = tpu.matmul %326, %328, %cst_456 {dimension_numbers = #tpu.dot_dimension_numbers<[1], [0], [0], [1], [0, 0, 1, 1], [], []>} : vector<16x4xf32>, vector<4x8xf32>, vector<16x8xf32> -> vector<16x8xf32>
    %330 = arith.addf %324, %329 : vector<16x8xf32>
    %c0_457 = arith.constant 0 : index
    %c5_458 = arith.constant 5 : index
    %c1_459 = arith.constant 1 : index
    %c0_460 = arith.constant 0 : index
    %331 = vector.load %arg1[%c0_457, %c5_458, %c1_459, %c0_460] : memref<1x18x18x4xf32, #tpu.memory_space<vmem>>, vector<1x1x16x4xf32>
    %332 = vector.shape_cast %331 : vector<1x1x16x4xf32> to vector<16x4xf32>
    %c0_461 = arith.constant 0 : index
    %c1_462 = arith.constant 1 : index
    %c0_463 = arith.constant 0 : index
    %c0_464 = arith.constant 0 : index
    %333 = vector.load %arg2[%c0_461, %c1_462, %c0_463, %c0_464] : memref<3x3x4x8xf32, #tpu.memory_space<vmem>>, vector<1x1x4x8xf32>
    %334 = vector.shape_cast %333 : vector<1x1x4x8xf32> to vector<4x8xf32>
    %cst_465 = arith.constant dense<0.000000e+00> : vector<16x8xf32>
    %335 = tpu.matmul %332, %334, %cst_465 {dimension_numbers = #tpu.dot_dimension_numbers<[1], [0], [0], [1], [0, 0, 1, 1], [], []>} : vector<16x4xf32>, vector<4x8xf32>, vector<16x8xf32> -> vector<16x8xf32>
    %336 = arith.addf %330, %335 : vector<16x8xf32>
    %c0_466 = arith.constant 0 : index
    %c5_467 = arith.constant 5 : index
    %c2_468 = arith.constant 2 : index
    %c0_469 = arith.constant 0 : index
    %337 = vector.load %arg1[%c0_466, %c5_467, %c2_468, %c0_469] : memref<1x18x18x4xf32, #tpu.memory_space<vmem>>, vector<1x1x16x4xf32>
    %338 = vector.shape_cast %337 : vector<1x1x16x4xf32> to vector<16x4xf32>
    %c0_470 = arith.constant 0 : index
    %c2_471 = arith.constant 2 : index
    %c0_472 = arith.constant 0 : index
    %c0_473 = arith.constant 0 : index
    %339 = vector.load %arg2[%c0_470, %c2_471, %c0_472, %c0_473] : memref<3x3x4x8xf32, #tpu.memory_space<vmem>>, vector<1x1x4x8xf32>
    %340 = vector.shape_cast %339 : vector<1x1x4x8xf32> to vector<4x8xf32>
    %cst_474 = arith.constant dense<0.000000e+00> : vector<16x8xf32>
    %341 = tpu.matmul %338, %340, %cst_474 {dimension_numbers = #tpu.dot_dimension_numbers<[1], [0], [0], [1], [0, 0, 1, 1], [], []>} : vector<16x4xf32>, vector<4x8xf32>, vector<16x8xf32> -> vector<16x8xf32>
    %342 = arith.addf %336, %341 : vector<16x8xf32>
    %c0_475 = arith.constant 0 : index
    %c6_476 = arith.constant 6 : index
    %c0_477 = arith.constant 0 : index
    %c0_478 = arith.constant 0 : index
    %343 = vector.load %arg1[%c0_475, %c6_476, %c0_477, %c0_478] : memref<1x18x18x4xf32, #tpu.memory_space<vmem>>, vector<1x1x16x4xf32>
    %344 = vector.shape_cast %343 : vector<1x1x16x4xf32> to vector<16x4xf32>
    %c1_479 = arith.constant 1 : index
    %c0_480 = arith.constant 0 : index
    %c0_481 = arith.constant 0 : index
    %c0_482 = arith.constant 0 : index
    %345 = vector.load %arg2[%c1_479, %c0_480, %c0_481, %c0_482] : memref<3x3x4x8xf32, #tpu.memory_space<vmem>>, vector<1x1x4x8xf32>
    %346 = vector.shape_cast %345 : vector<1x1x4x8xf32> to vector<4x8xf32>
    %cst_483 = arith.constant dense<0.000000e+00> : vector<16x8xf32>
    %347 = tpu.matmul %344, %346, %cst_483 {dimension_numbers = #tpu.dot_dimension_numbers<[1], [0], [0], [1], [0, 0, 1, 1], [], []>} : vector<16x4xf32>, vector<4x8xf32>, vector<16x8xf32> -> vector<16x8xf32>
    %348 = arith.addf %342, %347 : vector<16x8xf32>
    %c0_484 = arith.constant 0 : index
    %c6_485 = arith.constant 6 : index
    %c1_486 = arith.constant 1 : index
    %c0_487 = arith.constant 0 : index
    %349 = vector.load %arg1[%c0_484, %c6_485, %c1_486, %c0_487] : memref<1x18x18x4xf32, #tpu.memory_space<vmem>>, vector<1x1x16x4xf32>
    %350 = vector.shape_cast %349 : vector<1x1x16x4xf32> to vector<16x4xf32>
    %c1_488 = arith.constant 1 : index
    %c1_489 = arith.constant 1 : index
    %c0_490 = arith.constant 0 : index
    %c0_491 = arith.constant 0 : index
    %351 = vector.load %arg2[%c1_488, %c1_489, %c0_490, %c0_491] : memref<3x3x4x8xf32, #tpu.memory_space<vmem>>, vector<1x1x4x8xf32>
    %352 = vector.shape_cast %351 : vector<1x1x4x8xf32> to vector<4x8xf32>
    %cst_492 = arith.constant dense<0.000000e+00> : vector<16x8xf32>
    %353 = tpu.matmul %350, %352, %cst_492 {dimension_numbers = #tpu.dot_dimension_numbers<[1], [0], [0], [1], [0, 0, 1, 1], [], []>} : vector<16x4xf32>, vector<4x8xf32>, vector<16x8xf32> -> vector<16x8xf32>
    %354 = arith.addf %348, %353 : vector<16x8xf32>
    %c0_493 = arith.constant 0 : index
    %c6_494 = arith.constant 6 : index
    %c2_495 = arith.constant 2 : index
    %c0_496 = arith.constant 0 : index
    %355 = vector.load %arg1[%c0_493, %c6_494, %c2_495, %c0_496] : memref<1x18x18x4xf32, #tpu.memory_space<vmem>>, vector<1x1x16x4xf32>
    %356 = vector.shape_cast %355 : vector<1x1x16x4xf32> to vector<16x4xf32>
    %c1_497 = arith.constant 1 : index
    %c2_498 = arith.constant 2 : index
    %c0_499 = arith.constant 0 : index
    %c0_500 = arith.constant 0 : index
    %357 = vector.load %arg2[%c1_497, %c2_498, %c0_499, %c0_500] : memref<3x3x4x8xf32, #tpu.memory_space<vmem>>, vector<1x1x4x8xf32>
    %358 = vector.shape_cast %357 : vector<1x1x4x8xf32> to vector<4x8xf32>
    %cst_501 = arith.constant dense<0.000000e+00> : vector<16x8xf32>
    %359 = tpu.matmul %356, %358, %cst_501 {dimension_numbers = #tpu.dot_dimension_numbers<[1], [0], [0], [1], [0, 0, 1, 1], [], []>} : vector<16x4xf32>, vector<4x8xf32>, vector<16x8xf32> -> vector<16x8xf32>
    %360 = arith.addf %354, %359 : vector<16x8xf32>
    %c0_502 = arith.constant 0 : index
    %c7 = arith.constant 7 : index
    %c0_503 = arith.constant 0 : index
    %c0_504 = arith.constant 0 : index
    %361 = vector.load %arg1[%c0_502, %c7, %c0_503, %c0_504] : memref<1x18x18x4xf32, #tpu.memory_space<vmem>>, vector<1x1x16x4xf32>
    %362 = vector.shape_cast %361 : vector<1x1x16x4xf32> to vector<16x4xf32>
    %c2_505 = arith.constant 2 : index
    %c0_506 = arith.constant 0 : index
    %c0_507 = arith.constant 0 : index
    %c0_508 = arith.constant 0 : index
    %363 = vector.load %arg2[%c2_505, %c0_506, %c0_507, %c0_508] : memref<3x3x4x8xf32, #tpu.memory_space<vmem>>, vector<1x1x4x8xf32>
    %364 = vector.shape_cast %363 : vector<1x1x4x8xf32> to vector<4x8xf32>
    %cst_509 = arith.constant dense<0.000000e+00> : vector<16x8xf32>
    %365 = tpu.matmul %362, %364, %cst_509 {dimension_numbers = #tpu.dot_dimension_numbers<[1], [0], [0], [1], [0, 0, 1, 1], [], []>} : vector<16x4xf32>, vector<4x8xf32>, vector<16x8xf32> -> vector<16x8xf32>
    %366 = arith.addf %360, %365 : vector<16x8xf32>
    %c0_510 = arith.constant 0 : index
    %c7_511 = arith.constant 7 : index
    %c1_512 = arith.constant 1 : index
    %c0_513 = arith.constant 0 : index
    %367 = vector.load %arg1[%c0_510, %c7_511, %c1_512, %c0_513] : memref<1x18x18x4xf32, #tpu.memory_space<vmem>>, vector<1x1x16x4xf32>
    %368 = vector.shape_cast %367 : vector<1x1x16x4xf32> to vector<16x4xf32>
    %c2_514 = arith.constant 2 : index
    %c1_515 = arith.constant 1 : index
    %c0_516 = arith.constant 0 : index
    %c0_517 = arith.constant 0 : index
    %369 = vector.load %arg2[%c2_514, %c1_515, %c0_516, %c0_517] : memref<3x3x4x8xf32, #tpu.memory_space<vmem>>, vector<1x1x4x8xf32>
    %370 = vector.shape_cast %369 : vector<1x1x4x8xf32> to vector<4x8xf32>
    %cst_518 = arith.constant dense<0.000000e+00> : vector<16x8xf32>
    %371 = tpu.matmul %368, %370, %cst_518 {dimension_numbers = #tpu.dot_dimension_numbers<[1], [0], [0], [1], [0, 0, 1, 1], [], []>} : vector<16x4xf32>, vector<4x8xf32>, vector<16x8xf32> -> vector<16x8xf32>
    %372 = arith.addf %366, %371 : vector<16x8xf32>
    %c0_519 = arith.constant 0 : index
    %c7_520 = arith.constant 7 : index
    %c2_521 = arith.constant 2 : index
    %c0_522 = arith.constant 0 : index
    %373 = vector.load %arg1[%c0_519, %c7_520, %c2_521, %c0_522] : memref<1x18x18x4xf32, #tpu.memory_space<vmem>>, vector<1x1x16x4xf32>
    %374 = vector.shape_cast %373 : vector<1x1x16x4xf32> to vector<16x4xf32>
    %c2_523 = arith.constant 2 : index
    %c2_524 = arith.constant 2 : index
    %c0_525 = arith.constant 0 : index
    %c0_526 = arith.constant 0 : index
    %375 = vector.load %arg2[%c2_523, %c2_524, %c0_525, %c0_526] : memref<3x3x4x8xf32, #tpu.memory_space<vmem>>, vector<1x1x4x8xf32>
    %376 = vector.shape_cast %375 : vector<1x1x4x8xf32> to vector<4x8xf32>
    %cst_527 = arith.constant dense<0.000000e+00> : vector<16x8xf32>
    %377 = tpu.matmul %374, %376, %cst_527 {dimension_numbers = #tpu.dot_dimension_numbers<[1], [0], [0], [1], [0, 0, 1, 1], [], []>} : vector<16x4xf32>, vector<4x8xf32>, vector<16x8xf32> -> vector<16x8xf32>
    %378 = arith.addf %372, %377 : vector<16x8xf32>
    %379 = vector.broadcast %0 : vector<1x8xf32> to vector<16x8xf32>
    %380 = arith.addf %378, %379 : vector<16x8xf32>
    %cst_528 = arith.constant 0.000000e+00 : f32
    %381 = vector.broadcast %cst_528 : f32 to vector<16x8xf32>
    %382 = arith.maximumf %380, %381 : vector<16x8xf32>
    %c0_529 = arith.constant 0 : index
    %c0_530 = arith.constant 0 : index
    %383 = vector.load %arg5[%c0_529, %c0_530] : memref<16x8xf32, #tpu.memory_space<vmem>>, vector<16x8xf32>
    tpu.vector_store %arg5[%c0_529, %c0_530], %382 {strides = array<i32>} : memref<16x8xf32, #tpu.memory_space<vmem>>, vector<16x8xf32>,
    %c0_531 = arith.constant 0 : index
    %c0_532 = arith.constant 0 : index
    %384 = tpu.strided_load %arg5[%c0_531, %c0_532] {strides = array<i32: 2, 1>} : memref<16x8xf32, #tpu.memory_space<vmem>>, vector<8x8xf32>
    %c1_533 = arith.constant 1 : index
    %c0_534 = arith.constant 0 : index
    %385 = tpu.strided_load %arg5[%c1_533, %c0_534] {strides = array<i32: 2, 1>} : memref<16x8xf32, #tpu.memory_space<vmem>>, vector<8x8xf32>
    %386 = arith.maximumf %384, %385 : vector<8x8xf32>
    %387 = arith.maximumf %323, %386 : vector<8x8xf32>
    %c0_535 = arith.constant 0 : index
    %c2_536 = arith.constant 2 : index
    %c0_537 = arith.constant 0 : index
    %c0_538 = arith.constant 0 : index
    %388 = vector.load %arg4[%c0_535, %c2_536, %c0_537, %c0_538] : memref<1x8x8x8xf32, #tpu.memory_space<vmem>>, vector<1x1x8x8xf32>
    %389 = vector.shape_cast %388 : vector<1x1x8x8xf32> to vector<8x8xf32>
    %390 = vector.shape_cast %387 : vector<8x8xf32> to vector<1x1x8x8xf32>
    tpu.vector_store %arg4[%c0_535, %c2_536, %c0_537, %c0_538], %390 {strides = array<i32>} : memref<1x8x8x8xf32, #tpu.memory_space<vmem>>, vector<1x1x8x8xf32>,
    %cst_539 = arith.constant 0.000000e+00 : f32
    %391 = vector.broadcast %cst_539 : f32 to vector<16x8xf32>
    %c0_540 = arith.constant 0 : index
    %c6_541 = arith.constant 6 : index
    %c0_542 = arith.constant 0 : index
    %c0_543 = arith.constant 0 : index
    %392 = vector.load %arg1[%c0_540, %c6_541, %c0_542, %c0_543] : memref<1x18x18x4xf32, #tpu.memory_space<vmem>>, vector<1x1x16x4xf32>
    %393 = vector.shape_cast %392 : vector<1x1x16x4xf32> to vector<16x4xf32>
    %c0_544 = arith.constant 0 : index
    %c0_545 = arith.constant 0 : index
    %c0_546 = arith.constant 0 : index
    %c0_547 = arith.constant 0 : index
    %394 = vector.load %arg2[%c0_544, %c0_545, %c0_546, %c0_547] : memref<3x3x4x8xf32, #tpu.memory_space<vmem>>, vector<1x1x4x8xf32>
    %395 = vector.shape_cast %394 : vector<1x1x4x8xf32> to vector<4x8xf32>
    %cst_548 = arith.constant dense<0.000000e+00> : vector<16x8xf32>
    %396 = tpu.matmul %393, %395, %cst_548 {dimension_numbers = #tpu.dot_dimension_numbers<[1], [0], [0], [1], [0, 0, 1, 1], [], []>} : vector<16x4xf32>, vector<4x8xf32>, vector<16x8xf32> -> vector<16x8xf32>
    %397 = arith.addf %391, %396 : vector<16x8xf32>
    %c0_549 = arith.constant 0 : index
    %c6_550 = arith.constant 6 : index
    %c1_551 = arith.constant 1 : index
    %c0_552 = arith.constant 0 : index
    %398 = vector.load %arg1[%c0_549, %c6_550, %c1_551, %c0_552] : memref<1x18x18x4xf32, #tpu.memory_space<vmem>>, vector<1x1x16x4xf32>
    %399 = vector.shape_cast %398 : vector<1x1x16x4xf32> to vector<16x4xf32>
    %c0_553 = arith.constant 0 : index
    %c1_554 = arith.constant 1 : index
    %c0_555 = arith.constant 0 : index
    %c0_556 = arith.constant 0 : index
    %400 = vector.load %arg2[%c0_553, %c1_554, %c0_555, %c0_556] : memref<3x3x4x8xf32, #tpu.memory_space<vmem>>, vector<1x1x4x8xf32>
    %401 = vector.shape_cast %400 : vector<1x1x4x8xf32> to vector<4x8xf32>
    %cst_557 = arith.constant dense<0.000000e+00> : vector<16x8xf32>
    %402 = tpu.matmul %399, %401, %cst_557 {dimension_numbers = #tpu.dot_dimension_numbers<[1], [0], [0], [1], [0, 0, 1, 1], [], []>} : vector<16x4xf32>, vector<4x8xf32>, vector<16x8xf32> -> vector<16x8xf32>
    %403 = arith.addf %397, %402 : vector<16x8xf32>
    %c0_558 = arith.constant 0 : index
    %c6_559 = arith.constant 6 : index
    %c2_560 = arith.constant 2 : index
    %c0_561 = arith.constant 0 : index
    %404 = vector.load %arg1[%c0_558, %c6_559, %c2_560, %c0_561] : memref<1x18x18x4xf32, #tpu.memory_space<vmem>>, vector<1x1x16x4xf32>
    %405 = vector.shape_cast %404 : vector<1x1x16x4xf32> to vector<16x4xf32>
    %c0_562 = arith.constant 0 : index
    %c2_563 = arith.constant 2 : index
    %c0_564 = arith.constant 0 : index
    %c0_565 = arith.constant 0 : index
    %406 = vector.load %arg2[%c0_562, %c2_563, %c0_564, %c0_565] : memref<3x3x4x8xf32, #tpu.memory_space<vmem>>, vector<1x1x4x8xf32>
    %407 = vector.shape_cast %406 : vector<1x1x4x8xf32> to vector<4x8xf32>
    %cst_566 = arith.constant dense<0.000000e+00> : vector<16x8xf32>
    %408 = tpu.matmul %405, %407, %cst_566 {dimension_numbers = #tpu.dot_dimension_numbers<[1], [0], [0], [1], [0, 0, 1, 1], [], []>} : vector<16x4xf32>, vector<4x8xf32>, vector<16x8xf32> -> vector<16x8xf32>
    %409 = arith.addf %403, %408 : vector<16x8xf32>
    %c0_567 = arith.constant 0 : index
    %c7_568 = arith.constant 7 : index
    %c0_569 = arith.constant 0 : index
    %c0_570 = arith.constant 0 : index
    %410 = vector.load %arg1[%c0_567, %c7_568, %c0_569, %c0_570] : memref<1x18x18x4xf32, #tpu.memory_space<vmem>>, vector<1x1x16x4xf32>
    %411 = vector.shape_cast %410 : vector<1x1x16x4xf32> to vector<16x4xf32>
    %c1_571 = arith.constant 1 : index
    %c0_572 = arith.constant 0 : index
    %c0_573 = arith.constant 0 : index
    %c0_574 = arith.constant 0 : index
    %412 = vector.load %arg2[%c1_571, %c0_572, %c0_573, %c0_574] : memref<3x3x4x8xf32, #tpu.memory_space<vmem>>, vector<1x1x4x8xf32>
    %413 = vector.shape_cast %412 : vector<1x1x4x8xf32> to vector<4x8xf32>
    %cst_575 = arith.constant dense<0.000000e+00> : vector<16x8xf32>
    %414 = tpu.matmul %411, %413, %cst_575 {dimension_numbers = #tpu.dot_dimension_numbers<[1], [0], [0], [1], [0, 0, 1, 1], [], []>} : vector<16x4xf32>, vector<4x8xf32>, vector<16x8xf32> -> vector<16x8xf32>
    %415 = arith.addf %409, %414 : vector<16x8xf32>
    %c0_576 = arith.constant 0 : index
    %c7_577 = arith.constant 7 : index
    %c1_578 = arith.constant 1 : index
    %c0_579 = arith.constant 0 : index
    %416 = vector.load %arg1[%c0_576, %c7_577, %c1_578, %c0_579] : memref<1x18x18x4xf32, #tpu.memory_space<vmem>>, vector<1x1x16x4xf32>
    %417 = vector.shape_cast %416 : vector<1x1x16x4xf32> to vector<16x4xf32>
    %c1_580 = arith.constant 1 : index
    %c1_581 = arith.constant 1 : index
    %c0_582 = arith.constant 0 : index
    %c0_583 = arith.constant 0 : index
    %418 = vector.load %arg2[%c1_580, %c1_581, %c0_582, %c0_583] : memref<3x3x4x8xf32, #tpu.memory_space<vmem>>, vector<1x1x4x8xf32>
    %419 = vector.shape_cast %418 : vector<1x1x4x8xf32> to vector<4x8xf32>
    %cst_584 = arith.constant dense<0.000000e+00> : vector<16x8xf32>
    %420 = tpu.matmul %417, %419, %cst_584 {dimension_numbers = #tpu.dot_dimension_numbers<[1], [0], [0], [1], [0, 0, 1, 1], [], []>} : vector<16x4xf32>, vector<4x8xf32>, vector<16x8xf32> -> vector<16x8xf32>
    %421 = arith.addf %415, %420 : vector<16x8xf32>
    %c0_585 = arith.constant 0 : index
    %c7_586 = arith.constant 7 : index
    %c2_587 = arith.constant 2 : index
    %c0_588 = arith.constant 0 : index
    %422 = vector.load %arg1[%c0_585, %c7_586, %c2_587, %c0_588] : memref<1x18x18x4xf32, #tpu.memory_space<vmem>>, vector<1x1x16x4xf32>
    %423 = vector.shape_cast %422 : vector<1x1x16x4xf32> to vector<16x4xf32>
    %c1_589 = arith.constant 1 : index
    %c2_590 = arith.constant 2 : index
    %c0_591 = arith.constant 0 : index
    %c0_592 = arith.constant 0 : index
    %424 = vector.load %arg2[%c1_589, %c2_590, %c0_591, %c0_592] : memref<3x3x4x8xf32, #tpu.memory_space<vmem>>, vector<1x1x4x8xf32>
    %425 = vector.shape_cast %424 : vector<1x1x4x8xf32> to vector<4x8xf32>
    %cst_593 = arith.constant dense<0.000000e+00> : vector<16x8xf32>
    %426 = tpu.matmul %423, %425, %cst_593 {dimension_numbers = #tpu.dot_dimension_numbers<[1], [0], [0], [1], [0, 0, 1, 1], [], []>} : vector<16x4xf32>, vector<4x8xf32>, vector<16x8xf32> -> vector<16x8xf32>
    %427 = arith.addf %421, %426 : vector<16x8xf32>
    %c0_594 = arith.constant 0 : index
    %c8 = arith.constant 8 : index
    %c0_595 = arith.constant 0 : index
    %c0_596 = arith.constant 0 : index
    %428 = vector.load %arg1[%c0_594, %c8, %c0_595, %c0_596] : memref<1x18x18x4xf32, #tpu.memory_space<vmem>>, vector<1x1x16x4xf32>
    %429 = vector.shape_cast %428 : vector<1x1x16x4xf32> to vector<16x4xf32>
    %c2_597 = arith.constant 2 : index
    %c0_598 = arith.constant 0 : index
    %c0_599 = arith.constant 0 : index
    %c0_600 = arith.constant 0 : index
    %430 = vector.load %arg2[%c2_597, %c0_598, %c0_599, %c0_600] : memref<3x3x4x8xf32, #tpu.memory_space<vmem>>, vector<1x1x4x8xf32>
    %431 = vector.shape_cast %430 : vector<1x1x4x8xf32> to vector<4x8xf32>
    %cst_601 = arith.constant dense<0.000000e+00> : vector<16x8xf32>
    %432 = tpu.matmul %429, %431, %cst_601 {dimension_numbers = #tpu.dot_dimension_numbers<[1], [0], [0], [1], [0, 0, 1, 1], [], []>} : vector<16x4xf32>, vector<4x8xf32>, vector<16x8xf32> -> vector<16x8xf32>
    %433 = arith.addf %427, %432 : vector<16x8xf32>
    %c0_602 = arith.constant 0 : index
    %c8_603 = arith.constant 8 : index
    %c1_604 = arith.constant 1 : index
    %c0_605 = arith.constant 0 : index
    %434 = vector.load %arg1[%c0_602, %c8_603, %c1_604, %c0_605] : memref<1x18x18x4xf32, #tpu.memory_space<vmem>>, vector<1x1x16x4xf32>
    %435 = vector.shape_cast %434 : vector<1x1x16x4xf32> to vector<16x4xf32>
    %c2_606 = arith.constant 2 : index
    %c1_607 = arith.constant 1 : index
    %c0_608 = arith.constant 0 : index
    %c0_609 = arith.constant 0 : index
    %436 = vector.load %arg2[%c2_606, %c1_607, %c0_608, %c0_609] : memref<3x3x4x8xf32, #tpu.memory_space<vmem>>, vector<1x1x4x8xf32>
    %437 = vector.shape_cast %436 : vector<1x1x4x8xf32> to vector<4x8xf32>
    %cst_610 = arith.constant dense<0.000000e+00> : vector<16x8xf32>
    %438 = tpu.matmul %435, %437, %cst_610 {dimension_numbers = #tpu.dot_dimension_numbers<[1], [0], [0], [1], [0, 0, 1, 1], [], []>} : vector<16x4xf32>, vector<4x8xf32>, vector<16x8xf32> -> vector<16x8xf32>
    %439 = arith.addf %433, %438 : vector<16x8xf32>
    %c0_611 = arith.constant 0 : index
    %c8_612 = arith.constant 8 : index
    %c2_613 = arith.constant 2 : index
    %c0_614 = arith.constant 0 : index
    %440 = vector.load %arg1[%c0_611, %c8_612, %c2_613, %c0_614] : memref<1x18x18x4xf32, #tpu.memory_space<vmem>>, vector<1x1x16x4xf32>
    %441 = vector.shape_cast %440 : vector<1x1x16x4xf32> to vector<16x4xf32>
    %c2_615 = arith.constant 2 : index
    %c2_616 = arith.constant 2 : index
    %c0_617 = arith.constant 0 : index
    %c0_618 = arith.constant 0 : index
    %442 = vector.load %arg2[%c2_615, %c2_616, %c0_617, %c0_618] : memref<3x3x4x8xf32, #tpu.memory_space<vmem>>, vector<1x1x4x8xf32>
    %443 = vector.shape_cast %442 : vector<1x1x4x8xf32> to vector<4x8xf32>
    %cst_619 = arith.constant dense<0.000000e+00> : vector<16x8xf32>
    %444 = tpu.matmul %441, %443, %cst_619 {dimension_numbers = #tpu.dot_dimension_numbers<[1], [0], [0], [1], [0, 0, 1, 1], [], []>} : vector<16x4xf32>, vector<4x8xf32>, vector<16x8xf32> -> vector<16x8xf32>
    %445 = arith.addf %439, %444 : vector<16x8xf32>
    %446 = vector.broadcast %0 : vector<1x8xf32> to vector<16x8xf32>
    %447 = arith.addf %445, %446 : vector<16x8xf32>
    %cst_620 = arith.constant 0.000000e+00 : f32
    %448 = vector.broadcast %cst_620 : f32 to vector<16x8xf32>
    %449 = arith.maximumf %447, %448 : vector<16x8xf32>
    %c0_621 = arith.constant 0 : index
    %c0_622 = arith.constant 0 : index
    %450 = vector.load %arg5[%c0_621, %c0_622] : memref<16x8xf32, #tpu.memory_space<vmem>>, vector<16x8xf32>
    tpu.vector_store %arg5[%c0_621, %c0_622], %449 {strides = array<i32>} : memref<16x8xf32, #tpu.memory_space<vmem>>, vector<16x8xf32>,
    %c0_623 = arith.constant 0 : index
    %c0_624 = arith.constant 0 : index
    %451 = tpu.strided_load %arg5[%c0_623, %c0_624] {strides = array<i32: 2, 1>} : memref<16x8xf32, #tpu.memory_space<vmem>>, vector<8x8xf32>
    %c1_625 = arith.constant 1 : index
    %c0_626 = arith.constant 0 : index
    %452 = tpu.strided_load %arg5[%c1_625, %c0_626] {strides = array<i32: 2, 1>} : memref<16x8xf32, #tpu.memory_space<vmem>>, vector<8x8xf32>
    %453 = arith.maximumf %451, %452 : vector<8x8xf32>
    %cst_627 = arith.constant 0.000000e+00 : f32
    %454 = vector.broadcast %cst_627 : f32 to vector<16x8xf32>
    %c0_628 = arith.constant 0 : index
    %c7_629 = arith.constant 7 : index
    %c0_630 = arith.constant 0 : index
    %c0_631 = arith.constant 0 : index
    %455 = vector.load %arg1[%c0_628, %c7_629, %c0_630, %c0_631] : memref<1x18x18x4xf32, #tpu.memory_space<vmem>>, vector<1x1x16x4xf32>
    %456 = vector.shape_cast %455 : vector<1x1x16x4xf32> to vector<16x4xf32>
    %c0_632 = arith.constant 0 : index
    %c0_633 = arith.constant 0 : index
    %c0_634 = arith.constant 0 : index
    %c0_635 = arith.constant 0 : index
    %457 = vector.load %arg2[%c0_632, %c0_633, %c0_634, %c0_635] : memref<3x3x4x8xf32, #tpu.memory_space<vmem>>, vector<1x1x4x8xf32>
    %458 = vector.shape_cast %457 : vector<1x1x4x8xf32> to vector<4x8xf32>
    %cst_636 = arith.constant dense<0.000000e+00> : vector<16x8xf32>
    %459 = tpu.matmul %456, %458, %cst_636 {dimension_numbers = #tpu.dot_dimension_numbers<[1], [0], [0], [1], [0, 0, 1, 1], [], []>} : vector<16x4xf32>, vector<4x8xf32>, vector<16x8xf32> -> vector<16x8xf32>
    %460 = arith.addf %454, %459 : vector<16x8xf32>
    %c0_637 = arith.constant 0 : index
    %c7_638 = arith.constant 7 : index
    %c1_639 = arith.constant 1 : index
    %c0_640 = arith.constant 0 : index
    %461 = vector.load %arg1[%c0_637, %c7_638, %c1_639, %c0_640] : memref<1x18x18x4xf32, #tpu.memory_space<vmem>>, vector<1x1x16x4xf32>
    %462 = vector.shape_cast %461 : vector<1x1x16x4xf32> to vector<16x4xf32>
    %c0_641 = arith.constant 0 : index
    %c1_642 = arith.constant 1 : index
    %c0_643 = arith.constant 0 : index
    %c0_644 = arith.constant 0 : index
    %463 = vector.load %arg2[%c0_641, %c1_642, %c0_643, %c0_644] : memref<3x3x4x8xf32, #tpu.memory_space<vmem>>, vector<1x1x4x8xf32>
    %464 = vector.shape_cast %463 : vector<1x1x4x8xf32> to vector<4x8xf32>
    %cst_645 = arith.constant dense<0.000000e+00> : vector<16x8xf32>
    %465 = tpu.matmul %462, %464, %cst_645 {dimension_numbers = #tpu.dot_dimension_numbers<[1], [0], [0], [1], [0, 0, 1, 1], [], []>} : vector<16x4xf32>, vector<4x8xf32>, vector<16x8xf32> -> vector<16x8xf32>
    %466 = arith.addf %460, %465 : vector<16x8xf32>
    %c0_646 = arith.constant 0 : index
    %c7_647 = arith.constant 7 : index
    %c2_648 = arith.constant 2 : index
    %c0_649 = arith.constant 0 : index
    %467 = vector.load %arg1[%c0_646, %c7_647, %c2_648, %c0_649] : memref<1x18x18x4xf32, #tpu.memory_space<vmem>>, vector<1x1x16x4xf32>
    %468 = vector.shape_cast %467 : vector<1x1x16x4xf32> to vector<16x4xf32>
    %c0_650 = arith.constant 0 : index
    %c2_651 = arith.constant 2 : index
    %c0_652 = arith.constant 0 : index
    %c0_653 = arith.constant 0 : index
    %469 = vector.load %arg2[%c0_650, %c2_651, %c0_652, %c0_653] : memref<3x3x4x8xf32, #tpu.memory_space<vmem>>, vector<1x1x4x8xf32>
    %470 = vector.shape_cast %469 : vector<1x1x4x8xf32> to vector<4x8xf32>
    %cst_654 = arith.constant dense<0.000000e+00> : vector<16x8xf32>
    %471 = tpu.matmul %468, %470, %cst_654 {dimension_numbers = #tpu.dot_dimension_numbers<[1], [0], [0], [1], [0, 0, 1, 1], [], []>} : vector<16x4xf32>, vector<4x8xf32>, vector<16x8xf32> -> vector<16x8xf32>
    %472 = arith.addf %466, %471 : vector<16x8xf32>
    %c0_655 = arith.constant 0 : index
    %c8_656 = arith.constant 8 : index
    %c0_657 = arith.constant 0 : index
    %c0_658 = arith.constant 0 : index
    %473 = vector.load %arg1[%c0_655, %c8_656, %c0_657, %c0_658] : memref<1x18x18x4xf32, #tpu.memory_space<vmem>>, vector<1x1x16x4xf32>
    %474 = vector.shape_cast %473 : vector<1x1x16x4xf32> to vector<16x4xf32>
    %c1_659 = arith.constant 1 : index
    %c0_660 = arith.constant 0 : index
    %c0_661 = arith.constant 0 : index
    %c0_662 = arith.constant 0 : index
    %475 = vector.load %arg2[%c1_659, %c0_660, %c0_661, %c0_662] : memref<3x3x4x8xf32, #tpu.memory_space<vmem>>, vector<1x1x4x8xf32>
    %476 = vector.shape_cast %475 : vector<1x1x4x8xf32> to vector<4x8xf32>
    %cst_663 = arith.constant dense<0.000000e+00> : vector<16x8xf32>
    %477 = tpu.matmul %474, %476, %cst_663 {dimension_numbers = #tpu.dot_dimension_numbers<[1], [0], [0], [1], [0, 0, 1, 1], [], []>} : vector<16x4xf32>, vector<4x8xf32>, vector<16x8xf32> -> vector<16x8xf32>
    %478 = arith.addf %472, %477 : vector<16x8xf32>
    %c0_664 = arith.constant 0 : index
    %c8_665 = arith.constant 8 : index
    %c1_666 = arith.constant 1 : index
    %c0_667 = arith.constant 0 : index
    %479 = vector.load %arg1[%c0_664, %c8_665, %c1_666, %c0_667] : memref<1x18x18x4xf32, #tpu.memory_space<vmem>>, vector<1x1x16x4xf32>
    %480 = vector.shape_cast %479 : vector<1x1x16x4xf32> to vector<16x4xf32>
    %c1_668 = arith.constant 1 : index
    %c1_669 = arith.constant 1 : index
    %c0_670 = arith.constant 0 : index
    %c0_671 = arith.constant 0 : index
    %481 = vector.load %arg2[%c1_668, %c1_669, %c0_670, %c0_671] : memref<3x3x4x8xf32, #tpu.memory_space<vmem>>, vector<1x1x4x8xf32>
    %482 = vector.shape_cast %481 : vector<1x1x4x8xf32> to vector<4x8xf32>
    %cst_672 = arith.constant dense<0.000000e+00> : vector<16x8xf32>
    %483 = tpu.matmul %480, %482, %cst_672 {dimension_numbers = #tpu.dot_dimension_numbers<[1], [0], [0], [1], [0, 0, 1, 1], [], []>} : vector<16x4xf32>, vector<4x8xf32>, vector<16x8xf32> -> vector<16x8xf32>
    %484 = arith.addf %478, %483 : vector<16x8xf32>
    %c0_673 = arith.constant 0 : index
    %c8_674 = arith.constant 8 : index
    %c2_675 = arith.constant 2 : index
    %c0_676 = arith.constant 0 : index
    %485 = vector.load %arg1[%c0_673, %c8_674, %c2_675, %c0_676] : memref<1x18x18x4xf32, #tpu.memory_space<vmem>>, vector<1x1x16x4xf32>
    %486 = vector.shape_cast %485 : vector<1x1x16x4xf32> to vector<16x4xf32>
    %c1_677 = arith.constant 1 : index
    %c2_678 = arith.constant 2 : index
    %c0_679 = arith.constant 0 : index
    %c0_680 = arith.constant 0 : index
    %487 = vector.load %arg2[%c1_677, %c2_678, %c0_679, %c0_680] : memref<3x3x4x8xf32, #tpu.memory_space<vmem>>, vector<1x1x4x8xf32>
    %488 = vector.shape_cast %487 : vector<1x1x4x8xf32> to vector<4x8xf32>
    %cst_681 = arith.constant dense<0.000000e+00> : vector<16x8xf32>
    %489 = tpu.matmul %486, %488, %cst_681 {dimension_numbers = #tpu.dot_dimension_numbers<[1], [0], [0], [1], [0, 0, 1, 1], [], []>} : vector<16x4xf32>, vector<4x8xf32>, vector<16x8xf32> -> vector<16x8xf32>
    %490 = arith.addf %484, %489 : vector<16x8xf32>
    %c0_682 = arith.constant 0 : index
    %c9 = arith.constant 9 : index
    %c0_683 = arith.constant 0 : index
    %c0_684 = arith.constant 0 : index
    %491 = vector.load %arg1[%c0_682, %c9, %c0_683, %c0_684] : memref<1x18x18x4xf32, #tpu.memory_space<vmem>>, vector<1x1x16x4xf32>
    %492 = vector.shape_cast %491 : vector<1x1x16x4xf32> to vector<16x4xf32>
    %c2_685 = arith.constant 2 : index
    %c0_686 = arith.constant 0 : index
    %c0_687 = arith.constant 0 : index
    %c0_688 = arith.constant 0 : index
    %493 = vector.load %arg2[%c2_685, %c0_686, %c0_687, %c0_688] : memref<3x3x4x8xf32, #tpu.memory_space<vmem>>, vector<1x1x4x8xf32>
    %494 = vector.shape_cast %493 : vector<1x1x4x8xf32> to vector<4x8xf32>
    %cst_689 = arith.constant dense<0.000000e+00> : vector<16x8xf32>
    %495 = tpu.matmul %492, %494, %cst_689 {dimension_numbers = #tpu.dot_dimension_numbers<[1], [0], [0], [1], [0, 0, 1, 1], [], []>} : vector<16x4xf32>, vector<4x8xf32>, vector<16x8xf32> -> vector<16x8xf32>
    %496 = arith.addf %490, %495 : vector<16x8xf32>
    %c0_690 = arith.constant 0 : index
    %c9_691 = arith.constant 9 : index
    %c1_692 = arith.constant 1 : index
    %c0_693 = arith.constant 0 : index
    %497 = vector.load %arg1[%c0_690, %c9_691, %c1_692, %c0_693] : memref<1x18x18x4xf32, #tpu.memory_space<vmem>>, vector<1x1x16x4xf32>
    %498 = vector.shape_cast %497 : vector<1x1x16x4xf32> to vector<16x4xf32>
    %c2_694 = arith.constant 2 : index
    %c1_695 = arith.constant 1 : index
    %c0_696 = arith.constant 0 : index
    %c0_697 = arith.constant 0 : index
    %499 = vector.load %arg2[%c2_694, %c1_695, %c0_696, %c0_697] : memref<3x3x4x8xf32, #tpu.memory_space<vmem>>, vector<1x1x4x8xf32>
    %500 = vector.shape_cast %499 : vector<1x1x4x8xf32> to vector<4x8xf32>
    %cst_698 = arith.constant dense<0.000000e+00> : vector<16x8xf32>
    %501 = tpu.matmul %498, %500, %cst_698 {dimension_numbers = #tpu.dot_dimension_numbers<[1], [0], [0], [1], [0, 0, 1, 1], [], []>} : vector<16x4xf32>, vector<4x8xf32>, vector<16x8xf32> -> vector<16x8xf32>
    %502 = arith.addf %496, %501 : vector<16x8xf32>
    %c0_699 = arith.constant 0 : index
    %c9_700 = arith.constant 9 : index
    %c2_701 = arith.constant 2 : index
    %c0_702 = arith.constant 0 : index
    %503 = vector.load %arg1[%c0_699, %c9_700, %c2_701, %c0_702] : memref<1x18x18x4xf32, #tpu.memory_space<vmem>>, vector<1x1x16x4xf32>
    %504 = vector.shape_cast %503 : vector<1x1x16x4xf32> to vector<16x4xf32>
    %c2_703 = arith.constant 2 : index
    %c2_704 = arith.constant 2 : index
    %c0_705 = arith.constant 0 : index
    %c0_706 = arith.constant 0 : index
    %505 = vector.load %arg2[%c2_703, %c2_704, %c0_705, %c0_706] : memref<3x3x4x8xf32, #tpu.memory_space<vmem>>, vector<1x1x4x8xf32>
    %506 = vector.shape_cast %505 : vector<1x1x4x8xf32> to vector<4x8xf32>
    %cst_707 = arith.constant dense<0.000000e+00> : vector<16x8xf32>
    %507 = tpu.matmul %504, %506, %cst_707 {dimension_numbers = #tpu.dot_dimension_numbers<[1], [0], [0], [1], [0, 0, 1, 1], [], []>} : vector<16x4xf32>, vector<4x8xf32>, vector<16x8xf32> -> vector<16x8xf32>
    %508 = arith.addf %502, %507 : vector<16x8xf32>
    %509 = vector.broadcast %0 : vector<1x8xf32> to vector<16x8xf32>
    %510 = arith.addf %508, %509 : vector<16x8xf32>
    %cst_708 = arith.constant 0.000000e+00 : f32
    %511 = vector.broadcast %cst_708 : f32 to vector<16x8xf32>
    %512 = arith.maximumf %510, %511 : vector<16x8xf32>
    %c0_709 = arith.constant 0 : index
    %c0_710 = arith.constant 0 : index
    %513 = vector.load %arg5[%c0_709, %c0_710] : memref<16x8xf32, #tpu.memory_space<vmem>>, vector<16x8xf32>
    tpu.vector_store %arg5[%c0_709, %c0_710], %512 {strides = array<i32>} : memref<16x8xf32, #tpu.memory_space<vmem>>, vector<16x8xf32>,
    %c0_711 = arith.constant 0 : index
    %c0_712 = arith.constant 0 : index
    %514 = tpu.strided_load %arg5[%c0_711, %c0_712] {strides = array<i32: 2, 1>} : memref<16x8xf32, #tpu.memory_space<vmem>>, vector<8x8xf32>
    %c1_713 = arith.constant 1 : index
    %c0_714 = arith.constant 0 : index
    %515 = tpu.strided_load %arg5[%c1_713, %c0_714] {strides = array<i32: 2, 1>} : memref<16x8xf32, #tpu.memory_space<vmem>>, vector<8x8xf32>
    %516 = arith.maximumf %514, %515 : vector<8x8xf32>
    %517 = arith.maximumf %453, %516 : vector<8x8xf32>
    %c0_715 = arith.constant 0 : index
    %c3_716 = arith.constant 3 : index
    %c0_717 = arith.constant 0 : index
    %c0_718 = arith.constant 0 : index
    %518 = vector.load %arg4[%c0_715, %c3_716, %c0_717, %c0_718] : memref<1x8x8x8xf32, #tpu.memory_space<vmem>>, vector<1x1x8x8xf32>
    %519 = vector.shape_cast %518 : vector<1x1x8x8xf32> to vector<8x8xf32>
    %520 = vector.shape_cast %517 : vector<8x8xf32> to vector<1x1x8x8xf32>
    tpu.vector_store %arg4[%c0_715, %c3_716, %c0_717, %c0_718], %520 {strides = array<i32>} : memref<1x8x8x8xf32, #tpu.memory_space<vmem>>, vector<1x1x8x8xf32>,
    %cst_719 = arith.constant 0.000000e+00 : f32
    %521 = vector.broadcast %cst_719 : f32 to vector<16x8xf32>
    %c0_720 = arith.constant 0 : index
    %c8_721 = arith.constant 8 : index
    %c0_722 = arith.constant 0 : index
    %c0_723 = arith.constant 0 : index
    %522 = vector.load %arg1[%c0_720, %c8_721, %c0_722, %c0_723] : memref<1x18x18x4xf32, #tpu.memory_space<vmem>>, vector<1x1x16x4xf32>
    %523 = vector.shape_cast %522 : vector<1x1x16x4xf32> to vector<16x4xf32>
    %c0_724 = arith.constant 0 : index
    %c0_725 = arith.constant 0 : index
    %c0_726 = arith.constant 0 : index
    %c0_727 = arith.constant 0 : index
    %524 = vector.load %arg2[%c0_724, %c0_725, %c0_726, %c0_727] : memref<3x3x4x8xf32, #tpu.memory_space<vmem>>, vector<1x1x4x8xf32>
    %525 = vector.shape_cast %524 : vector<1x1x4x8xf32> to vector<4x8xf32>
    %cst_728 = arith.constant dense<0.000000e+00> : vector<16x8xf32>
    %526 = tpu.matmul %523, %525, %cst_728 {dimension_numbers = #tpu.dot_dimension_numbers<[1], [0], [0], [1], [0, 0, 1, 1], [], []>} : vector<16x4xf32>, vector<4x8xf32>, vector<16x8xf32> -> vector<16x8xf32>
    %527 = arith.addf %521, %526 : vector<16x8xf32>
    %c0_729 = arith.constant 0 : index
    %c8_730 = arith.constant 8 : index
    %c1_731 = arith.constant 1 : index
    %c0_732 = arith.constant 0 : index
    %528 = vector.load %arg1[%c0_729, %c8_730, %c1_731, %c0_732] : memref<1x18x18x4xf32, #tpu.memory_space<vmem>>, vector<1x1x16x4xf32>
    %529 = vector.shape_cast %528 : vector<1x1x16x4xf32> to vector<16x4xf32>
    %c0_733 = arith.constant 0 : index
    %c1_734 = arith.constant 1 : index
    %c0_735 = arith.constant 0 : index
    %c0_736 = arith.constant 0 : index
    %530 = vector.load %arg2[%c0_733, %c1_734, %c0_735, %c0_736] : memref<3x3x4x8xf32, #tpu.memory_space<vmem>>, vector<1x1x4x8xf32>
    %531 = vector.shape_cast %530 : vector<1x1x4x8xf32> to vector<4x8xf32>
    %cst_737 = arith.constant dense<0.000000e+00> : vector<16x8xf32>
    %532 = tpu.matmul %529, %531, %cst_737 {dimension_numbers = #tpu.dot_dimension_numbers<[1], [0], [0], [1], [0, 0, 1, 1], [], []>} : vector<16x4xf32>, vector<4x8xf32>, vector<16x8xf32> -> vector<16x8xf32>
    %533 = arith.addf %527, %532 : vector<16x8xf32>
    %c0_738 = arith.constant 0 : index
    %c8_739 = arith.constant 8 : index
    %c2_740 = arith.constant 2 : index
    %c0_741 = arith.constant 0 : index
    %534 = vector.load %arg1[%c0_738, %c8_739, %c2_740, %c0_741] : memref<1x18x18x4xf32, #tpu.memory_space<vmem>>, vector<1x1x16x4xf32>
    %535 = vector.shape_cast %534 : vector<1x1x16x4xf32> to vector<16x4xf32>
    %c0_742 = arith.constant 0 : index
    %c2_743 = arith.constant 2 : index
    %c0_744 = arith.constant 0 : index
    %c0_745 = arith.constant 0 : index
    %536 = vector.load %arg2[%c0_742, %c2_743, %c0_744, %c0_745] : memref<3x3x4x8xf32, #tpu.memory_space<vmem>>, vector<1x1x4x8xf32>
    %537 = vector.shape_cast %536 : vector<1x1x4x8xf32> to vector<4x8xf32>
    %cst_746 = arith.constant dense<0.000000e+00> : vector<16x8xf32>
    %538 = tpu.matmul %535, %537, %cst_746 {dimension_numbers = #tpu.dot_dimension_numbers<[1], [0], [0], [1], [0, 0, 1, 1], [], []>} : vector<16x4xf32>, vector<4x8xf32>, vector<16x8xf32> -> vector<16x8xf32>
    %539 = arith.addf %533, %538 : vector<16x8xf32>
    %c0_747 = arith.constant 0 : index
    %c9_748 = arith.constant 9 : index
    %c0_749 = arith.constant 0 : index
    %c0_750 = arith.constant 0 : index
    %540 = vector.load %arg1[%c0_747, %c9_748, %c0_749, %c0_750] : memref<1x18x18x4xf32, #tpu.memory_space<vmem>>, vector<1x1x16x4xf32>
    %541 = vector.shape_cast %540 : vector<1x1x16x4xf32> to vector<16x4xf32>
    %c1_751 = arith.constant 1 : index
    %c0_752 = arith.constant 0 : index
    %c0_753 = arith.constant 0 : index
    %c0_754 = arith.constant 0 : index
    %542 = vector.load %arg2[%c1_751, %c0_752, %c0_753, %c0_754] : memref<3x3x4x8xf32, #tpu.memory_space<vmem>>, vector<1x1x4x8xf32>
    %543 = vector.shape_cast %542 : vector<1x1x4x8xf32> to vector<4x8xf32>
    %cst_755 = arith.constant dense<0.000000e+00> : vector<16x8xf32>
    %544 = tpu.matmul %541, %543, %cst_755 {dimension_numbers = #tpu.dot_dimension_numbers<[1], [0], [0], [1], [0, 0, 1, 1], [], []>} : vector<16x4xf32>, vector<4x8xf32>, vector<16x8xf32> -> vector<16x8xf32>
    %545 = arith.addf %539, %544 : vector<16x8xf32>
    %c0_756 = arith.constant 0 : index
    %c9_757 = arith.constant 9 : index
    %c1_758 = arith.constant 1 : index
    %c0_759 = arith.constant 0 : index
    %546 = vector.load %arg1[%c0_756, %c9_757, %c1_758, %c0_759] : memref<1x18x18x4xf32, #tpu.memory_space<vmem>>, vector<1x1x16x4xf32>
    %547 = vector.shape_cast %546 : vector<1x1x16x4xf32> to vector<16x4xf32>
    %c1_760 = arith.constant 1 : index
    %c1_761 = arith.constant 1 : index
    %c0_762 = arith.constant 0 : index
    %c0_763 = arith.constant 0 : index
    %548 = vector.load %arg2[%c1_760, %c1_761, %c0_762, %c0_763] : memref<3x3x4x8xf32, #tpu.memory_space<vmem>>, vector<1x1x4x8xf32>
    %549 = vector.shape_cast %548 : vector<1x1x4x8xf32> to vector<4x8xf32>
    %cst_764 = arith.constant dense<0.000000e+00> : vector<16x8xf32>
    %550 = tpu.matmul %547, %549, %cst_764 {dimension_numbers = #tpu.dot_dimension_numbers<[1], [0], [0], [1], [0, 0, 1, 1], [], []>} : vector<16x4xf32>, vector<4x8xf32>, vector<16x8xf32> -> vector<16x8xf32>
    %551 = arith.addf %545, %550 : vector<16x8xf32>
    %c0_765 = arith.constant 0 : index
    %c9_766 = arith.constant 9 : index
    %c2_767 = arith.constant 2 : index
    %c0_768 = arith.constant 0 : index
    %552 = vector.load %arg1[%c0_765, %c9_766, %c2_767, %c0_768] : memref<1x18x18x4xf32, #tpu.memory_space<vmem>>, vector<1x1x16x4xf32>
    %553 = vector.shape_cast %552 : vector<1x1x16x4xf32> to vector<16x4xf32>
    %c1_769 = arith.constant 1 : index
    %c2_770 = arith.constant 2 : index
    %c0_771 = arith.constant 0 : index
    %c0_772 = arith.constant 0 : index
    %554 = vector.load %arg2[%c1_769, %c2_770, %c0_771, %c0_772] : memref<3x3x4x8xf32, #tpu.memory_space<vmem>>, vector<1x1x4x8xf32>
    %555 = vector.shape_cast %554 : vector<1x1x4x8xf32> to vector<4x8xf32>
    %cst_773 = arith.constant dense<0.000000e+00> : vector<16x8xf32>
    %556 = tpu.matmul %553, %555, %cst_773 {dimension_numbers = #tpu.dot_dimension_numbers<[1], [0], [0], [1], [0, 0, 1, 1], [], []>} : vector<16x4xf32>, vector<4x8xf32>, vector<16x8xf32> -> vector<16x8xf32>
    %557 = arith.addf %551, %556 : vector<16x8xf32>
    %c0_774 = arith.constant 0 : index
    %c10 = arith.constant 10 : index
    %c0_775 = arith.constant 0 : index
    %c0_776 = arith.constant 0 : index
    %558 = vector.load %arg1[%c0_774, %c10, %c0_775, %c0_776] : memref<1x18x18x4xf32, #tpu.memory_space<vmem>>, vector<1x1x16x4xf32>
    %559 = vector.shape_cast %558 : vector<1x1x16x4xf32> to vector<16x4xf32>
    %c2_777 = arith.constant 2 : index
    %c0_778 = arith.constant 0 : index
    %c0_779 = arith.constant 0 : index
    %c0_780 = arith.constant 0 : index
    %560 = vector.load %arg2[%c2_777, %c0_778, %c0_779, %c0_780] : memref<3x3x4x8xf32, #tpu.memory_space<vmem>>, vector<1x1x4x8xf32>
    %561 = vector.shape_cast %560 : vector<1x1x4x8xf32> to vector<4x8xf32>
    %cst_781 = arith.constant dense<0.000000e+00> : vector<16x8xf32>
    %562 = tpu.matmul %559, %561, %cst_781 {dimension_numbers = #tpu.dot_dimension_numbers<[1], [0], [0], [1], [0, 0, 1, 1], [], []>} : vector<16x4xf32>, vector<4x8xf32>, vector<16x8xf32> -> vector<16x8xf32>
    %563 = arith.addf %557, %562 : vector<16x8xf32>
    %c0_782 = arith.constant 0 : index
    %c10_783 = arith.constant 10 : index
    %c1_784 = arith.constant 1 : index
    %c0_785 = arith.constant 0 : index
    %564 = vector.load %arg1[%c0_782, %c10_783, %c1_784, %c0_785] : memref<1x18x18x4xf32, #tpu.memory_space<vmem>>, vector<1x1x16x4xf32>
    %565 = vector.shape_cast %564 : vector<1x1x16x4xf32> to vector<16x4xf32>
    %c2_786 = arith.constant 2 : index
    %c1_787 = arith.constant 1 : index
    %c0_788 = arith.constant 0 : index
    %c0_789 = arith.constant 0 : index
    %566 = vector.load %arg2[%c2_786, %c1_787, %c0_788, %c0_789] : memref<3x3x4x8xf32, #tpu.memory_space<vmem>>, vector<1x1x4x8xf32>
    %567 = vector.shape_cast %566 : vector<1x1x4x8xf32> to vector<4x8xf32>
    %cst_790 = arith.constant dense<0.000000e+00> : vector<16x8xf32>
    %568 = tpu.matmul %565, %567, %cst_790 {dimension_numbers = #tpu.dot_dimension_numbers<[1], [0], [0], [1], [0, 0, 1, 1], [], []>} : vector<16x4xf32>, vector<4x8xf32>, vector<16x8xf32> -> vector<16x8xf32>
    %569 = arith.addf %563, %568 : vector<16x8xf32>
    %c0_791 = arith.constant 0 : index
    %c10_792 = arith.constant 10 : index
    %c2_793 = arith.constant 2 : index
    %c0_794 = arith.constant 0 : index
    %570 = vector.load %arg1[%c0_791, %c10_792, %c2_793, %c0_794] : memref<1x18x18x4xf32, #tpu.memory_space<vmem>>, vector<1x1x16x4xf32>
    %571 = vector.shape_cast %570 : vector<1x1x16x4xf32> to vector<16x4xf32>
    %c2_795 = arith.constant 2 : index
    %c2_796 = arith.constant 2 : index
    %c0_797 = arith.constant 0 : index
    %c0_798 = arith.constant 0 : index
    %572 = vector.load %arg2[%c2_795, %c2_796, %c0_797, %c0_798] : memref<3x3x4x8xf32, #tpu.memory_space<vmem>>, vector<1x1x4x8xf32>
    %573 = vector.shape_cast %572 : vector<1x1x4x8xf32> to vector<4x8xf32>
    %cst_799 = arith.constant dense<0.000000e+00> : vector<16x8xf32>
    %574 = tpu.matmul %571, %573, %cst_799 {dimension_numbers = #tpu.dot_dimension_numbers<[1], [0], [0], [1], [0, 0, 1, 1], [], []>} : vector<16x4xf32>, vector<4x8xf32>, vector<16x8xf32> -> vector<16x8xf32>
    %575 = arith.addf %569, %574 : vector<16x8xf32>
    %576 = vector.broadcast %0 : vector<1x8xf32> to vector<16x8xf32>
    %577 = arith.addf %575, %576 : vector<16x8xf32>
    %cst_800 = arith.constant 0.000000e+00 : f32
    %578 = vector.broadcast %cst_800 : f32 to vector<16x8xf32>
    %579 = arith.maximumf %577, %578 : vector<16x8xf32>
    %c0_801 = arith.constant 0 : index
    %c0_802 = arith.constant 0 : index
    %580 = vector.load %arg5[%c0_801, %c0_802] : memref<16x8xf32, #tpu.memory_space<vmem>>, vector<16x8xf32>
    tpu.vector_store %arg5[%c0_801, %c0_802], %579 {strides = array<i32>} : memref<16x8xf32, #tpu.memory_space<vmem>>, vector<16x8xf32>,
    %c0_803 = arith.constant 0 : index
    %c0_804 = arith.constant 0 : index
    %581 = tpu.strided_load %arg5[%c0_803, %c0_804] {strides = array<i32: 2, 1>} : memref<16x8xf32, #tpu.memory_space<vmem>>, vector<8x8xf32>
    %c1_805 = arith.constant 1 : index
    %c0_806 = arith.constant 0 : index
    %582 = tpu.strided_load %arg5[%c1_805, %c0_806] {strides = array<i32: 2, 1>} : memref<16x8xf32, #tpu.memory_space<vmem>>, vector<8x8xf32>
    %583 = arith.maximumf %581, %582 : vector<8x8xf32>
    %cst_807 = arith.constant 0.000000e+00 : f32
    %584 = vector.broadcast %cst_807 : f32 to vector<16x8xf32>
    %c0_808 = arith.constant 0 : index
    %c9_809 = arith.constant 9 : index
    %c0_810 = arith.constant 0 : index
    %c0_811 = arith.constant 0 : index
    %585 = vector.load %arg1[%c0_808, %c9_809, %c0_810, %c0_811] : memref<1x18x18x4xf32, #tpu.memory_space<vmem>>, vector<1x1x16x4xf32>
    %586 = vector.shape_cast %585 : vector<1x1x16x4xf32> to vector<16x4xf32>
    %c0_812 = arith.constant 0 : index
    %c0_813 = arith.constant 0 : index
    %c0_814 = arith.constant 0 : index
    %c0_815 = arith.constant 0 : index
    %587 = vector.load %arg2[%c0_812, %c0_813, %c0_814, %c0_815] : memref<3x3x4x8xf32, #tpu.memory_space<vmem>>, vector<1x1x4x8xf32>
    %588 = vector.shape_cast %587 : vector<1x1x4x8xf32> to vector<4x8xf32>
    %cst_816 = arith.constant dense<0.000000e+00> : vector<16x8xf32>
    %589 = tpu.matmul %586, %588, %cst_816 {dimension_numbers = #tpu.dot_dimension_numbers<[1], [0], [0], [1], [0, 0, 1, 1], [], []>} : vector<16x4xf32>, vector<4x8xf32>, vector<16x8xf32> -> vector<16x8xf32>
    %590 = arith.addf %584, %589 : vector<16x8xf32>
    %c0_817 = arith.constant 0 : index
    %c9_818 = arith.constant 9 : index
    %c1_819 = arith.constant 1 : index
    %c0_820 = arith.constant 0 : index
    %591 = vector.load %arg1[%c0_817, %c9_818, %c1_819, %c0_820] : memref<1x18x18x4xf32, #tpu.memory_space<vmem>>, vector<1x1x16x4xf32>
    %592 = vector.shape_cast %591 : vector<1x1x16x4xf32> to vector<16x4xf32>
    %c0_821 = arith.constant 0 : index
    %c1_822 = arith.constant 1 : index
    %c0_823 = arith.constant 0 : index
    %c0_824 = arith.constant 0 : index
    %593 = vector.load %arg2[%c0_821, %c1_822, %c0_823, %c0_824] : memref<3x3x4x8xf32, #tpu.memory_space<vmem>>, vector<1x1x4x8xf32>
    %594 = vector.shape_cast %593 : vector<1x1x4x8xf32> to vector<4x8xf32>
    %cst_825 = arith.constant dense<0.000000e+00> : vector<16x8xf32>
    %595 = tpu.matmul %592, %594, %cst_825 {dimension_numbers = #tpu.dot_dimension_numbers<[1], [0], [0], [1], [0, 0, 1, 1], [], []>} : vector<16x4xf32>, vector<4x8xf32>, vector<16x8xf32> -> vector<16x8xf32>
    %596 = arith.addf %590, %595 : vector<16x8xf32>
    %c0_826 = arith.constant 0 : index
    %c9_827 = arith.constant 9 : index
    %c2_828 = arith.constant 2 : index
    %c0_829 = arith.constant 0 : index
    %597 = vector.load %arg1[%c0_826, %c9_827, %c2_828, %c0_829] : memref<1x18x18x4xf32, #tpu.memory_space<vmem>>, vector<1x1x16x4xf32>
    %598 = vector.shape_cast %597 : vector<1x1x16x4xf32> to vector<16x4xf32>
    %c0_830 = arith.constant 0 : index
    %c2_831 = arith.constant 2 : index
    %c0_832 = arith.constant 0 : index
    %c0_833 = arith.constant 0 : index
    %599 = vector.load %arg2[%c0_830, %c2_831, %c0_832, %c0_833] : memref<3x3x4x8xf32, #tpu.memory_space<vmem>>, vector<1x1x4x8xf32>
    %600 = vector.shape_cast %599 : vector<1x1x4x8xf32> to vector<4x8xf32>
    %cst_834 = arith.constant dense<0.000000e+00> : vector<16x8xf32>
    %601 = tpu.matmul %598, %600, %cst_834 {dimension_numbers = #tpu.dot_dimension_numbers<[1], [0], [0], [1], [0, 0, 1, 1], [], []>} : vector<16x4xf32>, vector<4x8xf32>, vector<16x8xf32> -> vector<16x8xf32>
    %602 = arith.addf %596, %601 : vector<16x8xf32>
    %c0_835 = arith.constant 0 : index
    %c10_836 = arith.constant 10 : index
    %c0_837 = arith.constant 0 : index
    %c0_838 = arith.constant 0 : index
    %603 = vector.load %arg1[%c0_835, %c10_836, %c0_837, %c0_838] : memref<1x18x18x4xf32, #tpu.memory_space<vmem>>, vector<1x1x16x4xf32>
    %604 = vector.shape_cast %603 : vector<1x1x16x4xf32> to vector<16x4xf32>
    %c1_839 = arith.constant 1 : index
    %c0_840 = arith.constant 0 : index
    %c0_841 = arith.constant 0 : index
    %c0_842 = arith.constant 0 : index
    %605 = vector.load %arg2[%c1_839, %c0_840, %c0_841, %c0_842] : memref<3x3x4x8xf32, #tpu.memory_space<vmem>>, vector<1x1x4x8xf32>
    %606 = vector.shape_cast %605 : vector<1x1x4x8xf32> to vector<4x8xf32>
    %cst_843 = arith.constant dense<0.000000e+00> : vector<16x8xf32>
    %607 = tpu.matmul %604, %606, %cst_843 {dimension_numbers = #tpu.dot_dimension_numbers<[1], [0], [0], [1], [0, 0, 1, 1], [], []>} : vector<16x4xf32>, vector<4x8xf32>, vector<16x8xf32> -> vector<16x8xf32>
    %608 = arith.addf %602, %607 : vector<16x8xf32>
    %c0_844 = arith.constant 0 : index
    %c10_845 = arith.constant 10 : index
    %c1_846 = arith.constant 1 : index
    %c0_847 = arith.constant 0 : index
    %609 = vector.load %arg1[%c0_844, %c10_845, %c1_846, %c0_847] : memref<1x18x18x4xf32, #tpu.memory_space<vmem>>, vector<1x1x16x4xf32>
    %610 = vector.shape_cast %609 : vector<1x1x16x4xf32> to vector<16x4xf32>
    %c1_848 = arith.constant 1 : index
    %c1_849 = arith.constant 1 : index
    %c0_850 = arith.constant 0 : index
    %c0_851 = arith.constant 0 : index
    %611 = vector.load %arg2[%c1_848, %c1_849, %c0_850, %c0_851] : memref<3x3x4x8xf32, #tpu.memory_space<vmem>>, vector<1x1x4x8xf32>
    %612 = vector.shape_cast %611 : vector<1x1x4x8xf32> to vector<4x8xf32>
    %cst_852 = arith.constant dense<0.000000e+00> : vector<16x8xf32>
    %613 = tpu.matmul %610, %612, %cst_852 {dimension_numbers = #tpu.dot_dimension_numbers<[1], [0], [0], [1], [0, 0, 1, 1], [], []>} : vector<16x4xf32>, vector<4x8xf32>, vector<16x8xf32> -> vector<16x8xf32>
    %614 = arith.addf %608, %613 : vector<16x8xf32>
    %c0_853 = arith.constant 0 : index
    %c10_854 = arith.constant 10 : index
    %c2_855 = arith.constant 2 : index
    %c0_856 = arith.constant 0 : index
    %615 = vector.load %arg1[%c0_853, %c10_854, %c2_855, %c0_856] : memref<1x18x18x4xf32, #tpu.memory_space<vmem>>, vector<1x1x16x4xf32>
    %616 = vector.shape_cast %615 : vector<1x1x16x4xf32> to vector<16x4xf32>
    %c1_857 = arith.constant 1 : index
    %c2_858 = arith.constant 2 : index
    %c0_859 = arith.constant 0 : index
    %c0_860 = arith.constant 0 : index
    %617 = vector.load %arg2[%c1_857, %c2_858, %c0_859, %c0_860] : memref<3x3x4x8xf32, #tpu.memory_space<vmem>>, vector<1x1x4x8xf32>
    %618 = vector.shape_cast %617 : vector<1x1x4x8xf32> to vector<4x8xf32>
    %cst_861 = arith.constant dense<0.000000e+00> : vector<16x8xf32>
    %619 = tpu.matmul %616, %618, %cst_861 {dimension_numbers = #tpu.dot_dimension_numbers<[1], [0], [0], [1], [0, 0, 1, 1], [], []>} : vector<16x4xf32>, vector<4x8xf32>, vector<16x8xf32> -> vector<16x8xf32>
    %620 = arith.addf %614, %619 : vector<16x8xf32>
    %c0_862 = arith.constant 0 : index
    %c11 = arith.constant 11 : index
    %c0_863 = arith.constant 0 : index
    %c0_864 = arith.constant 0 : index
    %621 = vector.load %arg1[%c0_862, %c11, %c0_863, %c0_864] : memref<1x18x18x4xf32, #tpu.memory_space<vmem>>, vector<1x1x16x4xf32>
    %622 = vector.shape_cast %621 : vector<1x1x16x4xf32> to vector<16x4xf32>
    %c2_865 = arith.constant 2 : index
    %c0_866 = arith.constant 0 : index
    %c0_867 = arith.constant 0 : index
    %c0_868 = arith.constant 0 : index
    %623 = vector.load %arg2[%c2_865, %c0_866, %c0_867, %c0_868] : memref<3x3x4x8xf32, #tpu.memory_space<vmem>>, vector<1x1x4x8xf32>
    %624 = vector.shape_cast %623 : vector<1x1x4x8xf32> to vector<4x8xf32>
    %cst_869 = arith.constant dense<0.000000e+00> : vector<16x8xf32>
    %625 = tpu.matmul %622, %624, %cst_869 {dimension_numbers = #tpu.dot_dimension_numbers<[1], [0], [0], [1], [0, 0, 1, 1], [], []>} : vector<16x4xf32>, vector<4x8xf32>, vector<16x8xf32> -> vector<16x8xf32>
    %626 = arith.addf %620, %625 : vector<16x8xf32>
    %c0_870 = arith.constant 0 : index
    %c11_871 = arith.constant 11 : index
    %c1_872 = arith.constant 1 : index
    %c0_873 = arith.constant 0 : index
    %627 = vector.load %arg1[%c0_870, %c11_871, %c1_872, %c0_873] : memref<1x18x18x4xf32, #tpu.memory_space<vmem>>, vector<1x1x16x4xf32>
    %628 = vector.shape_cast %627 : vector<1x1x16x4xf32> to vector<16x4xf32>
    %c2_874 = arith.constant 2 : index
    %c1_875 = arith.constant 1 : index
    %c0_876 = arith.constant 0 : index
    %c0_877 = arith.constant 0 : index
    %629 = vector.load %arg2[%c2_874, %c1_875, %c0_876, %c0_877] : memref<3x3x4x8xf32, #tpu.memory_space<vmem>>, vector<1x1x4x8xf32>
    %630 = vector.shape_cast %629 : vector<1x1x4x8xf32> to vector<4x8xf32>
    %cst_878 = arith.constant dense<0.000000e+00> : vector<16x8xf32>
    %631 = tpu.matmul %628, %630, %cst_878 {dimension_numbers = #tpu.dot_dimension_numbers<[1], [0], [0], [1], [0, 0, 1, 1], [], []>} : vector<16x4xf32>, vector<4x8xf32>, vector<16x8xf32> -> vector<16x8xf32>
    %632 = arith.addf %626, %631 : vector<16x8xf32>
    %c0_879 = arith.constant 0 : index
    %c11_880 = arith.constant 11 : index
    %c2_881 = arith.constant 2 : index
    %c0_882 = arith.constant 0 : index
    %633 = vector.load %arg1[%c0_879, %c11_880, %c2_881, %c0_882] : memref<1x18x18x4xf32, #tpu.memory_space<vmem>>, vector<1x1x16x4xf32>
    %634 = vector.shape_cast %633 : vector<1x1x16x4xf32> to vector<16x4xf32>
    %c2_883 = arith.constant 2 : index
    %c2_884 = arith.constant 2 : index
    %c0_885 = arith.constant 0 : index
    %c0_886 = arith.constant 0 : index
    %635 = vector.load %arg2[%c2_883, %c2_884, %c0_885, %c0_886] : memref<3x3x4x8xf32, #tpu.memory_space<vmem>>, vector<1x1x4x8xf32>
    %636 = vector.shape_cast %635 : vector<1x1x4x8xf32> to vector<4x8xf32>
    %cst_887 = arith.constant dense<0.000000e+00> : vector<16x8xf32>
    %637 = tpu.matmul %634, %636, %cst_887 {dimension_numbers = #tpu.dot_dimension_numbers<[1], [0], [0], [1], [0, 0, 1, 1], [], []>} : vector<16x4xf32>, vector<4x8xf32>, vector<16x8xf32> -> vector<16x8xf32>
    %638 = arith.addf %632, %637 : vector<16x8xf32>
    %639 = vector.broadcast %0 : vector<1x8xf32> to vector<16x8xf32>
    %640 = arith.addf %638, %639 : vector<16x8xf32>
    %cst_888 = arith.constant 0.000000e+00 : f32
    %641 = vector.broadcast %cst_888 : f32 to vector<16x8xf32>
    %642 = arith.maximumf %640, %641 : vector<16x8xf32>
    %c0_889 = arith.constant 0 : index
    %c0_890 = arith.constant 0 : index
    %643 = vector.load %arg5[%c0_889, %c0_890] : memref<16x8xf32, #tpu.memory_space<vmem>>, vector<16x8xf32>
    tpu.vector_store %arg5[%c0_889, %c0_890], %642 {strides = array<i32>} : memref<16x8xf32, #tpu.memory_space<vmem>>, vector<16x8xf32>,
    %c0_891 = arith.constant 0 : index
    %c0_892 = arith.constant 0 : index
    %644 = tpu.strided_load %arg5[%c0_891, %c0_892] {strides = array<i32: 2, 1>} : memref<16x8xf32, #tpu.memory_space<vmem>>, vector<8x8xf32>
    %c1_893 = arith.constant 1 : index
    %c0_894 = arith.constant 0 : index
    %645 = tpu.strided_load %arg5[%c1_893, %c0_894] {strides = array<i32: 2, 1>} : memref<16x8xf32, #tpu.memory_space<vmem>>, vector<8x8xf32>
    %646 = arith.maximumf %644, %645 : vector<8x8xf32>
    %647 = arith.maximumf %583, %646 : vector<8x8xf32>
    %c0_895 = arith.constant 0 : index
    %c4_896 = arith.constant 4 : index
    %c0_897 = arith.constant 0 : index
    %c0_898 = arith.constant 0 : index
    %648 = vector.load %arg4[%c0_895, %c4_896, %c0_897, %c0_898] : memref<1x8x8x8xf32, #tpu.memory_space<vmem>>, vector<1x1x8x8xf32>
    %649 = vector.shape_cast %648 : vector<1x1x8x8xf32> to vector<8x8xf32>
    %650 = vector.shape_cast %647 : vector<8x8xf32> to vector<1x1x8x8xf32>
    tpu.vector_store %arg4[%c0_895, %c4_896, %c0_897, %c0_898], %650 {strides = array<i32>} : memref<1x8x8x8xf32, #tpu.memory_space<vmem>>, vector<1x1x8x8xf32>,
    %cst_899 = arith.constant 0.000000e+00 : f32
    %651 = vector.broadcast %cst_899 : f32 to vector<16x8xf32>
    %c0_900 = arith.constant 0 : index
    %c10_901 = arith.constant 10 : index
    %c0_902 = arith.constant 0 : index
    %c0_903 = arith.constant 0 : index
    %652 = vector.load %arg1[%c0_900, %c10_901, %c0_902, %c0_903] : memref<1x18x18x4xf32, #tpu.memory_space<vmem>>, vector<1x1x16x4xf32>
    %653 = vector.shape_cast %652 : vector<1x1x16x4xf32> to vector<16x4xf32>
    %c0_904 = arith.constant 0 : index
    %c0_905 = arith.constant 0 : index
    %c0_906 = arith.constant 0 : index
    %c0_907 = arith.constant 0 : index
    %654 = vector.load %arg2[%c0_904, %c0_905, %c0_906, %c0_907] : memref<3x3x4x8xf32, #tpu.memory_space<vmem>>, vector<1x1x4x8xf32>
    %655 = vector.shape_cast %654 : vector<1x1x4x8xf32> to vector<4x8xf32>
    %cst_908 = arith.constant dense<0.000000e+00> : vector<16x8xf32>
    %656 = tpu.matmul %653, %655, %cst_908 {dimension_numbers = #tpu.dot_dimension_numbers<[1], [0], [0], [1], [0, 0, 1, 1], [], []>} : vector<16x4xf32>, vector<4x8xf32>, vector<16x8xf32> -> vector<16x8xf32>
    %657 = arith.addf %651, %656 : vector<16x8xf32>
    %c0_909 = arith.constant 0 : index
    %c10_910 = arith.constant 10 : index
    %c1_911 = arith.constant 1 : index
    %c0_912 = arith.constant 0 : index
    %658 = vector.load %arg1[%c0_909, %c10_910, %c1_911, %c0_912] : memref<1x18x18x4xf32, #tpu.memory_space<vmem>>, vector<1x1x16x4xf32>
    %659 = vector.shape_cast %658 : vector<1x1x16x4xf32> to vector<16x4xf32>
    %c0_913 = arith.constant 0 : index
    %c1_914 = arith.constant 1 : index
    %c0_915 = arith.constant 0 : index
    %c0_916 = arith.constant 0 : index
    %660 = vector.load %arg2[%c0_913, %c1_914, %c0_915, %c0_916] : memref<3x3x4x8xf32, #tpu.memory_space<vmem>>, vector<1x1x4x8xf32>
    %661 = vector.shape_cast %660 : vector<1x1x4x8xf32> to vector<4x8xf32>
    %cst_917 = arith.constant dense<0.000000e+00> : vector<16x8xf32>
    %662 = tpu.matmul %659, %661, %cst_917 {dimension_numbers = #tpu.dot_dimension_numbers<[1], [0], [0], [1], [0, 0, 1, 1], [], []>} : vector<16x4xf32>, vector<4x8xf32>, vector<16x8xf32> -> vector<16x8xf32>
    %663 = arith.addf %657, %662 : vector<16x8xf32>
    %c0_918 = arith.constant 0 : index
    %c10_919 = arith.constant 10 : index
    %c2_920 = arith.constant 2 : index
    %c0_921 = arith.constant 0 : index
    %664 = vector.load %arg1[%c0_918, %c10_919, %c2_920, %c0_921] : memref<1x18x18x4xf32, #tpu.memory_space<vmem>>, vector<1x1x16x4xf32>
    %665 = vector.shape_cast %664 : vector<1x1x16x4xf32> to vector<16x4xf32>
    %c0_922 = arith.constant 0 : index
    %c2_923 = arith.constant 2 : index
    %c0_924 = arith.constant 0 : index
    %c0_925 = arith.constant 0 : index
    %666 = vector.load %arg2[%c0_922, %c2_923, %c0_924, %c0_925] : memref<3x3x4x8xf32, #tpu.memory_space<vmem>>, vector<1x1x4x8xf32>
    %667 = vector.shape_cast %666 : vector<1x1x4x8xf32> to vector<4x8xf32>
    %cst_926 = arith.constant dense<0.000000e+00> : vector<16x8xf32>
    %668 = tpu.matmul %665, %667, %cst_926 {dimension_numbers = #tpu.dot_dimension_numbers<[1], [0], [0], [1], [0, 0, 1, 1], [], []>} : vector<16x4xf32>, vector<4x8xf32>, vector<16x8xf32> -> vector<16x8xf32>
    %669 = arith.addf %663, %668 : vector<16x8xf32>
    %c0_927 = arith.constant 0 : index
    %c11_928 = arith.constant 11 : index
    %c0_929 = arith.constant 0 : index
    %c0_930 = arith.constant 0 : index
    %670 = vector.load %arg1[%c0_927, %c11_928, %c0_929, %c0_930] : memref<1x18x18x4xf32, #tpu.memory_space<vmem>>, vector<1x1x16x4xf32>
    %671 = vector.shape_cast %670 : vector<1x1x16x4xf32> to vector<16x4xf32>
    %c1_931 = arith.constant 1 : index
    %c0_932 = arith.constant 0 : index
    %c0_933 = arith.constant 0 : index
    %c0_934 = arith.constant 0 : index
    %672 = vector.load %arg2[%c1_931, %c0_932, %c0_933, %c0_934] : memref<3x3x4x8xf32, #tpu.memory_space<vmem>>, vector<1x1x4x8xf32>
    %673 = vector.shape_cast %672 : vector<1x1x4x8xf32> to vector<4x8xf32>
    %cst_935 = arith.constant dense<0.000000e+00> : vector<16x8xf32>
    %674 = tpu.matmul %671, %673, %cst_935 {dimension_numbers = #tpu.dot_dimension_numbers<[1], [0], [0], [1], [0, 0, 1, 1], [], []>} : vector<16x4xf32>, vector<4x8xf32>, vector<16x8xf32> -> vector<16x8xf32>
    %675 = arith.addf %669, %674 : vector<16x8xf32>
    %c0_936 = arith.constant 0 : index
    %c11_937 = arith.constant 11 : index
    %c1_938 = arith.constant 1 : index
    %c0_939 = arith.constant 0 : index
    %676 = vector.load %arg1[%c0_936, %c11_937, %c1_938, %c0_939] : memref<1x18x18x4xf32, #tpu.memory_space<vmem>>, vector<1x1x16x4xf32>
    %677 = vector.shape_cast %676 : vector<1x1x16x4xf32> to vector<16x4xf32>
    %c1_940 = arith.constant 1 : index
    %c1_941 = arith.constant 1 : index
    %c0_942 = arith.constant 0 : index
    %c0_943 = arith.constant 0 : index
    %678 = vector.load %arg2[%c1_940, %c1_941, %c0_942, %c0_943] : memref<3x3x4x8xf32, #tpu.memory_space<vmem>>, vector<1x1x4x8xf32>
    %679 = vector.shape_cast %678 : vector<1x1x4x8xf32> to vector<4x8xf32>
    %cst_944 = arith.constant dense<0.000000e+00> : vector<16x8xf32>
    %680 = tpu.matmul %677, %679, %cst_944 {dimension_numbers = #tpu.dot_dimension_numbers<[1], [0], [0], [1], [0, 0, 1, 1], [], []>} : vector<16x4xf32>, vector<4x8xf32>, vector<16x8xf32> -> vector<16x8xf32>
    %681 = arith.addf %675, %680 : vector<16x8xf32>
    %c0_945 = arith.constant 0 : index
    %c11_946 = arith.constant 11 : index
    %c2_947 = arith.constant 2 : index
    %c0_948 = arith.constant 0 : index
    %682 = vector.load %arg1[%c0_945, %c11_946, %c2_947, %c0_948] : memref<1x18x18x4xf32, #tpu.memory_space<vmem>>, vector<1x1x16x4xf32>
    %683 = vector.shape_cast %682 : vector<1x1x16x4xf32> to vector<16x4xf32>
    %c1_949 = arith.constant 1 : index
    %c2_950 = arith.constant 2 : index
    %c0_951 = arith.constant 0 : index
    %c0_952 = arith.constant 0 : index
    %684 = vector.load %arg2[%c1_949, %c2_950, %c0_951, %c0_952] : memref<3x3x4x8xf32, #tpu.memory_space<vmem>>, vector<1x1x4x8xf32>
    %685 = vector.shape_cast %684 : vector<1x1x4x8xf32> to vector<4x8xf32>
    %cst_953 = arith.constant dense<0.000000e+00> : vector<16x8xf32>
    %686 = tpu.matmul %683, %685, %cst_953 {dimension_numbers = #tpu.dot_dimension_numbers<[1], [0], [0], [1], [0, 0, 1, 1], [], []>} : vector<16x4xf32>, vector<4x8xf32>, vector<16x8xf32> -> vector<16x8xf32>
    %687 = arith.addf %681, %686 : vector<16x8xf32>
    %c0_954 = arith.constant 0 : index
    %c12 = arith.constant 12 : index
    %c0_955 = arith.constant 0 : index
    %c0_956 = arith.constant 0 : index
    %688 = vector.load %arg1[%c0_954, %c12, %c0_955, %c0_956] : memref<1x18x18x4xf32, #tpu.memory_space<vmem>>, vector<1x1x16x4xf32>
    %689 = vector.shape_cast %688 : vector<1x1x16x4xf32> to vector<16x4xf32>
    %c2_957 = arith.constant 2 : index
    %c0_958 = arith.constant 0 : index
    %c0_959 = arith.constant 0 : index
    %c0_960 = arith.constant 0 : index
    %690 = vector.load %arg2[%c2_957, %c0_958, %c0_959, %c0_960] : memref<3x3x4x8xf32, #tpu.memory_space<vmem>>, vector<1x1x4x8xf32>
    %691 = vector.shape_cast %690 : vector<1x1x4x8xf32> to vector<4x8xf32>
    %cst_961 = arith.constant dense<0.000000e+00> : vector<16x8xf32>
    %692 = tpu.matmul %689, %691, %cst_961 {dimension_numbers = #tpu.dot_dimension_numbers<[1], [0], [0], [1], [0, 0, 1, 1], [], []>} : vector<16x4xf32>, vector<4x8xf32>, vector<16x8xf32> -> vector<16x8xf32>
    %693 = arith.addf %687, %692 : vector<16x8xf32>
    %c0_962 = arith.constant 0 : index
    %c12_963 = arith.constant 12 : index
    %c1_964 = arith.constant 1 : index
    %c0_965 = arith.constant 0 : index
    %694 = vector.load %arg1[%c0_962, %c12_963, %c1_964, %c0_965] : memref<1x18x18x4xf32, #tpu.memory_space<vmem>>, vector<1x1x16x4xf32>
    %695 = vector.shape_cast %694 : vector<1x1x16x4xf32> to vector<16x4xf32>
    %c2_966 = arith.constant 2 : index
    %c1_967 = arith.constant 1 : index
    %c0_968 = arith.constant 0 : index
    %c0_969 = arith.constant 0 : index
    %696 = vector.load %arg2[%c2_966, %c1_967, %c0_968, %c0_969] : memref<3x3x4x8xf32, #tpu.memory_space<vmem>>, vector<1x1x4x8xf32>
    %697 = vector.shape_cast %696 : vector<1x1x4x8xf32> to vector<4x8xf32>
    %cst_970 = arith.constant dense<0.000000e+00> : vector<16x8xf32>
    %698 = tpu.matmul %695, %697, %cst_970 {dimension_numbers = #tpu.dot_dimension_numbers<[1], [0], [0], [1], [0, 0, 1, 1], [], []>} : vector<16x4xf32>, vector<4x8xf32>, vector<16x8xf32> -> vector<16x8xf32>
    %699 = arith.addf %693, %698 : vector<16x8xf32>
    %c0_971 = arith.constant 0 : index
    %c12_972 = arith.constant 12 : index
    %c2_973 = arith.constant 2 : index
    %c0_974 = arith.constant 0 : index
    %700 = vector.load %arg1[%c0_971, %c12_972, %c2_973, %c0_974] : memref<1x18x18x4xf32, #tpu.memory_space<vmem>>, vector<1x1x16x4xf32>
    %701 = vector.shape_cast %700 : vector<1x1x16x4xf32> to vector<16x4xf32>
    %c2_975 = arith.constant 2 : index
    %c2_976 = arith.constant 2 : index
    %c0_977 = arith.constant 0 : index
    %c0_978 = arith.constant 0 : index
    %702 = vector.load %arg2[%c2_975, %c2_976, %c0_977, %c0_978] : memref<3x3x4x8xf32, #tpu.memory_space<vmem>>, vector<1x1x4x8xf32>
    %703 = vector.shape_cast %702 : vector<1x1x4x8xf32> to vector<4x8xf32>
    %cst_979 = arith.constant dense<0.000000e+00> : vector<16x8xf32>
    %704 = tpu.matmul %701, %703, %cst_979 {dimension_numbers = #tpu.dot_dimension_numbers<[1], [0], [0], [1], [0, 0, 1, 1], [], []>} : vector<16x4xf32>, vector<4x8xf32>, vector<16x8xf32> -> vector<16x8xf32>
    %705 = arith.addf %699, %704 : vector<16x8xf32>
    %706 = vector.broadcast %0 : vector<1x8xf32> to vector<16x8xf32>
    %707 = arith.addf %705, %706 : vector<16x8xf32>
    %cst_980 = arith.constant 0.000000e+00 : f32
    %708 = vector.broadcast %cst_980 : f32 to vector<16x8xf32>
    %709 = arith.maximumf %707, %708 : vector<16x8xf32>
    %c0_981 = arith.constant 0 : index
    %c0_982 = arith.constant 0 : index
    %710 = vector.load %arg5[%c0_981, %c0_982] : memref<16x8xf32, #tpu.memory_space<vmem>>, vector<16x8xf32>
    tpu.vector_store %arg5[%c0_981, %c0_982], %709 {strides = array<i32>} : memref<16x8xf32, #tpu.memory_space<vmem>>, vector<16x8xf32>,
    %c0_983 = arith.constant 0 : index
    %c0_984 = arith.constant 0 : index
    %711 = tpu.strided_load %arg5[%c0_983, %c0_984] {strides = array<i32: 2, 1>} : memref<16x8xf32, #tpu.memory_space<vmem>>, vector<8x8xf32>
    %c1_985 = arith.constant 1 : index
    %c0_986 = arith.constant 0 : index
    %712 = tpu.strided_load %arg5[%c1_985, %c0_986] {strides = array<i32: 2, 1>} : memref<16x8xf32, #tpu.memory_space<vmem>>, vector<8x8xf32>
    %713 = arith.maximumf %711, %712 : vector<8x8xf32>
    %cst_987 = arith.constant 0.000000e+00 : f32
    %714 = vector.broadcast %cst_987 : f32 to vector<16x8xf32>
    %c0_988 = arith.constant 0 : index
    %c11_989 = arith.constant 11 : index
    %c0_990 = arith.constant 0 : index
    %c0_991 = arith.constant 0 : index
    %715 = vector.load %arg1[%c0_988, %c11_989, %c0_990, %c0_991] : memref<1x18x18x4xf32, #tpu.memory_space<vmem>>, vector<1x1x16x4xf32>
    %716 = vector.shape_cast %715 : vector<1x1x16x4xf32> to vector<16x4xf32>
    %c0_992 = arith.constant 0 : index
    %c0_993 = arith.constant 0 : index
    %c0_994 = arith.constant 0 : index
    %c0_995 = arith.constant 0 : index
    %717 = vector.load %arg2[%c0_992, %c0_993, %c0_994, %c0_995] : memref<3x3x4x8xf32, #tpu.memory_space<vmem>>, vector<1x1x4x8xf32>
    %718 = vector.shape_cast %717 : vector<1x1x4x8xf32> to vector<4x8xf32>
    %cst_996 = arith.constant dense<0.000000e+00> : vector<16x8xf32>
    %719 = tpu.matmul %716, %718, %cst_996 {dimension_numbers = #tpu.dot_dimension_numbers<[1], [0], [0], [1], [0, 0, 1, 1], [], []>} : vector<16x4xf32>, vector<4x8xf32>, vector<16x8xf32> -> vector<16x8xf32>
    %720 = arith.addf %714, %719 : vector<16x8xf32>
    %c0_997 = arith.constant 0 : index
    %c11_998 = arith.constant 11 : index
    %c1_999 = arith.constant 1 : index
    %c0_1000 = arith.constant 0 : index
    %721 = vector.load %arg1[%c0_997, %c11_998, %c1_999, %c0_1000] : memref<1x18x18x4xf32, #tpu.memory_space<vmem>>, vector<1x1x16x4xf32>
    %722 = vector.shape_cast %721 : vector<1x1x16x4xf32> to vector<16x4xf32>
    %c0_1001 = arith.constant 0 : index
    %c1_1002 = arith.constant 1 : index
    %c0_1003 = arith.constant 0 : index
    %c0_1004 = arith.constant 0 : index
    %723 = vector.load %arg2[%c0_1001, %c1_1002, %c0_1003, %c0_1004] : memref<3x3x4x8xf32, #tpu.memory_space<vmem>>, vector<1x1x4x8xf32>
    %724 = vector.shape_cast %723 : vector<1x1x4x8xf32> to vector<4x8xf32>
    %cst_1005 = arith.constant dense<0.000000e+00> : vector<16x8xf32>
    %725 = tpu.matmul %722, %724, %cst_1005 {dimension_numbers = #tpu.dot_dimension_numbers<[1], [0], [0], [1], [0, 0, 1, 1], [], []>} : vector<16x4xf32>, vector<4x8xf32>, vector<16x8xf32> -> vector<16x8xf32>
    %726 = arith.addf %720, %725 : vector<16x8xf32>
    %c0_1006 = arith.constant 0 : index
    %c11_1007 = arith.constant 11 : index
    %c2_1008 = arith.constant 2 : index
    %c0_1009 = arith.constant 0 : index
    %727 = vector.load %arg1[%c0_1006, %c11_1007, %c2_1008, %c0_1009] : memref<1x18x18x4xf32, #tpu.memory_space<vmem>>, vector<1x1x16x4xf32>
    %728 = vector.shape_cast %727 : vector<1x1x16x4xf32> to vector<16x4xf32>
    %c0_1010 = arith.constant 0 : index
    %c2_1011 = arith.constant 2 : index
    %c0_1012 = arith.constant 0 : index
    %c0_1013 = arith.constant 0 : index
    %729 = vector.load %arg2[%c0_1010, %c2_1011, %c0_1012, %c0_1013] : memref<3x3x4x8xf32, #tpu.memory_space<vmem>>, vector<1x1x4x8xf32>
    %730 = vector.shape_cast %729 : vector<1x1x4x8xf32> to vector<4x8xf32>
    %cst_1014 = arith.constant dense<0.000000e+00> : vector<16x8xf32>
    %731 = tpu.matmul %728, %730, %cst_1014 {dimension_numbers = #tpu.dot_dimension_numbers<[1], [0], [0], [1], [0, 0, 1, 1], [], []>} : vector<16x4xf32>, vector<4x8xf32>, vector<16x8xf32> -> vector<16x8xf32>
    %732 = arith.addf %726, %731 : vector<16x8xf32>
    %c0_1015 = arith.constant 0 : index
    %c12_1016 = arith.constant 12 : index
    %c0_1017 = arith.constant 0 : index
    %c0_1018 = arith.constant 0 : index
    %733 = vector.load %arg1[%c0_1015, %c12_1016, %c0_1017, %c0_1018] : memref<1x18x18x4xf32, #tpu.memory_space<vmem>>, vector<1x1x16x4xf32>
    %734 = vector.shape_cast %733 : vector<1x1x16x4xf32> to vector<16x4xf32>
    %c1_1019 = arith.constant 1 : index
    %c0_1020 = arith.constant 0 : index
    %c0_1021 = arith.constant 0 : index
    %c0_1022 = arith.constant 0 : index
    %735 = vector.load %arg2[%c1_1019, %c0_1020, %c0_1021, %c0_1022] : memref<3x3x4x8xf32, #tpu.memory_space<vmem>>, vector<1x1x4x8xf32>
    %736 = vector.shape_cast %735 : vector<1x1x4x8xf32> to vector<4x8xf32>
    %cst_1023 = arith.constant dense<0.000000e+00> : vector<16x8xf32>
    %737 = tpu.matmul %734, %736, %cst_1023 {dimension_numbers = #tpu.dot_dimension_numbers<[1], [0], [0], [1], [0, 0, 1, 1], [], []>} : vector<16x4xf32>, vector<4x8xf32>, vector<16x8xf32> -> vector<16x8xf32>
    %738 = arith.addf %732, %737 : vector<16x8xf32>
    %c0_1024 = arith.constant 0 : index
    %c12_1025 = arith.constant 12 : index
    %c1_1026 = arith.constant 1 : index
    %c0_1027 = arith.constant 0 : index
    %739 = vector.load %arg1[%c0_1024, %c12_1025, %c1_1026, %c0_1027] : memref<1x18x18x4xf32, #tpu.memory_space<vmem>>, vector<1x1x16x4xf32>
    %740 = vector.shape_cast %739 : vector<1x1x16x4xf32> to vector<16x4xf32>
    %c1_1028 = arith.constant 1 : index
    %c1_1029 = arith.constant 1 : index
    %c0_1030 = arith.constant 0 : index
    %c0_1031 = arith.constant 0 : index
    %741 = vector.load %arg2[%c1_1028, %c1_1029, %c0_1030, %c0_1031] : memref<3x3x4x8xf32, #tpu.memory_space<vmem>>, vector<1x1x4x8xf32>
    %742 = vector.shape_cast %741 : vector<1x1x4x8xf32> to vector<4x8xf32>
    %cst_1032 = arith.constant dense<0.000000e+00> : vector<16x8xf32>
    %743 = tpu.matmul %740, %742, %cst_1032 {dimension_numbers = #tpu.dot_dimension_numbers<[1], [0], [0], [1], [0, 0, 1, 1], [], []>} : vector<16x4xf32>, vector<4x8xf32>, vector<16x8xf32> -> vector<16x8xf32>
    %744 = arith.addf %738, %743 : vector<16x8xf32>
    %c0_1033 = arith.constant 0 : index
    %c12_1034 = arith.constant 12 : index
    %c2_1035 = arith.constant 2 : index
    %c0_1036 = arith.constant 0 : index
    %745 = vector.load %arg1[%c0_1033, %c12_1034, %c2_1035, %c0_1036] : memref<1x18x18x4xf32, #tpu.memory_space<vmem>>, vector<1x1x16x4xf32>
    %746 = vector.shape_cast %745 : vector<1x1x16x4xf32> to vector<16x4xf32>
    %c1_1037 = arith.constant 1 : index
    %c2_1038 = arith.constant 2 : index
    %c0_1039 = arith.constant 0 : index
    %c0_1040 = arith.constant 0 : index
    %747 = vector.load %arg2[%c1_1037, %c2_1038, %c0_1039, %c0_1040] : memref<3x3x4x8xf32, #tpu.memory_space<vmem>>, vector<1x1x4x8xf32>
    %748 = vector.shape_cast %747 : vector<1x1x4x8xf32> to vector<4x8xf32>
    %cst_1041 = arith.constant dense<0.000000e+00> : vector<16x8xf32>
    %749 = tpu.matmul %746, %748, %cst_1041 {dimension_numbers = #tpu.dot_dimension_numbers<[1], [0], [0], [1], [0, 0, 1, 1], [], []>} : vector<16x4xf32>, vector<4x8xf32>, vector<16x8xf32> -> vector<16x8xf32>
    %750 = arith.addf %744, %749 : vector<16x8xf32>
    %c0_1042 = arith.constant 0 : index
    %c13 = arith.constant 13 : index
    %c0_1043 = arith.constant 0 : index
    %c0_1044 = arith.constant 0 : index
    %751 = vector.load %arg1[%c0_1042, %c13, %c0_1043, %c0_1044] : memref<1x18x18x4xf32, #tpu.memory_space<vmem>>, vector<1x1x16x4xf32>
    %752 = vector.shape_cast %751 : vector<1x1x16x4xf32> to vector<16x4xf32>
    %c2_1045 = arith.constant 2 : index
    %c0_1046 = arith.constant 0 : index
    %c0_1047 = arith.constant 0 : index
    %c0_1048 = arith.constant 0 : index
    %753 = vector.load %arg2[%c2_1045, %c0_1046, %c0_1047, %c0_1048] : memref<3x3x4x8xf32, #tpu.memory_space<vmem>>, vector<1x1x4x8xf32>
    %754 = vector.shape_cast %753 : vector<1x1x4x8xf32> to vector<4x8xf32>
    %cst_1049 = arith.constant dense<0.000000e+00> : vector<16x8xf32>
    %755 = tpu.matmul %752, %754, %cst_1049 {dimension_numbers = #tpu.dot_dimension_numbers<[1], [0], [0], [1], [0, 0, 1, 1], [], []>} : vector<16x4xf32>, vector<4x8xf32>, vector<16x8xf32> -> vector<16x8xf32>
    %756 = arith.addf %750, %755 : vector<16x8xf32>
    %c0_1050 = arith.constant 0 : index
    %c13_1051 = arith.constant 13 : index
    %c1_1052 = arith.constant 1 : index
    %c0_1053 = arith.constant 0 : index
    %757 = vector.load %arg1[%c0_1050, %c13_1051, %c1_1052, %c0_1053] : memref<1x18x18x4xf32, #tpu.memory_space<vmem>>, vector<1x1x16x4xf32>
    %758 = vector.shape_cast %757 : vector<1x1x16x4xf32> to vector<16x4xf32>
    %c2_1054 = arith.constant 2 : index
    %c1_1055 = arith.constant 1 : index
    %c0_1056 = arith.constant 0 : index
    %c0_1057 = arith.constant 0 : index
    %759 = vector.load %arg2[%c2_1054, %c1_1055, %c0_1056, %c0_1057] : memref<3x3x4x8xf32, #tpu.memory_space<vmem>>, vector<1x1x4x8xf32>
    %760 = vector.shape_cast %759 : vector<1x1x4x8xf32> to vector<4x8xf32>
    %cst_1058 = arith.constant dense<0.000000e+00> : vector<16x8xf32>
    %761 = tpu.matmul %758, %760, %cst_1058 {dimension_numbers = #tpu.dot_dimension_numbers<[1], [0], [0], [1], [0, 0, 1, 1], [], []>} : vector<16x4xf32>, vector<4x8xf32>, vector<16x8xf32> -> vector<16x8xf32>
    %762 = arith.addf %756, %761 : vector<16x8xf32>
    %c0_1059 = arith.constant 0 : index
    %c13_1060 = arith.constant 13 : index
    %c2_1061 = arith.constant 2 : index
    %c0_1062 = arith.constant 0 : index
    %763 = vector.load %arg1[%c0_1059, %c13_1060, %c2_1061, %c0_1062] : memref<1x18x18x4xf32, #tpu.memory_space<vmem>>, vector<1x1x16x4xf32>
    %764 = vector.shape_cast %763 : vector<1x1x16x4xf32> to vector<16x4xf32>
    %c2_1063 = arith.constant 2 : index
    %c2_1064 = arith.constant 2 : index
    %c0_1065 = arith.constant 0 : index
    %c0_1066 = arith.constant 0 : index
    %765 = vector.load %arg2[%c2_1063, %c2_1064, %c0_1065, %c0_1066] : memref<3x3x4x8xf32, #tpu.memory_space<vmem>>, vector<1x1x4x8xf32>
    %766 = vector.shape_cast %765 : vector<1x1x4x8xf32> to vector<4x8xf32>
    %cst_1067 = arith.constant dense<0.000000e+00> : vector<16x8xf32>
    %767 = tpu.matmul %764, %766, %cst_1067 {dimension_numbers = #tpu.dot_dimension_numbers<[1], [0], [0], [1], [0, 0, 1, 1], [], []>} : vector<16x4xf32>, vector<4x8xf32>, vector<16x8xf32> -> vector<16x8xf32>
    %768 = arith.addf %762, %767 : vector<16x8xf32>
    %769 = vector.broadcast %0 : vector<1x8xf32> to vector<16x8xf32>
    %770 = arith.addf %768, %769 : vector<16x8xf32>
    %cst_1068 = arith.constant 0.000000e+00 : f32
    %771 = vector.broadcast %cst_1068 : f32 to vector<16x8xf32>
    %772 = arith.maximumf %770, %771 : vector<16x8xf32>
    %c0_1069 = arith.constant 0 : index
    %c0_1070 = arith.constant 0 : index
    %773 = vector.load %arg5[%c0_1069, %c0_1070] : memref<16x8xf32, #tpu.memory_space<vmem>>, vector<16x8xf32>
    tpu.vector_store %arg5[%c0_1069, %c0_1070], %772 {strides = array<i32>} : memref<16x8xf32, #tpu.memory_space<vmem>>, vector<16x8xf32>,
    %c0_1071 = arith.constant 0 : index
    %c0_1072 = arith.constant 0 : index
    %774 = tpu.strided_load %arg5[%c0_1071, %c0_1072] {strides = array<i32: 2, 1>} : memref<16x8xf32, #tpu.memory_space<vmem>>, vector<8x8xf32>
    %c1_1073 = arith.constant 1 : index
    %c0_1074 = arith.constant 0 : index
    %775 = tpu.strided_load %arg5[%c1_1073, %c0_1074] {strides = array<i32: 2, 1>} : memref<16x8xf32, #tpu.memory_space<vmem>>, vector<8x8xf32>
    %776 = arith.maximumf %774, %775 : vector<8x8xf32>
    %777 = arith.maximumf %713, %776 : vector<8x8xf32>
    %c0_1075 = arith.constant 0 : index
    %c5_1076 = arith.constant 5 : index
    %c0_1077 = arith.constant 0 : index
    %c0_1078 = arith.constant 0 : index
    %778 = vector.load %arg4[%c0_1075, %c5_1076, %c0_1077, %c0_1078] : memref<1x8x8x8xf32, #tpu.memory_space<vmem>>, vector<1x1x8x8xf32>
    %779 = vector.shape_cast %778 : vector<1x1x8x8xf32> to vector<8x8xf32>
    %780 = vector.shape_cast %777 : vector<8x8xf32> to vector<1x1x8x8xf32>
    tpu.vector_store %arg4[%c0_1075, %c5_1076, %c0_1077, %c0_1078], %780 {strides = array<i32>} : memref<1x8x8x8xf32, #tpu.memory_space<vmem>>, vector<1x1x8x8xf32>,
    %cst_1079 = arith.constant 0.000000e+00 : f32
    %781 = vector.broadcast %cst_1079 : f32 to vector<16x8xf32>
    %c0_1080 = arith.constant 0 : index
    %c12_1081 = arith.constant 12 : index
    %c0_1082 = arith.constant 0 : index
    %c0_1083 = arith.constant 0 : index
    %782 = vector.load %arg1[%c0_1080, %c12_1081, %c0_1082, %c0_1083] : memref<1x18x18x4xf32, #tpu.memory_space<vmem>>, vector<1x1x16x4xf32>
    %783 = vector.shape_cast %782 : vector<1x1x16x4xf32> to vector<16x4xf32>
    %c0_1084 = arith.constant 0 : index
    %c0_1085 = arith.constant 0 : index
    %c0_1086 = arith.constant 0 : index
    %c0_1087 = arith.constant 0 : index
    %784 = vector.load %arg2[%c0_1084, %c0_1085, %c0_1086, %c0_1087] : memref<3x3x4x8xf32, #tpu.memory_space<vmem>>, vector<1x1x4x8xf32>
    %785 = vector.shape_cast %784 : vector<1x1x4x8xf32> to vector<4x8xf32>
    %cst_1088 = arith.constant dense<0.000000e+00> : vector<16x8xf32>
    %786 = tpu.matmul %783, %785, %cst_1088 {dimension_numbers = #tpu.dot_dimension_numbers<[1], [0], [0], [1], [0, 0, 1, 1], [], []>} : vector<16x4xf32>, vector<4x8xf32>, vector<16x8xf32> -> vector<16x8xf32>
    %787 = arith.addf %781, %786 : vector<16x8xf32>
    %c0_1089 = arith.constant 0 : index
    %c12_1090 = arith.constant 12 : index
    %c1_1091 = arith.constant 1 : index
    %c0_1092 = arith.constant 0 : index
    %788 = vector.load %arg1[%c0_1089, %c12_1090, %c1_1091, %c0_1092] : memref<1x18x18x4xf32, #tpu.memory_space<vmem>>, vector<1x1x16x4xf32>
    %789 = vector.shape_cast %788 : vector<1x1x16x4xf32> to vector<16x4xf32>
    %c0_1093 = arith.constant 0 : index
    %c1_1094 = arith.constant 1 : index
    %c0_1095 = arith.constant 0 : index
    %c0_1096 = arith.constant 0 : index
    %790 = vector.load %arg2[%c0_1093, %c1_1094, %c0_1095, %c0_1096] : memref<3x3x4x8xf32, #tpu.memory_space<vmem>>, vector<1x1x4x8xf32>
    %791 = vector.shape_cast %790 : vector<1x1x4x8xf32> to vector<4x8xf32>
    %cst_1097 = arith.constant dense<0.000000e+00> : vector<16x8xf32>
    %792 = tpu.matmul %789, %791, %cst_1097 {dimension_numbers = #tpu.dot_dimension_numbers<[1], [0], [0], [1], [0, 0, 1, 1], [], []>} : vector<16x4xf32>, vector<4x8xf32>, vector<16x8xf32> -> vector<16x8xf32>
    %793 = arith.addf %787, %792 : vector<16x8xf32>
    %c0_1098 = arith.constant 0 : index
    %c12_1099 = arith.constant 12 : index
    %c2_1100 = arith.constant 2 : index
    %c0_1101 = arith.constant 0 : index
    %794 = vector.load %arg1[%c0_1098, %c12_1099, %c2_1100, %c0_1101] : memref<1x18x18x4xf32, #tpu.memory_space<vmem>>, vector<1x1x16x4xf32>
    %795 = vector.shape_cast %794 : vector<1x1x16x4xf32> to vector<16x4xf32>
    %c0_1102 = arith.constant 0 : index
    %c2_1103 = arith.constant 2 : index
    %c0_1104 = arith.constant 0 : index
    %c0_1105 = arith.constant 0 : index
    %796 = vector.load %arg2[%c0_1102, %c2_1103, %c0_1104, %c0_1105] : memref<3x3x4x8xf32, #tpu.memory_space<vmem>>, vector<1x1x4x8xf32>
    %797 = vector.shape_cast %796 : vector<1x1x4x8xf32> to vector<4x8xf32>
    %cst_1106 = arith.constant dense<0.000000e+00> : vector<16x8xf32>
    %798 = tpu.matmul %795, %797, %cst_1106 {dimension_numbers = #tpu.dot_dimension_numbers<[1], [0], [0], [1], [0, 0, 1, 1], [], []>} : vector<16x4xf32>, vector<4x8xf32>, vector<16x8xf32> -> vector<16x8xf32>
    %799 = arith.addf %793, %798 : vector<16x8xf32>
    %c0_1107 = arith.constant 0 : index
    %c13_1108 = arith.constant 13 : index
    %c0_1109 = arith.constant 0 : index
    %c0_1110 = arith.constant 0 : index
    %800 = vector.load %arg1[%c0_1107, %c13_1108, %c0_1109, %c0_1110] : memref<1x18x18x4xf32, #tpu.memory_space<vmem>>, vector<1x1x16x4xf32>
    %801 = vector.shape_cast %800 : vector<1x1x16x4xf32> to vector<16x4xf32>
    %c1_1111 = arith.constant 1 : index
    %c0_1112 = arith.constant 0 : index
    %c0_1113 = arith.constant 0 : index
    %c0_1114 = arith.constant 0 : index
    %802 = vector.load %arg2[%c1_1111, %c0_1112, %c0_1113, %c0_1114] : memref<3x3x4x8xf32, #tpu.memory_space<vmem>>, vector<1x1x4x8xf32>
    %803 = vector.shape_cast %802 : vector<1x1x4x8xf32> to vector<4x8xf32>
    %cst_1115 = arith.constant dense<0.000000e+00> : vector<16x8xf32>
    %804 = tpu.matmul %801, %803, %cst_1115 {dimension_numbers = #tpu.dot_dimension_numbers<[1], [0], [0], [1], [0, 0, 1, 1], [], []>} : vector<16x4xf32>, vector<4x8xf32>, vector<16x8xf32> -> vector<16x8xf32>
    %805 = arith.addf %799, %804 : vector<16x8xf32>
    %c0_1116 = arith.constant 0 : index
    %c13_1117 = arith.constant 13 : index
    %c1_1118 = arith.constant 1 : index
    %c0_1119 = arith.constant 0 : index
    %806 = vector.load %arg1[%c0_1116, %c13_1117, %c1_1118, %c0_1119] : memref<1x18x18x4xf32, #tpu.memory_space<vmem>>, vector<1x1x16x4xf32>
    %807 = vector.shape_cast %806 : vector<1x1x16x4xf32> to vector<16x4xf32>
    %c1_1120 = arith.constant 1 : index
    %c1_1121 = arith.constant 1 : index
    %c0_1122 = arith.constant 0 : index
    %c0_1123 = arith.constant 0 : index
    %808 = vector.load %arg2[%c1_1120, %c1_1121, %c0_1122, %c0_1123] : memref<3x3x4x8xf32, #tpu.memory_space<vmem>>, vector<1x1x4x8xf32>
    %809 = vector.shape_cast %808 : vector<1x1x4x8xf32> to vector<4x8xf32>
    %cst_1124 = arith.constant dense<0.000000e+00> : vector<16x8xf32>
    %810 = tpu.matmul %807, %809, %cst_1124 {dimension_numbers = #tpu.dot_dimension_numbers<[1], [0], [0], [1], [0, 0, 1, 1], [], []>} : vector<16x4xf32>, vector<4x8xf32>, vector<16x8xf32> -> vector<16x8xf32>
    %811 = arith.addf %805, %810 : vector<16x8xf32>
    %c0_1125 = arith.constant 0 : index
    %c13_1126 = arith.constant 13 : index
    %c2_1127 = arith.constant 2 : index
    %c0_1128 = arith.constant 0 : index
    %812 = vector.load %arg1[%c0_1125, %c13_1126, %c2_1127, %c0_1128] : memref<1x18x18x4xf32, #tpu.memory_space<vmem>>, vector<1x1x16x4xf32>
    %813 = vector.shape_cast %812 : vector<1x1x16x4xf32> to vector<16x4xf32>
    %c1_1129 = arith.constant 1 : index
    %c2_1130 = arith.constant 2 : index
    %c0_1131 = arith.constant 0 : index
    %c0_1132 = arith.constant 0 : index
    %814 = vector.load %arg2[%c1_1129, %c2_1130, %c0_1131, %c0_1132] : memref<3x3x4x8xf32, #tpu.memory_space<vmem>>, vector<1x1x4x8xf32>
    %815 = vector.shape_cast %814 : vector<1x1x4x8xf32> to vector<4x8xf32>
    %cst_1133 = arith.constant dense<0.000000e+00> : vector<16x8xf32>
    %816 = tpu.matmul %813, %815, %cst_1133 {dimension_numbers = #tpu.dot_dimension_numbers<[1], [0], [0], [1], [0, 0, 1, 1], [], []>} : vector<16x4xf32>, vector<4x8xf32>, vector<16x8xf32> -> vector<16x8xf32>
    %817 = arith.addf %811, %816 : vector<16x8xf32>
    %c0_1134 = arith.constant 0 : index
    %c14 = arith.constant 14 : index
    %c0_1135 = arith.constant 0 : index
    %c0_1136 = arith.constant 0 : index
    %818 = vector.load %arg1[%c0_1134, %c14, %c0_1135, %c0_1136] : memref<1x18x18x4xf32, #tpu.memory_space<vmem>>, vector<1x1x16x4xf32>
    %819 = vector.shape_cast %818 : vector<1x1x16x4xf32> to vector<16x4xf32>
    %c2_1137 = arith.constant 2 : index
    %c0_1138 = arith.constant 0 : index
    %c0_1139 = arith.constant 0 : index
    %c0_1140 = arith.constant 0 : index
    %820 = vector.load %arg2[%c2_1137, %c0_1138, %c0_1139, %c0_1140] : memref<3x3x4x8xf32, #tpu.memory_space<vmem>>, vector<1x1x4x8xf32>
    %821 = vector.shape_cast %820 : vector<1x1x4x8xf32> to vector<4x8xf32>
    %cst_1141 = arith.constant dense<0.000000e+00> : vector<16x8xf32>
    %822 = tpu.matmul %819, %821, %cst_1141 {dimension_numbers = #tpu.dot_dimension_numbers<[1], [0], [0], [1], [0, 0, 1, 1], [], []>} : vector<16x4xf32>, vector<4x8xf32>, vector<16x8xf32> -> vector<16x8xf32>
    %823 = arith.addf %817, %822 : vector<16x8xf32>
    %c0_1142 = arith.constant 0 : index
    %c14_1143 = arith.constant 14 : index
    %c1_1144 = arith.constant 1 : index
    %c0_1145 = arith.constant 0 : index
    %824 = vector.load %arg1[%c0_1142, %c14_1143, %c1_1144, %c0_1145] : memref<1x18x18x4xf32, #tpu.memory_space<vmem>>, vector<1x1x16x4xf32>
    %825 = vector.shape_cast %824 : vector<1x1x16x4xf32> to vector<16x4xf32>
    %c2_1146 = arith.constant 2 : index
    %c1_1147 = arith.constant 1 : index
    %c0_1148 = arith.constant 0 : index
    %c0_1149 = arith.constant 0 : index
    %826 = vector.load %arg2[%c2_1146, %c1_1147, %c0_1148, %c0_1149] : memref<3x3x4x8xf32, #tpu.memory_space<vmem>>, vector<1x1x4x8xf32>
    %827 = vector.shape_cast %826 : vector<1x1x4x8xf32> to vector<4x8xf32>
    %cst_1150 = arith.constant dense<0.000000e+00> : vector<16x8xf32>
    %828 = tpu.matmul %825, %827, %cst_1150 {dimension_numbers = #tpu.dot_dimension_numbers<[1], [0], [0], [1], [0, 0, 1, 1], [], []>} : vector<16x4xf32>, vector<4x8xf32>, vector<16x8xf32> -> vector<16x8xf32>
    %829 = arith.addf %823, %828 : vector<16x8xf32>
    %c0_1151 = arith.constant 0 : index
    %c14_1152 = arith.constant 14 : index
    %c2_1153 = arith.constant 2 : index
    %c0_1154 = arith.constant 0 : index
    %830 = vector.load %arg1[%c0_1151, %c14_1152, %c2_1153, %c0_1154] : memref<1x18x18x4xf32, #tpu.memory_space<vmem>>, vector<1x1x16x4xf32>
    %831 = vector.shape_cast %830 : vector<1x1x16x4xf32> to vector<16x4xf32>
    %c2_1155 = arith.constant 2 : index
    %c2_1156 = arith.constant 2 : index
    %c0_1157 = arith.constant 0 : index
    %c0_1158 = arith.constant 0 : index
    %832 = vector.load %arg2[%c2_1155, %c2_1156, %c0_1157, %c0_1158] : memref<3x3x4x8xf32, #tpu.memory_space<vmem>>, vector<1x1x4x8xf32>
    %833 = vector.shape_cast %832 : vector<1x1x4x8xf32> to vector<4x8xf32>
    %cst_1159 = arith.constant dense<0.000000e+00> : vector<16x8xf32>
    %834 = tpu.matmul %831, %833, %cst_1159 {dimension_numbers = #tpu.dot_dimension_numbers<[1], [0], [0], [1], [0, 0, 1, 1], [], []>} : vector<16x4xf32>, vector<4x8xf32>, vector<16x8xf32> -> vector<16x8xf32>
    %835 = arith.addf %829, %834 : vector<16x8xf32>
    %836 = vector.broadcast %0 : vector<1x8xf32> to vector<16x8xf32>
    %837 = arith.addf %835, %836 : vector<16x8xf32>
    %cst_1160 = arith.constant 0.000000e+00 : f32
    %838 = vector.broadcast %cst_1160 : f32 to vector<16x8xf32>
    %839 = arith.maximumf %837, %838 : vector<16x8xf32>
    %c0_1161 = arith.constant 0 : index
    %c0_1162 = arith.constant 0 : index
    %840 = vector.load %arg5[%c0_1161, %c0_1162] : memref<16x8xf32, #tpu.memory_space<vmem>>, vector<16x8xf32>
    tpu.vector_store %arg5[%c0_1161, %c0_1162], %839 {strides = array<i32>} : memref<16x8xf32, #tpu.memory_space<vmem>>, vector<16x8xf32>,
    %c0_1163 = arith.constant 0 : index
    %c0_1164 = arith.constant 0 : index
    %841 = tpu.strided_load %arg5[%c0_1163, %c0_1164] {strides = array<i32: 2, 1>} : memref<16x8xf32, #tpu.memory_space<vmem>>, vector<8x8xf32>
    %c1_1165 = arith.constant 1 : index
    %c0_1166 = arith.constant 0 : index
    %842 = tpu.strided_load %arg5[%c1_1165, %c0_1166] {strides = array<i32: 2, 1>} : memref<16x8xf32, #tpu.memory_space<vmem>>, vector<8x8xf32>
    %843 = arith.maximumf %841, %842 : vector<8x8xf32>
    %cst_1167 = arith.constant 0.000000e+00 : f32
    %844 = vector.broadcast %cst_1167 : f32 to vector<16x8xf32>
    %c0_1168 = arith.constant 0 : index
    %c13_1169 = arith.constant 13 : index
    %c0_1170 = arith.constant 0 : index
    %c0_1171 = arith.constant 0 : index
    %845 = vector.load %arg1[%c0_1168, %c13_1169, %c0_1170, %c0_1171] : memref<1x18x18x4xf32, #tpu.memory_space<vmem>>, vector<1x1x16x4xf32>
    %846 = vector.shape_cast %845 : vector<1x1x16x4xf32> to vector<16x4xf32>
    %c0_1172 = arith.constant 0 : index
    %c0_1173 = arith.constant 0 : index
    %c0_1174 = arith.constant 0 : index
    %c0_1175 = arith.constant 0 : index
    %847 = vector.load %arg2[%c0_1172, %c0_1173, %c0_1174, %c0_1175] : memref<3x3x4x8xf32, #tpu.memory_space<vmem>>, vector<1x1x4x8xf32>
    %848 = vector.shape_cast %847 : vector<1x1x4x8xf32> to vector<4x8xf32>
    %cst_1176 = arith.constant dense<0.000000e+00> : vector<16x8xf32>
    %849 = tpu.matmul %846, %848, %cst_1176 {dimension_numbers = #tpu.dot_dimension_numbers<[1], [0], [0], [1], [0, 0, 1, 1], [], []>} : vector<16x4xf32>, vector<4x8xf32>, vector<16x8xf32> -> vector<16x8xf32>
    %850 = arith.addf %844, %849 : vector<16x8xf32>
    %c0_1177 = arith.constant 0 : index
    %c13_1178 = arith.constant 13 : index
    %c1_1179 = arith.constant 1 : index
    %c0_1180 = arith.constant 0 : index
    %851 = vector.load %arg1[%c0_1177, %c13_1178, %c1_1179, %c0_1180] : memref<1x18x18x4xf32, #tpu.memory_space<vmem>>, vector<1x1x16x4xf32>
    %852 = vector.shape_cast %851 : vector<1x1x16x4xf32> to vector<16x4xf32>
    %c0_1181 = arith.constant 0 : index
    %c1_1182 = arith.constant 1 : index
    %c0_1183 = arith.constant 0 : index
    %c0_1184 = arith.constant 0 : index
    %853 = vector.load %arg2[%c0_1181, %c1_1182, %c0_1183, %c0_1184] : memref<3x3x4x8xf32, #tpu.memory_space<vmem>>, vector<1x1x4x8xf32>
    %854 = vector.shape_cast %853 : vector<1x1x4x8xf32> to vector<4x8xf32>
    %cst_1185 = arith.constant dense<0.000000e+00> : vector<16x8xf32>
    %855 = tpu.matmul %852, %854, %cst_1185 {dimension_numbers = #tpu.dot_dimension_numbers<[1], [0], [0], [1], [0, 0, 1, 1], [], []>} : vector<16x4xf32>, vector<4x8xf32>, vector<16x8xf32> -> vector<16x8xf32>
    %856 = arith.addf %850, %855 : vector<16x8xf32>
    %c0_1186 = arith.constant 0 : index
    %c13_1187 = arith.constant 13 : index
    %c2_1188 = arith.constant 2 : index
    %c0_1189 = arith.constant 0 : index
    %857 = vector.load %arg1[%c0_1186, %c13_1187, %c2_1188, %c0_1189] : memref<1x18x18x4xf32, #tpu.memory_space<vmem>>, vector<1x1x16x4xf32>
    %858 = vector.shape_cast %857 : vector<1x1x16x4xf32> to vector<16x4xf32>
    %c0_1190 = arith.constant 0 : index
    %c2_1191 = arith.constant 2 : index
    %c0_1192 = arith.constant 0 : index
    %c0_1193 = arith.constant 0 : index
    %859 = vector.load %arg2[%c0_1190, %c2_1191, %c0_1192, %c0_1193] : memref<3x3x4x8xf32, #tpu.memory_space<vmem>>, vector<1x1x4x8xf32>
    %860 = vector.shape_cast %859 : vector<1x1x4x8xf32> to vector<4x8xf32>
    %cst_1194 = arith.constant dense<0.000000e+00> : vector<16x8xf32>
    %861 = tpu.matmul %858, %860, %cst_1194 {dimension_numbers = #tpu.dot_dimension_numbers<[1], [0], [0], [1], [0, 0, 1, 1], [], []>} : vector<16x4xf32>, vector<4x8xf32>, vector<16x8xf32> -> vector<16x8xf32>
    %862 = arith.addf %856, %861 : vector<16x8xf32>
    %c0_1195 = arith.constant 0 : index
    %c14_1196 = arith.constant 14 : index
    %c0_1197 = arith.constant 0 : index
    %c0_1198 = arith.constant 0 : index
    %863 = vector.load %arg1[%c0_1195, %c14_1196, %c0_1197, %c0_1198] : memref<1x18x18x4xf32, #tpu.memory_space<vmem>>, vector<1x1x16x4xf32>
    %864 = vector.shape_cast %863 : vector<1x1x16x4xf32> to vector<16x4xf32>
    %c1_1199 = arith.constant 1 : index
    %c0_1200 = arith.constant 0 : index
    %c0_1201 = arith.constant 0 : index
    %c0_1202 = arith.constant 0 : index
    %865 = vector.load %arg2[%c1_1199, %c0_1200, %c0_1201, %c0_1202] : memref<3x3x4x8xf32, #tpu.memory_space<vmem>>, vector<1x1x4x8xf32>
    %866 = vector.shape_cast %865 : vector<1x1x4x8xf32> to vector<4x8xf32>
    %cst_1203 = arith.constant dense<0.000000e+00> : vector<16x8xf32>
    %867 = tpu.matmul %864, %866, %cst_1203 {dimension_numbers = #tpu.dot_dimension_numbers<[1], [0], [0], [1], [0, 0, 1, 1], [], []>} : vector<16x4xf32>, vector<4x8xf32>, vector<16x8xf32> -> vector<16x8xf32>
    %868 = arith.addf %862, %867 : vector<16x8xf32>
    %c0_1204 = arith.constant 0 : index
    %c14_1205 = arith.constant 14 : index
    %c1_1206 = arith.constant 1 : index
    %c0_1207 = arith.constant 0 : index
    %869 = vector.load %arg1[%c0_1204, %c14_1205, %c1_1206, %c0_1207] : memref<1x18x18x4xf32, #tpu.memory_space<vmem>>, vector<1x1x16x4xf32>
    %870 = vector.shape_cast %869 : vector<1x1x16x4xf32> to vector<16x4xf32>
    %c1_1208 = arith.constant 1 : index
    %c1_1209 = arith.constant 1 : index
    %c0_1210 = arith.constant 0 : index
    %c0_1211 = arith.constant 0 : index
    %871 = vector.load %arg2[%c1_1208, %c1_1209, %c0_1210, %c0_1211] : memref<3x3x4x8xf32, #tpu.memory_space<vmem>>, vector<1x1x4x8xf32>
    %872 = vector.shape_cast %871 : vector<1x1x4x8xf32> to vector<4x8xf32>
    %cst_1212 = arith.constant dense<0.000000e+00> : vector<16x8xf32>
    %873 = tpu.matmul %870, %872, %cst_1212 {dimension_numbers = #tpu.dot_dimension_numbers<[1], [0], [0], [1], [0, 0, 1, 1], [], []>} : vector<16x4xf32>, vector<4x8xf32>, vector<16x8xf32> -> vector<16x8xf32>
    %874 = arith.addf %868, %873 : vector<16x8xf32>
    %c0_1213 = arith.constant 0 : index
    %c14_1214 = arith.constant 14 : index
    %c2_1215 = arith.constant 2 : index
    %c0_1216 = arith.constant 0 : index
    %875 = vector.load %arg1[%c0_1213, %c14_1214, %c2_1215, %c0_1216] : memref<1x18x18x4xf32, #tpu.memory_space<vmem>>, vector<1x1x16x4xf32>
    %876 = vector.shape_cast %875 : vector<1x1x16x4xf32> to vector<16x4xf32>
    %c1_1217 = arith.constant 1 : index
    %c2_1218 = arith.constant 2 : index
    %c0_1219 = arith.constant 0 : index
    %c0_1220 = arith.constant 0 : index
    %877 = vector.load %arg2[%c1_1217, %c2_1218, %c0_1219, %c0_1220] : memref<3x3x4x8xf32, #tpu.memory_space<vmem>>, vector<1x1x4x8xf32>
    %878 = vector.shape_cast %877 : vector<1x1x4x8xf32> to vector<4x8xf32>
    %cst_1221 = arith.constant dense<0.000000e+00> : vector<16x8xf32>
    %879 = tpu.matmul %876, %878, %cst_1221 {dimension_numbers = #tpu.dot_dimension_numbers<[1], [0], [0], [1], [0, 0, 1, 1], [], []>} : vector<16x4xf32>, vector<4x8xf32>, vector<16x8xf32> -> vector<16x8xf32>
    %880 = arith.addf %874, %879 : vector<16x8xf32>
    %c0_1222 = arith.constant 0 : index
    %c15 = arith.constant 15 : index
    %c0_1223 = arith.constant 0 : index
    %c0_1224 = arith.constant 0 : index
    %881 = vector.load %arg1[%c0_1222, %c15, %c0_1223, %c0_1224] : memref<1x18x18x4xf32, #tpu.memory_space<vmem>>, vector<1x1x16x4xf32>
    %882 = vector.shape_cast %881 : vector<1x1x16x4xf32> to vector<16x4xf32>
    %c2_1225 = arith.constant 2 : index
    %c0_1226 = arith.constant 0 : index
    %c0_1227 = arith.constant 0 : index
    %c0_1228 = arith.constant 0 : index
    %883 = vector.load %arg2[%c2_1225, %c0_1226, %c0_1227, %c0_1228] : memref<3x3x4x8xf32, #tpu.memory_space<vmem>>, vector<1x1x4x8xf32>
    %884 = vector.shape_cast %883 : vector<1x1x4x8xf32> to vector<4x8xf32>
    %cst_1229 = arith.constant dense<0.000000e+00> : vector<16x8xf32>
    %885 = tpu.matmul %882, %884, %cst_1229 {dimension_numbers = #tpu.dot_dimension_numbers<[1], [0], [0], [1], [0, 0, 1, 1], [], []>} : vector<16x4xf32>, vector<4x8xf32>, vector<16x8xf32> -> vector<16x8xf32>
    %886 = arith.addf %880, %885 : vector<16x8xf32>
    %c0_1230 = arith.constant 0 : index
    %c15_1231 = arith.constant 15 : index
    %c1_1232 = arith.constant 1 : index
    %c0_1233 = arith.constant 0 : index
    %887 = vector.load %arg1[%c0_1230, %c15_1231, %c1_1232, %c0_1233] : memref<1x18x18x4xf32, #tpu.memory_space<vmem>>, vector<1x1x16x4xf32>
    %888 = vector.shape_cast %887 : vector<1x1x16x4xf32> to vector<16x4xf32>
    %c2_1234 = arith.constant 2 : index
    %c1_1235 = arith.constant 1 : index
    %c0_1236 = arith.constant 0 : index
    %c0_1237 = arith.constant 0 : index
    %889 = vector.load %arg2[%c2_1234, %c1_1235, %c0_1236, %c0_1237] : memref<3x3x4x8xf32, #tpu.memory_space<vmem>>, vector<1x1x4x8xf32>
    %890 = vector.shape_cast %889 : vector<1x1x4x8xf32> to vector<4x8xf32>
    %cst_1238 = arith.constant dense<0.000000e+00> : vector<16x8xf32>
    %891 = tpu.matmul %888, %890, %cst_1238 {dimension_numbers = #tpu.dot_dimension_numbers<[1], [0], [0], [1], [0, 0, 1, 1], [], []>} : vector<16x4xf32>, vector<4x8xf32>, vector<16x8xf32> -> vector<16x8xf32>
    %892 = arith.addf %886, %891 : vector<16x8xf32>
    %c0_1239 = arith.constant 0 : index
    %c15_1240 = arith.constant 15 : index
    %c2_1241 = arith.constant 2 : index
    %c0_1242 = arith.constant 0 : index
    %893 = vector.load %arg1[%c0_1239, %c15_1240, %c2_1241, %c0_1242] : memref<1x18x18x4xf32, #tpu.memory_space<vmem>>, vector<1x1x16x4xf32>
    %894 = vector.shape_cast %893 : vector<1x1x16x4xf32> to vector<16x4xf32>
    %c2_1243 = arith.constant 2 : index
    %c2_1244 = arith.constant 2 : index
    %c0_1245 = arith.constant 0 : index
    %c0_1246 = arith.constant 0 : index
    %895 = vector.load %arg2[%c2_1243, %c2_1244, %c0_1245, %c0_1246] : memref<3x3x4x8xf32, #tpu.memory_space<vmem>>, vector<1x1x4x8xf32>
    %896 = vector.shape_cast %895 : vector<1x1x4x8xf32> to vector<4x8xf32>
    %cst_1247 = arith.constant dense<0.000000e+00> : vector<16x8xf32>
    %897 = tpu.matmul %894, %896, %cst_1247 {dimension_numbers = #tpu.dot_dimension_numbers<[1], [0], [0], [1], [0, 0, 1, 1], [], []>} : vector<16x4xf32>, vector<4x8xf32>, vector<16x8xf32> -> vector<16x8xf32>
    %898 = arith.addf %892, %897 : vector<16x8xf32>
    %899 = vector.broadcast %0 : vector<1x8xf32> to vector<16x8xf32>
    %900 = arith.addf %898, %899 : vector<16x8xf32>
    %cst_1248 = arith.constant 0.000000e+00 : f32
    %901 = vector.broadcast %cst_1248 : f32 to vector<16x8xf32>
    %902 = arith.maximumf %900, %901 : vector<16x8xf32>
    %c0_1249 = arith.constant 0 : index
    %c0_1250 = arith.constant 0 : index
    %903 = vector.load %arg5[%c0_1249, %c0_1250] : memref<16x8xf32, #tpu.memory_space<vmem>>, vector<16x8xf32>
    tpu.vector_store %arg5[%c0_1249, %c0_1250], %902 {strides = array<i32>} : memref<16x8xf32, #tpu.memory_space<vmem>>, vector<16x8xf32>,
    %c0_1251 = arith.constant 0 : index
    %c0_1252 = arith.constant 0 : index
    %904 = tpu.strided_load %arg5[%c0_1251, %c0_1252] {strides = array<i32: 2, 1>} : memref<16x8xf32, #tpu.memory_space<vmem>>, vector<8x8xf32>
    %c1_1253 = arith.constant 1 : index
    %c0_1254 = arith.constant 0 : index
    %905 = tpu.strided_load %arg5[%c1_1253, %c0_1254] {strides = array<i32: 2, 1>} : memref<16x8xf32, #tpu.memory_space<vmem>>, vector<8x8xf32>
    %906 = arith.maximumf %904, %905 : vector<8x8xf32>
    %907 = arith.maximumf %843, %906 : vector<8x8xf32>
    %c0_1255 = arith.constant 0 : index
    %c6_1256 = arith.constant 6 : index
    %c0_1257 = arith.constant 0 : index
    %c0_1258 = arith.constant 0 : index
    %908 = vector.load %arg4[%c0_1255, %c6_1256, %c0_1257, %c0_1258] : memref<1x8x8x8xf32, #tpu.memory_space<vmem>>, vector<1x1x8x8xf32>
    %909 = vector.shape_cast %908 : vector<1x1x8x8xf32> to vector<8x8xf32>
    %910 = vector.shape_cast %907 : vector<8x8xf32> to vector<1x1x8x8xf32>
    tpu.vector_store %arg4[%c0_1255, %c6_1256, %c0_1257, %c0_1258], %910 {strides = array<i32>} : memref<1x8x8x8xf32, #tpu.memory_space<vmem>>, vector<1x1x8x8xf32>,
    %cst_1259 = arith.constant 0.000000e+00 : f32
    %911 = vector.broadcast %cst_1259 : f32 to vector<16x8xf32>
    %c0_1260 = arith.constant 0 : index
    %c14_1261 = arith.constant 14 : index
    %c0_1262 = arith.constant 0 : index
    %c0_1263 = arith.constant 0 : index
    %912 = vector.load %arg1[%c0_1260, %c14_1261, %c0_1262, %c0_1263] : memref<1x18x18x4xf32, #tpu.memory_space<vmem>>, vector<1x1x16x4xf32>
    %913 = vector.shape_cast %912 : vector<1x1x16x4xf32> to vector<16x4xf32>
    %c0_1264 = arith.constant 0 : index
    %c0_1265 = arith.constant 0 : index
    %c0_1266 = arith.constant 0 : index
    %c0_1267 = arith.constant 0 : index
    %914 = vector.load %arg2[%c0_1264, %c0_1265, %c0_1266, %c0_1267] : memref<3x3x4x8xf32, #tpu.memory_space<vmem>>, vector<1x1x4x8xf32>
    %915 = vector.shape_cast %914 : vector<1x1x4x8xf32> to vector<4x8xf32>
    %cst_1268 = arith.constant dense<0.000000e+00> : vector<16x8xf32>
    %916 = tpu.matmul %913, %915, %cst_1268 {dimension_numbers = #tpu.dot_dimension_numbers<[1], [0], [0], [1], [0, 0, 1, 1], [], []>} : vector<16x4xf32>, vector<4x8xf32>, vector<16x8xf32> -> vector<16x8xf32>
    %917 = arith.addf %911, %916 : vector<16x8xf32>
    %c0_1269 = arith.constant 0 : index
    %c14_1270 = arith.constant 14 : index
    %c1_1271 = arith.constant 1 : index
    %c0_1272 = arith.constant 0 : index
    %918 = vector.load %arg1[%c0_1269, %c14_1270, %c1_1271, %c0_1272] : memref<1x18x18x4xf32, #tpu.memory_space<vmem>>, vector<1x1x16x4xf32>
    %919 = vector.shape_cast %918 : vector<1x1x16x4xf32> to vector<16x4xf32>
    %c0_1273 = arith.constant 0 : index
    %c1_1274 = arith.constant 1 : index
    %c0_1275 = arith.constant 0 : index
    %c0_1276 = arith.constant 0 : index
    %920 = vector.load %arg2[%c0_1273, %c1_1274, %c0_1275, %c0_1276] : memref<3x3x4x8xf32, #tpu.memory_space<vmem>>, vector<1x1x4x8xf32>
    %921 = vector.shape_cast %920 : vector<1x1x4x8xf32> to vector<4x8xf32>
    %cst_1277 = arith.constant dense<0.000000e+00> : vector<16x8xf32>
    %922 = tpu.matmul %919, %921, %cst_1277 {dimension_numbers = #tpu.dot_dimension_numbers<[1], [0], [0], [1], [0, 0, 1, 1], [], []>} : vector<16x4xf32>, vector<4x8xf32>, vector<16x8xf32> -> vector<16x8xf32>
    %923 = arith.addf %917, %922 : vector<16x8xf32>
    %c0_1278 = arith.constant 0 : index
    %c14_1279 = arith.constant 14 : index
    %c2_1280 = arith.constant 2 : index
    %c0_1281 = arith.constant 0 : index
    %924 = vector.load %arg1[%c0_1278, %c14_1279, %c2_1280, %c0_1281] : memref<1x18x18x4xf32, #tpu.memory_space<vmem>>, vector<1x1x16x4xf32>
    %925 = vector.shape_cast %924 : vector<1x1x16x4xf32> to vector<16x4xf32>
    %c0_1282 = arith.constant 0 : index
    %c2_1283 = arith.constant 2 : index
    %c0_1284 = arith.constant 0 : index
    %c0_1285 = arith.constant 0 : index
    %926 = vector.load %arg2[%c0_1282, %c2_1283, %c0_1284, %c0_1285] : memref<3x3x4x8xf32, #tpu.memory_space<vmem>>, vector<1x1x4x8xf32>
    %927 = vector.shape_cast %926 : vector<1x1x4x8xf32> to vector<4x8xf32>
    %cst_1286 = arith.constant dense<0.000000e+00> : vector<16x8xf32>
    %928 = tpu.matmul %925, %927, %cst_1286 {dimension_numbers = #tpu.dot_dimension_numbers<[1], [0], [0], [1], [0, 0, 1, 1], [], []>} : vector<16x4xf32>, vector<4x8xf32>, vector<16x8xf32> -> vector<16x8xf32>
    %929 = arith.addf %923, %928 : vector<16x8xf32>
    %c0_1287 = arith.constant 0 : index
    %c15_1288 = arith.constant 15 : index
    %c0_1289 = arith.constant 0 : index
    %c0_1290 = arith.constant 0 : index
    %930 = vector.load %arg1[%c0_1287, %c15_1288, %c0_1289, %c0_1290] : memref<1x18x18x4xf32, #tpu.memory_space<vmem>>, vector<1x1x16x4xf32>
    %931 = vector.shape_cast %930 : vector<1x1x16x4xf32> to vector<16x4xf32>
    %c1_1291 = arith.constant 1 : index
    %c0_1292 = arith.constant 0 : index
    %c0_1293 = arith.constant 0 : index
    %c0_1294 = arith.constant 0 : index
    %932 = vector.load %arg2[%c1_1291, %c0_1292, %c0_1293, %c0_1294] : memref<3x3x4x8xf32, #tpu.memory_space<vmem>>, vector<1x1x4x8xf32>
    %933 = vector.shape_cast %932 : vector<1x1x4x8xf32> to vector<4x8xf32>
    %cst_1295 = arith.constant dense<0.000000e+00> : vector<16x8xf32>
    %934 = tpu.matmul %931, %933, %cst_1295 {dimension_numbers = #tpu.dot_dimension_numbers<[1], [0], [0], [1], [0, 0, 1, 1], [], []>} : vector<16x4xf32>, vector<4x8xf32>, vector<16x8xf32> -> vector<16x8xf32>
    %935 = arith.addf %929, %934 : vector<16x8xf32>
    %c0_1296 = arith.constant 0 : index
    %c15_1297 = arith.constant 15 : index
    %c1_1298 = arith.constant 1 : index
    %c0_1299 = arith.constant 0 : index
    %936 = vector.load %arg1[%c0_1296, %c15_1297, %c1_1298, %c0_1299] : memref<1x18x18x4xf32, #tpu.memory_space<vmem>>, vector<1x1x16x4xf32>
    %937 = vector.shape_cast %936 : vector<1x1x16x4xf32> to vector<16x4xf32>
    %c1_1300 = arith.constant 1 : index
    %c1_1301 = arith.constant 1 : index
    %c0_1302 = arith.constant 0 : index
    %c0_1303 = arith.constant 0 : index
    %938 = vector.load %arg2[%c1_1300, %c1_1301, %c0_1302, %c0_1303] : memref<3x3x4x8xf32, #tpu.memory_space<vmem>>, vector<1x1x4x8xf32>
    %939 = vector.shape_cast %938 : vector<1x1x4x8xf32> to vector<4x8xf32>
    %cst_1304 = arith.constant dense<0.000000e+00> : vector<16x8xf32>
    %940 = tpu.matmul %937, %939, %cst_1304 {dimension_numbers = #tpu.dot_dimension_numbers<[1], [0], [0], [1], [0, 0, 1, 1], [], []>} : vector<16x4xf32>, vector<4x8xf32>, vector<16x8xf32> -> vector<16x8xf32>
    %941 = arith.addf %935, %940 : vector<16x8xf32>
    %c0_1305 = arith.constant 0 : index
    %c15_1306 = arith.constant 15 : index
    %c2_1307 = arith.constant 2 : index
    %c0_1308 = arith.constant 0 : index
    %942 = vector.load %arg1[%c0_1305, %c15_1306, %c2_1307, %c0_1308] : memref<1x18x18x4xf32, #tpu.memory_space<vmem>>, vector<1x1x16x4xf32>
    %943 = vector.shape_cast %942 : vector<1x1x16x4xf32> to vector<16x4xf32>
    %c1_1309 = arith.constant 1 : index
    %c2_1310 = arith.constant 2 : index
    %c0_1311 = arith.constant 0 : index
    %c0_1312 = arith.constant 0 : index
    %944 = vector.load %arg2[%c1_1309, %c2_1310, %c0_1311, %c0_1312] : memref<3x3x4x8xf32, #tpu.memory_space<vmem>>, vector<1x1x4x8xf32>
    %945 = vector.shape_cast %944 : vector<1x1x4x8xf32> to vector<4x8xf32>
    %cst_1313 = arith.constant dense<0.000000e+00> : vector<16x8xf32>
    %946 = tpu.matmul %943, %945, %cst_1313 {dimension_numbers = #tpu.dot_dimension_numbers<[1], [0], [0], [1], [0, 0, 1, 1], [], []>} : vector<16x4xf32>, vector<4x8xf32>, vector<16x8xf32> -> vector<16x8xf32>
    %947 = arith.addf %941, %946 : vector<16x8xf32>
    %c0_1314 = arith.constant 0 : index
    %c16 = arith.constant 16 : index
    %c0_1315 = arith.constant 0 : index
    %c0_1316 = arith.constant 0 : index
    %948 = vector.load %arg1[%c0_1314, %c16, %c0_1315, %c0_1316] : memref<1x18x18x4xf32, #tpu.memory_space<vmem>>, vector<1x1x16x4xf32>
    %949 = vector.shape_cast %948 : vector<1x1x16x4xf32> to vector<16x4xf32>
    %c2_1317 = arith.constant 2 : index
    %c0_1318 = arith.constant 0 : index
    %c0_1319 = arith.constant 0 : index
    %c0_1320 = arith.constant 0 : index
    %950 = vector.load %arg2[%c2_1317, %c0_1318, %c0_1319, %c0_1320] : memref<3x3x4x8xf32, #tpu.memory_space<vmem>>, vector<1x1x4x8xf32>
    %951 = vector.shape_cast %950 : vector<1x1x4x8xf32> to vector<4x8xf32>
    %cst_1321 = arith.constant dense<0.000000e+00> : vector<16x8xf32>
    %952 = tpu.matmul %949, %951, %cst_1321 {dimension_numbers = #tpu.dot_dimension_numbers<[1], [0], [0], [1], [0, 0, 1, 1], [], []>} : vector<16x4xf32>, vector<4x8xf32>, vector<16x8xf32> -> vector<16x8xf32>
    %953 = arith.addf %947, %952 : vector<16x8xf32>
    %c0_1322 = arith.constant 0 : index
    %c16_1323 = arith.constant 16 : index
    %c1_1324 = arith.constant 1 : index
    %c0_1325 = arith.constant 0 : index
    %954 = vector.load %arg1[%c0_1322, %c16_1323, %c1_1324, %c0_1325] : memref<1x18x18x4xf32, #tpu.memory_space<vmem>>, vector<1x1x16x4xf32>
    %955 = vector.shape_cast %954 : vector<1x1x16x4xf32> to vector<16x4xf32>
    %c2_1326 = arith.constant 2 : index
    %c1_1327 = arith.constant 1 : index
    %c0_1328 = arith.constant 0 : index
    %c0_1329 = arith.constant 0 : index
    %956 = vector.load %arg2[%c2_1326, %c1_1327, %c0_1328, %c0_1329] : memref<3x3x4x8xf32, #tpu.memory_space<vmem>>, vector<1x1x4x8xf32>
    %957 = vector.shape_cast %956 : vector<1x1x4x8xf32> to vector<4x8xf32>
    %cst_1330 = arith.constant dense<0.000000e+00> : vector<16x8xf32>
    %958 = tpu.matmul %955, %957, %cst_1330 {dimension_numbers = #tpu.dot_dimension_numbers<[1], [0], [0], [1], [0, 0, 1, 1], [], []>} : vector<16x4xf32>, vector<4x8xf32>, vector<16x8xf32> -> vector<16x8xf32>
    %959 = arith.addf %953, %958 : vector<16x8xf32>
    %c0_1331 = arith.constant 0 : index
    %c16_1332 = arith.constant 16 : index
    %c2_1333 = arith.constant 2 : index
    %c0_1334 = arith.constant 0 : index
    %960 = vector.load %arg1[%c0_1331, %c16_1332, %c2_1333, %c0_1334] : memref<1x18x18x4xf32, #tpu.memory_space<vmem>>, vector<1x1x16x4xf32>
    %961 = vector.shape_cast %960 : vector<1x1x16x4xf32> to vector<16x4xf32>
    %c2_1335 = arith.constant 2 : index
    %c2_1336 = arith.constant 2 : index
    %c0_1337 = arith.constant 0 : index
    %c0_1338 = arith.constant 0 : index
    %962 = vector.load %arg2[%c2_1335, %c2_1336, %c0_1337, %c0_1338] : memref<3x3x4x8xf32, #tpu.memory_space<vmem>>, vector<1x1x4x8xf32>
    %963 = vector.shape_cast %962 : vector<1x1x4x8xf32> to vector<4x8xf32>
    %cst_1339 = arith.constant dense<0.000000e+00> : vector<16x8xf32>
    %964 = tpu.matmul %961, %963, %cst_1339 {dimension_numbers = #tpu.dot_dimension_numbers<[1], [0], [0], [1], [0, 0, 1, 1], [], []>} : vector<16x4xf32>, vector<4x8xf32>, vector<16x8xf32> -> vector<16x8xf32>
    %965 = arith.addf %959, %964 : vector<16x8xf32>
    %966 = vector.broadcast %0 : vector<1x8xf32> to vector<16x8xf32>
    %967 = arith.addf %965, %966 : vector<16x8xf32>
    %cst_1340 = arith.constant 0.000000e+00 : f32
    %968 = vector.broadcast %cst_1340 : f32 to vector<16x8xf32>
    %969 = arith.maximumf %967, %968 : vector<16x8xf32>
    %c0_1341 = arith.constant 0 : index
    %c0_1342 = arith.constant 0 : index
    %970 = vector.load %arg5[%c0_1341, %c0_1342] : memref<16x8xf32, #tpu.memory_space<vmem>>, vector<16x8xf32>
    tpu.vector_store %arg5[%c0_1341, %c0_1342], %969 {strides = array<i32>} : memref<16x8xf32, #tpu.memory_space<vmem>>, vector<16x8xf32>,
    %c0_1343 = arith.constant 0 : index
    %c0_1344 = arith.constant 0 : index
    %971 = tpu.strided_load %arg5[%c0_1343, %c0_1344] {strides = array<i32: 2, 1>} : memref<16x8xf32, #tpu.memory_space<vmem>>, vector<8x8xf32>
    %c1_1345 = arith.constant 1 : index
    %c0_1346 = arith.constant 0 : index
    %972 = tpu.strided_load %arg5[%c1_1345, %c0_1346] {strides = array<i32: 2, 1>} : memref<16x8xf32, #tpu.memory_space<vmem>>, vector<8x8xf32>
    %973 = arith.maximumf %971, %972 : vector<8x8xf32>
    %cst_1347 = arith.constant 0.000000e+00 : f32
    %974 = vector.broadcast %cst_1347 : f32 to vector<16x8xf32>
    %c0_1348 = arith.constant 0 : index
    %c15_1349 = arith.constant 15 : index
    %c0_1350 = arith.constant 0 : index
    %c0_1351 = arith.constant 0 : index
    %975 = vector.load %arg1[%c0_1348, %c15_1349, %c0_1350, %c0_1351] : memref<1x18x18x4xf32, #tpu.memory_space<vmem>>, vector<1x1x16x4xf32>
    %976 = vector.shape_cast %975 : vector<1x1x16x4xf32> to vector<16x4xf32>
    %c0_1352 = arith.constant 0 : index
    %c0_1353 = arith.constant 0 : index
    %c0_1354 = arith.constant 0 : index
    %c0_1355 = arith.constant 0 : index
    %977 = vector.load %arg2[%c0_1352, %c0_1353, %c0_1354, %c0_1355] : memref<3x3x4x8xf32, #tpu.memory_space<vmem>>, vector<1x1x4x8xf32>
    %978 = vector.shape_cast %977 : vector<1x1x4x8xf32> to vector<4x8xf32>
    %cst_1356 = arith.constant dense<0.000000e+00> : vector<16x8xf32>
    %979 = tpu.matmul %976, %978, %cst_1356 {dimension_numbers = #tpu.dot_dimension_numbers<[1], [0], [0], [1], [0, 0, 1, 1], [], []>} : vector<16x4xf32>, vector<4x8xf32>, vector<16x8xf32> -> vector<16x8xf32>
    %980 = arith.addf %974, %979 : vector<16x8xf32>
    %c0_1357 = arith.constant 0 : index
    %c15_1358 = arith.constant 15 : index
    %c1_1359 = arith.constant 1 : index
    %c0_1360 = arith.constant 0 : index
    %981 = vector.load %arg1[%c0_1357, %c15_1358, %c1_1359, %c0_1360] : memref<1x18x18x4xf32, #tpu.memory_space<vmem>>, vector<1x1x16x4xf32>
    %982 = vector.shape_cast %981 : vector<1x1x16x4xf32> to vector<16x4xf32>
    %c0_1361 = arith.constant 0 : index
    %c1_1362 = arith.constant 1 : index
    %c0_1363 = arith.constant 0 : index
    %c0_1364 = arith.constant 0 : index
    %983 = vector.load %arg2[%c0_1361, %c1_1362, %c0_1363, %c0_1364] : memref<3x3x4x8xf32, #tpu.memory_space<vmem>>, vector<1x1x4x8xf32>
    %984 = vector.shape_cast %983 : vector<1x1x4x8xf32> to vector<4x8xf32>
    %cst_1365 = arith.constant dense<0.000000e+00> : vector<16x8xf32>
    %985 = tpu.matmul %982, %984, %cst_1365 {dimension_numbers = #tpu.dot_dimension_numbers<[1], [0], [0], [1], [0, 0, 1, 1], [], []>} : vector<16x4xf32>, vector<4x8xf32>, vector<16x8xf32> -> vector<16x8xf32>
    %986 = arith.addf %980, %985 : vector<16x8xf32>
    %c0_1366 = arith.constant 0 : index
    %c15_1367 = arith.constant 15 : index
    %c2_1368 = arith.constant 2 : index
    %c0_1369 = arith.constant 0 : index
    %987 = vector.load %arg1[%c0_1366, %c15_1367, %c2_1368, %c0_1369] : memref<1x18x18x4xf32, #tpu.memory_space<vmem>>, vector<1x1x16x4xf32>
    %988 = vector.shape_cast %987 : vector<1x1x16x4xf32> to vector<16x4xf32>
    %c0_1370 = arith.constant 0 : index
    %c2_1371 = arith.constant 2 : index
    %c0_1372 = arith.constant 0 : index
    %c0_1373 = arith.constant 0 : index
    %989 = vector.load %arg2[%c0_1370, %c2_1371, %c0_1372, %c0_1373] : memref<3x3x4x8xf32, #tpu.memory_space<vmem>>, vector<1x1x4x8xf32>
    %990 = vector.shape_cast %989 : vector<1x1x4x8xf32> to vector<4x8xf32>
    %cst_1374 = arith.constant dense<0.000000e+00> : vector<16x8xf32>
    %991 = tpu.matmul %988, %990, %cst_1374 {dimension_numbers = #tpu.dot_dimension_numbers<[1], [0], [0], [1], [0, 0, 1, 1], [], []>} : vector<16x4xf32>, vector<4x8xf32>, vector<16x8xf32> -> vector<16x8xf32>
    %992 = arith.addf %986, %991 : vector<16x8xf32>
    %c0_1375 = arith.constant 0 : index
    %c16_1376 = arith.constant 16 : index
    %c0_1377 = arith.constant 0 : index
    %c0_1378 = arith.constant 0 : index
    %993 = vector.load %arg1[%c0_1375, %c16_1376, %c0_1377, %c0_1378] : memref<1x18x18x4xf32, #tpu.memory_space<vmem>>, vector<1x1x16x4xf32>
    %994 = vector.shape_cast %993 : vector<1x1x16x4xf32> to vector<16x4xf32>
    %c1_1379 = arith.constant 1 : index
    %c0_1380 = arith.constant 0 : index
    %c0_1381 = arith.constant 0 : index
    %c0_1382 = arith.constant 0 : index
    %995 = vector.load %arg2[%c1_1379, %c0_1380, %c0_1381, %c0_1382] : memref<3x3x4x8xf32, #tpu.memory_space<vmem>>, vector<1x1x4x8xf32>
    %996 = vector.shape_cast %995 : vector<1x1x4x8xf32> to vector<4x8xf32>
    %cst_1383 = arith.constant dense<0.000000e+00> : vector<16x8xf32>
    %997 = tpu.matmul %994, %996, %cst_1383 {dimension_numbers = #tpu.dot_dimension_numbers<[1], [0], [0], [1], [0, 0, 1, 1], [], []>} : vector<16x4xf32>, vector<4x8xf32>, vector<16x8xf32> -> vector<16x8xf32>
    %998 = arith.addf %992, %997 : vector<16x8xf32>
    %c0_1384 = arith.constant 0 : index
    %c16_1385 = arith.constant 16 : index
    %c1_1386 = arith.constant 1 : index
    %c0_1387 = arith.constant 0 : index
    %999 = vector.load %arg1[%c0_1384, %c16_1385, %c1_1386, %c0_1387] : memref<1x18x18x4xf32, #tpu.memory_space<vmem>>, vector<1x1x16x4xf32>
    %1000 = vector.shape_cast %999 : vector<1x1x16x4xf32> to vector<16x4xf32>
    %c1_1388 = arith.constant 1 : index
    %c1_1389 = arith.constant 1 : index
    %c0_1390 = arith.constant 0 : index
    %c0_1391 = arith.constant 0 : index
    %1001 = vector.load %arg2[%c1_1388, %c1_1389, %c0_1390, %c0_1391] : memref<3x3x4x8xf32, #tpu.memory_space<vmem>>, vector<1x1x4x8xf32>
    %1002 = vector.shape_cast %1001 : vector<1x1x4x8xf32> to vector<4x8xf32>
    %cst_1392 = arith.constant dense<0.000000e+00> : vector<16x8xf32>
    %1003 = tpu.matmul %1000, %1002, %cst_1392 {dimension_numbers = #tpu.dot_dimension_numbers<[1], [0], [0], [1], [0, 0, 1, 1], [], []>} : vector<16x4xf32>, vector<4x8xf32>, vector<16x8xf32> -> vector<16x8xf32>
    %1004 = arith.addf %998, %1003 : vector<16x8xf32>
    %c0_1393 = arith.constant 0 : index
    %c16_1394 = arith.constant 16 : index
    %c2_1395 = arith.constant 2 : index
    %c0_1396 = arith.constant 0 : index
    %1005 = vector.load %arg1[%c0_1393, %c16_1394, %c2_1395, %c0_1396] : memref<1x18x18x4xf32, #tpu.memory_space<vmem>>, vector<1x1x16x4xf32>
    %1006 = vector.shape_cast %1005 : vector<1x1x16x4xf32> to vector<16x4xf32>
    %c1_1397 = arith.constant 1 : index
    %c2_1398 = arith.constant 2 : index
    %c0_1399 = arith.constant 0 : index
    %c0_1400 = arith.constant 0 : index
    %1007 = vector.load %arg2[%c1_1397, %c2_1398, %c0_1399, %c0_1400] : memref<3x3x4x8xf32, #tpu.memory_space<vmem>>, vector<1x1x4x8xf32>
    %1008 = vector.shape_cast %1007 : vector<1x1x4x8xf32> to vector<4x8xf32>
    %cst_1401 = arith.constant dense<0.000000e+00> : vector<16x8xf32>
    %1009 = tpu.matmul %1006, %1008, %cst_1401 {dimension_numbers = #tpu.dot_dimension_numbers<[1], [0], [0], [1], [0, 0, 1, 1], [], []>} : vector<16x4xf32>, vector<4x8xf32>, vector<16x8xf32> -> vector<16x8xf32>
    %1010 = arith.addf %1004, %1009 : vector<16x8xf32>
    %c0_1402 = arith.constant 0 : index
    %c17 = arith.constant 17 : index
    %c0_1403 = arith.constant 0 : index
    %c0_1404 = arith.constant 0 : index
    %1011 = vector.load %arg1[%c0_1402, %c17, %c0_1403, %c0_1404] : memref<1x18x18x4xf32, #tpu.memory_space<vmem>>, vector<1x1x16x4xf32>
    %1012 = vector.shape_cast %1011 : vector<1x1x16x4xf32> to vector<16x4xf32>
    %c2_1405 = arith.constant 2 : index
    %c0_1406 = arith.constant 0 : index
    %c0_1407 = arith.constant 0 : index
    %c0_1408 = arith.constant 0 : index
    %1013 = vector.load %arg2[%c2_1405, %c0_1406, %c0_1407, %c0_1408] : memref<3x3x4x8xf32, #tpu.memory_space<vmem>>, vector<1x1x4x8xf32>
    %1014 = vector.shape_cast %1013 : vector<1x1x4x8xf32> to vector<4x8xf32>
    %cst_1409 = arith.constant dense<0.000000e+00> : vector<16x8xf32>
    %1015 = tpu.matmul %1012, %1014, %cst_1409 {dimension_numbers = #tpu.dot_dimension_numbers<[1], [0], [0], [1], [0, 0, 1, 1], [], []>} : vector<16x4xf32>, vector<4x8xf32>, vector<16x8xf32> -> vector<16x8xf32>
    %1016 = arith.addf %1010, %1015 : vector<16x8xf32>
    %c0_1410 = arith.constant 0 : index
    %c17_1411 = arith.constant 17 : index
    %c1_1412 = arith.constant 1 : index
    %c0_1413 = arith.constant 0 : index
    %1017 = vector.load %arg1[%c0_1410, %c17_1411, %c1_1412, %c0_1413] : memref<1x18x18x4xf32, #tpu.memory_space<vmem>>, vector<1x1x16x4xf32>
    %1018 = vector.shape_cast %1017 : vector<1x1x16x4xf32> to vector<16x4xf32>
    %c2_1414 = arith.constant 2 : index
    %c1_1415 = arith.constant 1 : index
    %c0_1416 = arith.constant 0 : index
    %c0_1417 = arith.constant 0 : index
    %1019 = vector.load %arg2[%c2_1414, %c1_1415, %c0_1416, %c0_1417] : memref<3x3x4x8xf32, #tpu.memory_space<vmem>>, vector<1x1x4x8xf32>
    %1020 = vector.shape_cast %1019 : vector<1x1x4x8xf32> to vector<4x8xf32>
    %cst_1418 = arith.constant dense<0.000000e+00> : vector<16x8xf32>
    %1021 = tpu.matmul %1018, %1020, %cst_1418 {dimension_numbers = #tpu.dot_dimension_numbers<[1], [0], [0], [1], [0, 0, 1, 1], [], []>} : vector<16x4xf32>, vector<4x8xf32>, vector<16x8xf32> -> vector<16x8xf32>
    %1022 = arith.addf %1016, %1021 : vector<16x8xf32>
    %c0_1419 = arith.constant 0 : index
    %c17_1420 = arith.constant 17 : index
    %c2_1421 = arith.constant 2 : index
    %c0_1422 = arith.constant 0 : index
    %1023 = vector.load %arg1[%c0_1419, %c17_1420, %c2_1421, %c0_1422] : memref<1x18x18x4xf32, #tpu.memory_space<vmem>>, vector<1x1x16x4xf32>
    %1024 = vector.shape_cast %1023 : vector<1x1x16x4xf32> to vector<16x4xf32>
    %c2_1423 = arith.constant 2 : index
    %c2_1424 = arith.constant 2 : index
    %c0_1425 = arith.constant 0 : index
    %c0_1426 = arith.constant 0 : index
    %1025 = vector.load %arg2[%c2_1423, %c2_1424, %c0_1425, %c0_1426] : memref<3x3x4x8xf32, #tpu.memory_space<vmem>>, vector<1x1x4x8xf32>
    %1026 = vector.shape_cast %1025 : vector<1x1x4x8xf32> to vector<4x8xf32>
    %cst_1427 = arith.constant dense<0.000000e+00> : vector<16x8xf32>
    %1027 = tpu.matmul %1024, %1026, %cst_1427 {dimension_numbers = #tpu.dot_dimension_numbers<[1], [0], [0], [1], [0, 0, 1, 1], [], []>} : vector<16x4xf32>, vector<4x8xf32>, vector<16x8xf32> -> vector<16x8xf32>
    %1028 = arith.addf %1022, %1027 : vector<16x8xf32>
    %1029 = vector.broadcast %0 : vector<1x8xf32> to vector<16x8xf32>
    %1030 = arith.addf %1028, %1029 : vector<16x8xf32>
    %cst_1428 = arith.constant 0.000000e+00 : f32
    %1031 = vector.broadcast %cst_1428 : f32 to vector<16x8xf32>
    %1032 = arith.maximumf %1030, %1031 : vector<16x8xf32>
    %c0_1429 = arith.constant 0 : index
    %c0_1430 = arith.constant 0 : index
    %1033 = vector.load %arg5[%c0_1429, %c0_1430] : memref<16x8xf32, #tpu.memory_space<vmem>>, vector<16x8xf32>
    tpu.vector_store %arg5[%c0_1429, %c0_1430], %1032 {strides = array<i32>} : memref<16x8xf32, #tpu.memory_space<vmem>>, vector<16x8xf32>,
    %c0_1431 = arith.constant 0 : index
    %c0_1432 = arith.constant 0 : index
    %1034 = tpu.strided_load %arg5[%c0_1431, %c0_1432] {strides = array<i32: 2, 1>} : memref<16x8xf32, #tpu.memory_space<vmem>>, vector<8x8xf32>
    %c1_1433 = arith.constant 1 : index
    %c0_1434 = arith.constant 0 : index
    %1035 = tpu.strided_load %arg5[%c1_1433, %c0_1434] {strides = array<i32: 2, 1>} : memref<16x8xf32, #tpu.memory_space<vmem>>, vector<8x8xf32>
    %1036 = arith.maximumf %1034, %1035 : vector<8x8xf32>
    %1037 = arith.maximumf %973, %1036 : vector<8x8xf32>
    %c0_1435 = arith.constant 0 : index
    %c7_1436 = arith.constant 7 : index
    %c0_1437 = arith.constant 0 : index
    %c0_1438 = arith.constant 0 : index
    %1038 = vector.load %arg4[%c0_1435, %c7_1436, %c0_1437, %c0_1438] : memref<1x8x8x8xf32, #tpu.memory_space<vmem>>, vector<1x1x8x8xf32>
    %1039 = vector.shape_cast %1038 : vector<1x1x8x8xf32> to vector<8x8xf32>
    %1040 = vector.shape_cast %1037 : vector<8x8xf32> to vector<1x1x8x8xf32>
    tpu.vector_store %arg4[%c0_1435, %c7_1436, %c0_1437, %c0_1438], %1040 {strides = array<i32>} : memref<1x8x8x8xf32, #tpu.memory_space<vmem>>, vector<1x1x8x8xf32>,
    return
  }
  func.func @transform_0(%arg0: i32) -> (i32, i32, i32, i32) {
    %c0_i32 = arith.constant 0 : i32
    %c0_i32_0 = arith.constant 0 : i32
    %c0_i32_1 = arith.constant 0 : i32
    %c0_i32_2 = arith.constant 0 : i32
    return %arg0, %c0_i32, %c0_i32_0, %c0_i32_1 : i32, i32, i32, i32
  }
  func.func @transform_1(%arg0: i32) -> (i32, i32, i32, i32) {
    %c0_i32 = arith.constant 0 : i32
    %c0_i32_0 = arith.constant 0 : i32
    %c0_i32_1 = arith.constant 0 : i32
    %c0_i32_2 = arith.constant 0 : i32
    %c0_i32_3 = arith.constant 0 : i32
    return %c0_i32, %c0_i32_0, %c0_i32_1, %c0_i32_2 : i32, i32, i32, i32
  }
  func.func @transform_2(%arg0: i32) -> (i32, i32) {
    %c0_i32 = arith.constant 0 : i32
    %c0_i32_0 = arith.constant 0 : i32
    %c0_i32_1 = arith.constant 0 : i32
    return %c0_i32, %c0_i32_0 : i32, i32
  }
  func.func @transform_3(%arg0: i32) -> (i32, i32, i32, i32) {
    %c0_i32 = arith.constant 0 : i32
    %c0_i32_0 = arith.constant 0 : i32
    %c0_i32_1 = arith.constant 0 : i32
    %c0_i32_2 = arith.constant 0 : i32
    return %arg0, %c0_i32, %c0_i32_0, %c0_i32_1 : i32, i32, i32, i32
  }
}

</mosaic_0001>

<bundles_post_ra>
// kernel: conv_block.1
= control target key start
LH: loop header
LB: loop body
LE: loop exit
PB: predicated region body
PF: predicated region fallthrough
CT: control target
= control target key end

     0   :  { %s15488_s12 = smov 0   ;;  %s17070_s0 = inlined_call_operand.vmem [shape: f32[2,18,18,4], index: 0, kind: input, shape index: {}]   ;;  %s17071_s1 = inlined_call_operand.vmem [shape: f32[3,3,4,8], index: 1, kind: input, shape index: {}]   ;;  %s17072_s2 = inlined_call_operand.vmem [shape: f32[1,8], index: 2, kind: input, shape index: {}]   ;;  %s17073_s3 = inlined_call_operand.vmem [shape: f32[2,8,8,8], index: 3, kind: output, shape index: {}]  }
   0x1 LB: > { %s13181_s13 = sadd.s32 4294967295, %s15466_s12   ;;  %p13185_p0 = scmp.ge.s32.totalorder %s15466_s12, 1  ;;  %s15466_s12 = sphi %s15488_s12, %s13_s12  }
   0x2   : > { %p137_p1 = scmp.lt.s32.totalorder %s15466_s12, 3 }
   0x4   : > { %p138_p2 = pnand %p13185_p0, %p137_p1 }
   0x5   : > { %v13189_v0 = vld [vmem:[%s17071_s1 + $0x4] sm:$0xf] (!%p138_p2)  ;;  %vm186_vm0 = vcmask (!%p138_p2), 1043456   ;;  %p161_p3 = scmp.lt.s32.totalorder (!%p138_p2), %s13181_s13, 1  ;;  %v174_v2 = vld [vmem:[%s17071_s1] sm:$0xf] (!%p138_p2) }
   0x6   : > { %141 = sbr.rel (%p138_p2) target bundleno = 797 (0x31d), region = 32  ;;  %v13241_v1 = vld [vmem:[%s17071_s1 + $0x4] sm:$0xf] (!%p138_p2)  ;;  %14474 = vmatprep.subr.msk.mxu0 (!%p138_p2), %vm186_vm0, %v13189_v0  ;;  %v1000_v3 = vld [vmem:[%s17071_s1] sm:$0xf] (!%p138_p2)  ;;  %vm179_vm1 = vcmask (!%p138_p2), 31744  }
   0x7   : > { %14519 = vmatprep.subr.msk.mxu1 (!%p138_p2), %vm186_vm0, %v13241_v1  ;;  %14475 = vmatpush3.msk.msra.mxu0 (!%p138_p2), %vm186_vm0, %v13189_v0  ;;  %v13196_v9 = vld [vmem:[%s17071_s1 + $0x8] sm:$0xf] (!%p138_p2)  ;;  %v13202_v15 = vld [vmem:[%s17071_s1 + $0xc] sm:$0xf] (!%p138_p2)  ;;  %v13208_v20 = vld [vmem:[%s17071_s1 + $0x10] sm:$0xf] (!%p138_p2) }
   0x8   : > { %14520 = vmatpush3.msk.msra.mxu1 (!%p138_p2), %vm186_vm0, %v13241_v1  ;;  %14479 = vmatprep.subr.msk.mxu0 (!%p138_p2), %vm186_vm0, %v174_v2  ;;  %v13250_v11 = vld [vmem:[%s17071_s1 + $0x8] sm:$0xf] (!%p138_p2)  ;;  %v13256_v17 = vld [vmem:[%s17071_s1 + $0xc] sm:$0xf] (!%p138_p2)  ;;  %v13262_v22 = vld [vmem:[%s17071_s1 + $0x10] sm:$0xf] (!%p138_p2) }
   0x9   : > { %14524 = vmatprep.subr.msk.mxu1 (!%p138_p2), %vm186_vm0, %v1000_v3  ;;  %v13214_v24 = vld [vmem:[%s17071_s1 + $0x14] sm:$0xf] (!%p138_p2)  ;;  %v13220_v28 = vld [vmem:[%s17071_s1 + $0x18] sm:$0xf] (!%p138_p2)  ;;  %v13226_v32 = vld [vmem:[%s17071_s1 + $0x1c] sm:$0xf] (!%p138_p2) }
   0xa   : > { %v13268_v26 = vld [vmem:[%s17071_s1 + $0x14] sm:$0xf] (!%p138_p2)  ;;  %v13274_v30 = vld [vmem:[%s17071_s1 + $0x18] sm:$0xf] (!%p138_p2)  ;;  %v13280_v34 = vld [vmem:[%s17071_s1 + $0x1c] sm:$0xf] (!%p138_p2) }
   0xb   : > { %v13232_v36 = vld [vmem:[%s17071_s1 + $0x20] sm:$0xf] (!%p138_p2)  ;;  %v13294_v41 = vld [vmem:[%s17071_s1 + $0x4] sm:$0xf] (!%p138_p2)  ;;  %v13303_v46 = vld [vmem:[%s17071_s1 + $0x8] sm:$0xf] (!%p138_p2) }
   0xc   : > { %v13286_v38 = vld [vmem:[%s17071_s1 + $0x20] sm:$0xf] (!%p138_p2)  ;;  %v13347_v42 = vld [vmem:[%s17071_s1 + $0x4] sm:$0xf] (!%p138_p2)  ;;  %v13356_v47 = vld [vmem:[%s17071_s1 + $0x8] sm:$0xf] (!%p138_p2) }
   0xd   : > { %s17075_s13 = smov (!%p161_p3, %s13181_s13), 1  ;;  %v1809_v44 = vld [vmem:[%s17071_s1] sm:$0xf]  ;;  %v13309_v48 = vld [vmem:[%s17071_s1 + $0xc] sm:$0xf]  ;;  %vm991_vm2 = vcmask 64512  }
   0xe   : > { %s15450_s22 = smul.u32 432, %s17075_s13  ;;  %v2616_v45 = vld [vmem:[%s17071_s1] sm:$0xf]  ;;  %v13362_v49 = vld [vmem:[%s17071_s1 + $0xc] sm:$0xf]  ;;  %s14041_s17 = sshll.u32 %s17075_s13, 6 }
   0xf   : > { %v13315_v50 = vld [vmem:[%s17071_s1 + $0x10] sm:$0xf]  ;;  %v13321_v54 = vld [vmem:[%s17071_s1 + $0x14] sm:$0xf]  ;;  %v13327_v58 = vld [vmem:[%s17071_s1 + $0x18] sm:$0xf]  ;;  %s16367_s21 = scalar_lea.vmem %s17073_s3, %s14041_s17 }
  0x10   : > { %s15520_s25 = scalar_lea.vmem %s17070_s0, %s15450_s22  ;;  %v13368_v52 = vld [vmem:[%s17071_s1 + $0x10] sm:$0xf]  ;;  %v13374_v56 = vld [vmem:[%s17071_s1 + $0x14] sm:$0xf]  ;;  %v13380_v60 = vld [vmem:[%s17071_s1 + $0x18] sm:$0xf] }
  0x11   : > { %v175_v4 = vld [vmem:[%s15520_s25 + $0x1] sm:$0xff]  ;;  %v13239_v5 = vld [vmem:[%s15520_s25 + $0x19] sm:$0xff]  ;;  %v176_v6 = vld [vmem:[%s15520_s25 + $0x9] sm:$0xff] }
  0x12   : > { %14476 = vmatprep.mubr.msk.f32.mxu0 %vm179_vm1, %v175_v4  ;;  %14521 = vmatprep.mubr.msk.f32.mxu1 %vm179_vm1, %v13239_v5  ;;  %v13240_v7 = vld [vmem:[%s15520_s25 + $0x21] sm:$0xff]  ;;  %v13237_v10 = vld [vmem:[%s15520_s25 + $0x18] sm:$0xff]  ;;  %v350_v18 = vld [vmem:[%s15520_s25 + $0xa] sm:$0xff] }
  0x13   : > { %v172_v8 = vld [vmem:[%s15520_s25] sm:$0xff]  ;;  %14477 = vmatmul.mubr.msk.f32.vlgmr.msra.gmra.mrb[0].mxu0 %vm179_vm1, %v176_v6  ;;  %14522 = vmatmul.mubr.msk.f32.vlgmr.msra.gmra.mrb[0].mxu1 %vm179_vm1, %v13240_v7  ;;  %v173_v12 = vld [vmem:[%s15520_s25 + $0x8] sm:$0xff]  ;;  %v15570_v21 = vld [vmem:[%s15520_s25 + $0x30] sm:$0xff] }
  0x14   : > { %14480 = vmatpush3.msk.msra.mxu0 %vm186_vm0, %v174_v2  ;;  %14481 = vmatprep.mubr.msk.f32.mxu0 %vm179_vm1, %v172_v8  ;;  %v13238_v13 = vld [vmem:[%s15520_s25 + $0x20] sm:$0xff]  ;;  %v15583_v23 = vld [vmem:[%s15520_s25 + $0x38] sm:$0xff]  ;;  %v15630_v33 = vld [vmem:[%s15520_s25 + $0x48] sm:$0xff] }
  0x15   : > { %14484 = vmatprep.subr.msk.mxu0 %vm186_vm0, %v13196_v9  ;;  %14525 = vmatpush3.msk.msra.mxu1 %vm186_vm0, %v1000_v3  ;;  %v349_v14 = vld [vmem:[%s15520_s25 + $0x2] sm:$0xff]  ;;  %v13248_v16 = vld [vmem:[%s15520_s25 + $0x1a] sm:$0xff]  ;;  %v13260_v25 = vld [vmem:[%s15520_s25 + $0x31] sm:$0xff] }
  0x16   : > { %14526 = vmatprep.mubr.msk.f32.mxu1 %vm179_vm1, %v13237_v10  ;;  %14529 = vmatprep.subr.msk.mxu1 %vm186_vm0, %v13250_v11  ;;  %v13249_v19 = vld [vmem:[%s15520_s25 + $0x22] sm:$0xff]  ;;  %v13261_v27 = vld [vmem:[%s15520_s25 + $0x39] sm:$0xff]  ;;  %v15644_v35 = vld [vmem:[%s15520_s25 + $0x50] sm:$0xff] }
  0x17   : > { %v15608_v29 = vld [vmem:[%s15520_s25 + $0x32] sm:$0xff]  ;;  %v15621_v31 = vld [vmem:[%s15520_s25 + $0x3a] sm:$0xff]  ;;  %v15654_v37 = vld [vmem:[%s15520_s25 + $0x49] sm:$0xff] }
  0x18   : > { %v15667_v39 = vld [vmem:[%s15520_s25 + $0x51] sm:$0xff]  ;;  %v15752_v51 = vld [vmem:[%s15520_s25 + $0x60] sm:$0xff]  ;;  %v15766_v53 = vld [vmem:[%s15520_s25 + $0x68] sm:$0xff] }
  0x19   : > { %v15670_v40 = vld [vmem:[%s15520_s25 + $0x4a] sm:$0xff]  ;;  %v15690_v43 = vld [vmem:[%s15520_s25 + $0x52] sm:$0xff]  ;;  %v13366_v55 = vld [vmem:[%s15520_s25 + $0x61] sm:$0xff] }
  0x1a   : > { %v13367_v57 = vld [vmem:[%s15520_s25 + $0x69] sm:$0xff]  ;;  %v13333_v62 = vld [vmem:[%s17071_s1 + $0x1c] sm:$0xf]  ;;  %v15832_v1 = vld [vmem:[%s15520_s25 + $0x80] sm:$0xff] }
  0x1b   : > { %14482 = vmatmul.mubr.msk.f32.vlgmr.msra.gmra.mrb[0].mxu0 %vm179_vm1, %v173_v12  ;;  %14527 = vmatmul.mubr.msk.f32.vlgmr.msra.gmra.mrb[0].mxu1 %vm179_vm1, %v13238_v13  ;;  %v15794_v59 = vld [vmem:[%s15520_s25 + $0x62] sm:$0xff]  ;;  %v15808_v61 = vld [vmem:[%s15520_s25 + $0x6a] sm:$0xff]  ;;  %v15818_v63 = vld [vmem:[%s15520_s25 + $0x78] sm:$0xff] }
  0x1c   : > { %14485 = vmatpush3.msk.msra.mxu0 %vm186_vm0, %v13196_v9  ;;  %14486 = vmatprep.mubr.msk.f32.mxu0 %vm179_vm1, %v349_v14  ;;  %v13386_v0 = vld [vmem:[%s17071_s1 + $0x1c] sm:$0xf]  ;;  %v13339_v2 = vld [vmem:[%s17071_s1 + $0x20] sm:$0xf]  ;;  %v13454_v8 = vld [vmem:[%s17071_s1 + $0x4] sm:$0xf] }
  0x1d   : > { %14489 = vmatprep.subr.msk.mxu0 %vm186_vm0, %v13202_v15  ;;  %14530 = vmatpush3.msk.msra.mxu1 %vm186_vm0, %v13250_v11  ;;  %v15842_v3 = vld [vmem:[%s15520_s25 + $0x79] sm:$0xff]  ;;  %v15878_v9 = vld [vmem:[%s15520_s25 + $0x82] sm:$0xff]  ;;  %v13416_v14 = vld [vmem:[%s17071_s1 + $0xc] sm:$0xf] }
  0x1e   : > { %14531 = vmatprep.mubr.msk.f32.mxu1 %vm179_vm1, %v13248_v16  ;;  %14534 = vmatprep.subr.msk.mxu1 %vm186_vm0, %v13256_v17  ;;  %v13392_v4 = vld [vmem:[%s17071_s1 + $0x20] sm:$0xf]  ;;  %v13410_v12 = vld [vmem:[%s17071_s1 + $0x8] sm:$0xf] }
  0x1f   : > { %v15858_v6 = vld [vmem:[%s15520_s25 + $0x7a] sm:$0xff] }
  0x20   : > { %v4233_v11 = vld [vmem:[%s17071_s1] sm:$0xf] }
  0x23   : > { %14487 = vmatmul.mubr.msk.f32.vlgmr.msra.gmra.mrb[0].mxu0 %vm179_vm1, %v350_v18  ;;  %14532 = vmatmul.mubr.msk.f32.vlgmr.msra.gmra.mrb[0].mxu1 %vm179_vm1, %v13249_v19  ;;  %v13475_v18 = vld [vmem:[%s17071_s1 + $0x10] sm:$0xf] }
  0x24   : > { %14490 = vmatpush3.msk.msra.mxu0 %vm186_vm0, %v13202_v15  ;;  %14491 = vmatprep.mubr.msk.f32.mxu0 %vm179_vm1, %v13237_v10  ;;  %v3426_v10 = vld [vmem:[%s17071_s1] sm:$0xf]  ;;  %v13469_v15 = vld [vmem:[%s17071_s1 + $0xc] sm:$0xf] }
  0x25   : > { %14494 = vmatprep.subr.msk.mxu0 %vm186_vm0, %v13208_v20  ;;  %14535 = vmatpush3.msk.msra.mxu1 %vm186_vm0, %v13256_v17  ;;  %v15940_v17 = vld [vmem:[%s15520_s25 + $0x90] sm:$0xff] }
  0x26   : > { %14536 = vmatprep.mubr.msk.f32.mxu1 %vm179_vm1, %v15570_v21  ;;  %14539 = vmatprep.subr.msk.mxu1 %vm186_vm0, %v13262_v22 }
  0x2b   : > { %14492 = vmatmul.mubr.msk.f32.vlgmr.msra.gmra.mrb[0].mxu0 %vm179_vm1, %v13238_v13  ;;  %14537 = vmatmul.mubr.msk.f32.vlgmr.msra.gmra.mrb[0].mxu1 %vm179_vm1, %v15583_v23  ;;  %v13463_v13 = vld [vmem:[%s17071_s1 + $0x8] sm:$0xf] }
  0x2c   : > { %14495 = vmatpush3.msk.msra.mxu0 %vm186_vm0, %v13208_v20  ;;  %14496 = vmatprep.mubr.msk.f32.mxu0 %vm179_vm1, %v13239_v5  ;;  %v15855_v5 = vld [vmem:[%s15520_s25 + $0x81] sm:$0xff]  ;;  %v13428_v20 = vld [vmem:[%s17071_s1 + $0x14] sm:$0xf] }
  0x2d   : > { %14499 = vmatprep.subr.msk.mxu0 %vm186_vm0, %v13214_v24  ;;  %14540 = vmatpush3.msk.msra.mxu1 %vm186_vm0, %v13262_v22  ;;  %v13481_v22 = vld [vmem:[%s17071_s1 + $0x14] sm:$0xf] }
  0x2e   : > { %14541 = vmatprep.mubr.msk.f32.mxu1 %vm179_vm1, %v13260_v25  ;;  %14544 = vmatprep.subr.msk.mxu1 %vm186_vm0, %v13268_v26 }
  0x33   : > { %14497 = vmatmul.mubr.msk.f32.vlgmr.msra.gmra.mrb[0].mxu0 %vm179_vm1, %v13240_v7  ;;  %14542 = vmatmul.mubr.msk.f32.vlgmr.msra.gmra.mrb[0].mxu1 %vm179_vm1, %v13261_v27  ;;  %v13401_v7 = vld [vmem:[%s17071_s1 + $0x4] sm:$0xf] }
  0x34   : > { %14500 = vmatpush3.msk.msra.mxu0 %vm186_vm0, %v13214_v24  ;;  %14501 = vmatprep.mubr.msk.f32.mxu0 %vm179_vm1, %v13248_v16  ;;  %v13422_v16 = vld [vmem:[%s17071_s1 + $0x10] sm:$0xf]  ;;  %v13434_v24 = vld [vmem:[%s17071_s1 + $0x18] sm:$0xf] }
  0x35   : > { %14504 = vmatprep.subr.msk.mxu0 %vm186_vm0, %v13220_v28  ;;  %14545 = vmatpush3.msk.msra.mxu1 %vm186_vm0, %v13268_v26  ;;  %v13487_v26 = vld [vmem:[%s17071_s1 + $0x18] sm:$0xf] }
  0x36   : > { %14546 = vmatprep.mubr.msk.f32.mxu1 %vm179_vm1, %v15608_v29  ;;  %14549 = vmatprep.subr.msk.mxu1 %vm186_vm0, %v13274_v30 }
  0x3b   : > { %14502 = vmatmul.mubr.msk.f32.vlgmr.msra.gmra.mrb[0].mxu0 %vm179_vm1, %v13249_v19  ;;  %14547 = vmatmul.mubr.msk.f32.vlgmr.msra.gmra.mrb[0].mxu1 %vm179_vm1, %v15621_v31  ;;  %v15954_v19 = vld [vmem:[%s15520_s25 + $0x98] sm:$0xff] }
  0x3c   : > { %14505 = vmatpush3.msk.msra.mxu0 %vm186_vm0, %v13220_v28  ;;  %14506 = vmatprep.mubr.msk.f32.mxu0 %vm179_vm1, %v15570_v21  ;;  %v13440_v28 = vld [vmem:[%s17071_s1 + $0x1c] sm:$0xf] }
  0x3d   : > { %14509 = vmatprep.subr.msk.mxu0 %vm186_vm0, %v13226_v32  ;;  %14550 = vmatpush3.msk.msra.mxu1 %vm186_vm0, %v13274_v30  ;;  %v13493_v30 = vld [vmem:[%s17071_s1 + $0x1c] sm:$0xf] }
  0x3e   : > { %14551 = vmatprep.mubr.msk.f32.mxu1 %vm179_vm1, %v15630_v33  ;;  %14554 = vmatprep.subr.msk.mxu1 %vm186_vm0, %v13280_v34 }
  0x43   : > { %14507 = vmatmul.mubr.msk.f32.vlgmr.msra.gmra.mrb[0].mxu0 %vm179_vm1, %v15583_v23  ;;  %14552 = vmatmul.mubr.msk.f32.vlgmr.msra.gmra.mrb[0].mxu1 %vm179_vm1, %v15644_v35 }
  0x44   : > { %14510 = vmatpush3.msk.msra.mxu0 %vm186_vm0, %v13226_v32  ;;  %14511 = vmatprep.mubr.msk.f32.mxu0 %vm179_vm1, %v13260_v25  ;;  %v13446_v32 = vld [vmem:[%s17071_s1 + $0x20] sm:$0xf] }
  0x45   : > { %14514 = vmatprep.subr.msk.mxu0 %vm186_vm0, %v13232_v36  ;;  %14555 = vmatpush3.msk.msra.mxu1 %vm186_vm0, %v13280_v34  ;;  %v13499_v34 = vld [vmem:[%s17071_s1 + $0x20] sm:$0xf] }
  0x46   : > { %14556 = vmatprep.mubr.msk.f32.mxu1 %vm179_vm1, %v15654_v37  ;;  %14559 = vmatprep.subr.msk.mxu1 %vm186_vm0, %v13286_v38 }
  0x4b   : > { %14512 = vmatmul.mubr.msk.f32.vlgmr.msra.gmra.mrb[0].mxu0 %vm179_vm1, %v13261_v27  ;;  %14557 = vmatmul.mubr.msk.f32.vlgmr.msra.gmra.mrb[0].mxu1 %vm179_vm1, %v15667_v39 }
  0x4c   : > { %14515 = vmatpush3.msk.msra.mxu0 %vm186_vm0, %v13232_v36  ;;  %14516 = vmatprep.mubr.msk.f32.mxu0 %vm179_vm1, %v15608_v29  ;;  %v16046_v36 = vld [vmem:[%s15520_s25 + $0xaa] sm:$0xff] }
  0x4d   : > { %14560 = vmatpush3.msk.msra.mxu1 %vm186_vm0, %v13286_v38  ;;  %14561 = vmatprep.mubr.msk.f32.mxu1 %vm179_vm1, %v15670_v40  ;;  %v13561_v38 = vld [vmem:[%s17071_s1 + $0x4] sm:$0xf] }
  0x4e   : > { %14564 = vmatprep.subr.msk.mxu0 %vm186_vm0, %v13294_v41  ;;  %14609 = vmatprep.subr.msk.mxu1 %vm186_vm0, %v13347_v42 }
  0x53   : > { %14517 = vmatmul.mubr.msk.f32.vlgmr.msra.gmra.mrb[0].mxu0 %vm179_vm1, %v15621_v31  ;;  %14562 = vmatmul.mubr.msk.f32.vlgmr.msra.gmra.mrb[0].mxu1 %vm179_vm1, %v15690_v43 }
  0x54   : > { %14565 = vmatpush3.msk.msra.mxu0 %vm186_vm0, %v13294_v41  ;;  %14566 = vmatprep.mubr.msk.f32.mxu0 %vm179_vm1, %v13260_v25  ;;  %v15982_v25 = vld [vmem:[%s15520_s25 + $0x92] sm:$0xff]  ;;  %v5850_v41 = vld [vmem:[%s17071_s1] sm:$0xf] }
  0x55   : > { %14569 = vmatprep.subr.msk.mxu0 %vm186_vm0, %v1809_v44  ;;  %14610 = vmatpush3.msk.msra.mxu1 %vm186_vm0, %v13347_v42  ;;  %v13517_v42 = vld [vmem:[%s17071_s1 + $0x8] sm:$0xf] }
  0x56   : > { %14611 = vmatprep.mubr.msk.f32.mxu1 %vm179_vm1, %v15654_v37  ;;  %14614 = vmatprep.subr.msk.mxu1 %vm186_vm0, %v2616_v45 }
  0x57   : > { %14567 = vmatmul.mubr.msk.f32.vlgmr.msra.gmra.mrb[2].mxu0 %vm179_vm1, %v13261_v27  ;;  %14612 = vmatmul.mubr.msk.f32.vlgmr.msra.gmra.mrb[2].mxu1 %vm179_vm1, %v15667_v39  ;;  %v15996_v27 = vld [vmem:[%s15520_s25 + $0x9a] sm:$0xff] }
  0x58   : > { %14570 = vmatpush3.msk.msra.mxu0 %vm186_vm0, %v1809_v44  ;;  %14571 = vmatprep.mubr.msk.f32.mxu0 %vm179_vm1, %v15570_v21  ;;  %v13473_v21 = vld [vmem:[%s15520_s25 + $0x91] sm:$0xff]  ;;  %v13523_v44 = vld [vmem:[%s17071_s1 + $0xc] sm:$0xf] }
  0x59   : > { %14574 = vmatprep.subr.msk.mxu0 %vm186_vm0, %v13303_v46  ;;  %14615 = vmatpush3.msk.msra.mxu1 %vm186_vm0, %v2616_v45  ;;  %v13576_v45 = vld [vmem:[%s17071_s1 + $0xc] sm:$0xf] }
  0x5a   : > { %14616 = vmatprep.mubr.msk.f32.mxu1 %vm179_vm1, %v15630_v33  ;;  %14619 = vmatprep.subr.msk.mxu1 %vm186_vm0, %v13356_v47 }
  0x5f   : > { %14572 = vmatmul.mubr.msk.f32.vlgmr.msra.gmra.mrb[2].mxu0 %vm179_vm1, %v15583_v23  ;;  %14617 = vmatmul.mubr.msk.f32.vlgmr.msra.gmra.mrb[2].mxu1 %vm179_vm1, %v15644_v35  ;;  %v13474_v23 = vld [vmem:[%s15520_s25 + $0x99] sm:$0xff] }
  0x60   : > { %14575 = vmatpush3.msk.msra.mxu0 %vm186_vm0, %v13303_v46  ;;  %14576 = vmatprep.mubr.msk.f32.mxu0 %vm179_vm1, %v15608_v29  ;;  %v16006_v29 = vld [vmem:[%s15520_s25 + $0xa8] sm:$0xff]  ;;  %v13529_v46 = vld [vmem:[%s17071_s1 + $0x10] sm:$0xf] }
  0x61   : > { %14579 = vmatprep.subr.msk.mxu0 %vm186_vm0, %v13309_v48  ;;  %14620 = vmatpush3.msk.msra.mxu1 %vm186_vm0, %v13356_v47  ;;  %v16128_v47 = vld [vmem:[%s15520_s25 + $0xc0] sm:$0xff] }
  0x62   : > { %14621 = vmatprep.mubr.msk.f32.mxu1 %vm179_vm1, %v15670_v40  ;;  %14624 = vmatprep.subr.msk.mxu1 %vm186_vm0, %v13362_v49 }
  0x67   : > { %14577 = vmatmul.mubr.msk.f32.vlgmr.msra.gmra.mrb[2].mxu0 %vm179_vm1, %v15621_v31  ;;  %14622 = vmatmul.mubr.msk.f32.vlgmr.msra.gmra.mrb[2].mxu1 %vm179_vm1, %v15690_v43  ;;  %v16020_v31 = vld [vmem:[%s15520_s25 + $0xb0] sm:$0xff] }
  0x68   : > { %14580 = vmatpush3.msk.msra.mxu0 %vm186_vm0, %v13309_v48  ;;  %14581 = vmatprep.mubr.msk.f32.mxu0 %vm179_vm1, %v15630_v33  ;;  %v16030_v33 = vld [vmem:[%s15520_s25 + $0xa9] sm:$0xff] }
  0x69   : > { %14584 = vmatprep.subr.msk.mxu0 %vm186_vm0, %v13315_v50  ;;  %14625 = vmatpush3.msk.msra.mxu1 %vm186_vm0, %v13362_v49  ;;  %v13582_v48 = vld [vmem:[%s17071_s1 + $0x10] sm:$0xf]  ;;  %v16142_v49 = vld [vmem:[%s15520_s25 + $0xc8] sm:$0xff] }
  0x6a   : > { %14626 = vmatprep.mubr.msk.f32.mxu1 %vm179_vm1, %v15752_v51  ;;  %14629 = vmatprep.subr.msk.mxu1 %vm186_vm0, %v13368_v52 }
  0x6f   : > { %14582 = vmatmul.mubr.msk.f32.vlgmr.msra.gmra.mrb[2].mxu0 %vm179_vm1, %v15644_v35  ;;  %14627 = vmatmul.mubr.msk.f32.vlgmr.msra.gmra.mrb[2].mxu1 %vm179_vm1, %v15766_v53  ;;  %v16043_v35 = vld [vmem:[%s15520_s25 + $0xb1] sm:$0xff] }
  0x70   : > { %14585 = vmatpush3.msk.msra.mxu0 %vm186_vm0, %v13315_v50  ;;  %14586 = vmatprep.mubr.msk.f32.mxu0 %vm179_vm1, %v15654_v37  ;;  %v13508_v37 = vld [vmem:[%s17071_s1 + $0x4] sm:$0xf]  ;;  %v13535_v50 = vld [vmem:[%s17071_s1 + $0x14] sm:$0xf] }
  0x71   : > { %14589 = vmatprep.subr.msk.mxu0 %vm186_vm0, %v13321_v54  ;;  %14630 = vmatpush3.msk.msra.mxu1 %vm186_vm0, %v13368_v52  ;;  %v13588_v52 = vld [vmem:[%s17071_s1 + $0x14] sm:$0xf] }
  0x72   : > { %14631 = vmatprep.mubr.msk.f32.mxu1 %vm179_vm1, %v13366_v55  ;;  %14634 = vmatprep.subr.msk.mxu1 %vm186_vm0, %v13374_v56 }
  0x77   : > { %14587 = vmatmul.mubr.msk.f32.vlgmr.msra.gmra.mrb[2].mxu0 %vm179_vm1, %v15667_v39  ;;  %14632 = vmatmul.mubr.msk.f32.vlgmr.msra.gmra.mrb[2].mxu1 %vm179_vm1, %v13367_v57  ;;  %v16066_v39 = vld [vmem:[%s15520_s25 + $0xb2] sm:$0xff] }
  0x78   : > { %14590 = vmatpush3.msk.msra.mxu0 %vm186_vm0, %v13321_v54  ;;  %14591 = vmatprep.mubr.msk.f32.mxu0 %vm179_vm1, %v15670_v40  ;;  %v5043_v40 = vld [vmem:[%s17071_s1] sm:$0xf]  ;;  %v13541_v54 = vld [vmem:[%s17071_s1 + $0x18] sm:$0xf] }
  0x79   : > { %14594 = vmatprep.subr.msk.mxu0 %vm186_vm0, %v13327_v58  ;;  %14635 = vmatpush3.msk.msra.mxu1 %vm186_vm0, %v13374_v56  ;;  %v13594_v56 = vld [vmem:[%s17071_s1 + $0x18] sm:$0xf] }
  0x7a   : > { %14636 = vmatprep.mubr.msk.f32.mxu1 %vm179_vm1, %v15794_v59  ;;  %14639 = vmatprep.subr.msk.mxu1 %vm186_vm0, %v13380_v60 }
  0x7f   : > { %14592 = vmatmul.mubr.msk.f32.vlgmr.msra.gmra.mrb[2].mxu0 %vm179_vm1, %v15690_v43  ;;  %14637 = vmatmul.mubr.msk.f32.vlgmr.msra.gmra.mrb[2].mxu1 %vm179_vm1, %v15808_v61  ;;  %v13570_v43 = vld [vmem:[%s17071_s1 + $0x8] sm:$0xf] }
  0x80   : > { %14595 = vmatpush3.msk.msra.mxu0 %vm186_vm0, %v13327_v58  ;;  %14596 = vmatprep.mubr.msk.f32.mxu0 %vm179_vm1, %v15752_v51  ;;  %v13547_v58 = vld [vmem:[%s17071_s1 + $0x1c] sm:$0xf] }
  0x81   : > { %14599 = vmatprep.subr.msk.mxu0 %vm186_vm0, %v13333_v62  ;;  %14640 = vmatpush3.msk.msra.mxu1 %vm186_vm0, %v13380_v60  ;;  %v13600_v60 = vld [vmem:[%s17071_s1 + $0x1c] sm:$0xf] }
  0x82   : > { %14641 = vmatprep.mubr.msk.f32.mxu1 %vm179_vm1, %v15818_v63  ;;  %14644 = vmatprep.subr.msk.mxu1 %vm186_vm0, %v13386_v0 }
  0x87   : > { %14597 = vmatmul.mubr.msk.f32.vlgmr.msra.gmra.mrb[2].mxu0 %vm179_vm1, %v15766_v53  ;;  %14642 = vmatmul.mubr.msk.f32.vlgmr.msra.gmra.mrb[2].mxu1 %vm179_vm1, %v15832_v1 }
  0x88   : > { %14600 = vmatpush3.msk.msra.mxu0 %vm186_vm0, %v13333_v62  ;;  %14601 = vmatprep.mubr.msk.f32.mxu0 %vm179_vm1, %v13366_v55  ;;  %v13553_v62 = vld [vmem:[%s17071_s1 + $0x20] sm:$0xf] }
  0x89   : > { %14604 = vmatprep.subr.msk.mxu0 %vm186_vm0, %v13339_v2  ;;  %14645 = vmatpush3.msk.msra.mxu1 %vm186_vm0, %v13386_v0  ;;  %v13606_v0 = vld [vmem:[%s17071_s1 + $0x20] sm:$0xf] }
  0x8a   : > { %14646 = vmatprep.mubr.msk.f32.mxu1 %vm179_vm1, %v15842_v3  ;;  %14649 = vmatprep.subr.msk.mxu1 %vm186_vm0, %v13392_v4 }
  0x8f   : > { %14602 = vmatmul.mubr.msk.f32.vlgmr.msra.gmra.mrb[2].mxu0 %vm179_vm1, %v13367_v57  ;;  %14647 = vmatmul.mubr.msk.f32.vlgmr.msra.gmra.mrb[2].mxu1 %vm179_vm1, %v15855_v5 }
  0x90   : > { %14605 = vmatpush3.msk.msra.mxu0 %vm186_vm0, %v13339_v2  ;;  %14606 = vmatprep.mubr.msk.f32.mxu0 %vm179_vm1, %v15794_v59  ;;  %v16234_v2 = vld [vmem:[%s15520_s25 + $0xda] sm:$0xff] }
  0x91   : > { %14650 = vmatpush3.msk.msra.mxu1 %vm186_vm0, %v13392_v4  ;;  %14651 = vmatprep.mubr.msk.f32.mxu1 %vm179_vm1, %v15858_v6  ;;  %v13668_v4 = vld [vmem:[%s17071_s1 + $0x4] sm:$0xf] }
  0x92   : > { %14654 = vmatprep.subr.msk.mxu0 %vm186_vm0, %v13401_v7  ;;  %14699 = vmatprep.subr.msk.mxu1 %vm186_vm0, %v13454_v8 }
  0x97   : > { %14607 = vmatmul.mubr.msk.f32.vlgmr.msra.gmra.mrb[2].mxu0 %vm179_vm1, %v15808_v61  ;;  %14652 = vmatmul.mubr.msk.f32.vlgmr.msra.gmra.mrb[2].mxu1 %vm179_vm1, %v15878_v9 }
  0x98   : > { %14655 = vmatpush3.msk.msra.mxu0 %vm186_vm0, %v13401_v7  ;;  %14656 = vmatprep.mubr.msk.f32.mxu0 %vm179_vm1, %v13366_v55  ;;  %v16170_v55 = vld [vmem:[%s15520_s25 + $0xc2] sm:$0xff] }
  0x99   : > { %14659 = vmatprep.subr.msk.mxu0 %vm186_vm0, %v3426_v10  ;;  %14700 = vmatpush3.msk.msra.mxu1 %vm186_vm0, %v13454_v8  ;;  %v7467_v7 = vld [vmem:[%s17071_s1] sm:$0xf]  ;;  %v13624_v8 = vld [vmem:[%s17071_s1 + $0x8] sm:$0xf] }
  0x9a   : > { %14701 = vmatprep.mubr.msk.f32.mxu1 %vm179_vm1, %v15842_v3  ;;  %14704 = vmatprep.subr.msk.mxu1 %vm186_vm0, %v4233_v11 }
  0x9b   : > { %14657 = vmatmul.mubr.msk.f32.vlgmr.msra.gmra.mrb[4].mxu0 %vm179_vm1, %v13367_v57  ;;  %14702 = vmatmul.mubr.msk.f32.vlgmr.msra.gmra.mrb[4].mxu1 %vm179_vm1, %v15855_v5  ;;  %v16184_v57 = vld [vmem:[%s15520_s25 + $0xca] sm:$0xff] }
  0x9c   : > { %14660 = vmatpush3.msk.msra.mxu0 %vm186_vm0, %v3426_v10  ;;  %14661 = vmatprep.mubr.msk.f32.mxu0 %vm179_vm1, %v15752_v51  ;;  %v13580_v51 = vld [vmem:[%s15520_s25 + $0xc1] sm:$0xff]  ;;  %v16286_v10 = vld [vmem:[%s17072_s2] ss:$0 sm:$0xff] }
  0x9d   : > { %14664 = vmatprep.subr.msk.mxu0 %vm186_vm0, %v13410_v12  ;;  %14705 = vmatpush3.msk.msra.mxu1 %vm186_vm0, %v4233_v11 }
  0x9e   : > { %14706 = vmatprep.mubr.msk.f32.mxu1 %vm179_vm1, %v15818_v63  ;;  %14709 = vmatprep.subr.msk.mxu1 %vm186_vm0, %v13463_v13 }
  0xa3   : > { %14662 = vmatmul.mubr.msk.f32.vlgmr.msra.gmra.mrb[4].mxu0 %vm179_vm1, %v15766_v53  ;;  %14707 = vmatmul.mubr.msk.f32.vlgmr.msra.gmra.mrb[4].mxu1 %vm179_vm1, %v15832_v1  ;;  %v13581_v53 = vld [vmem:[%s15520_s25 + $0xc9] sm:$0xff] }
  0xa4   : > { %14665 = vmatpush3.msk.msra.mxu0 %vm186_vm0, %v13410_v12  ;;  %14666 = vmatprep.mubr.msk.f32.mxu0 %vm179_vm1, %v15794_v59  ;;  %v16194_v59 = vld [vmem:[%s15520_s25 + $0xd8] sm:$0xff] }
  0xa5   : > { %14669 = vmatprep.subr.msk.mxu0 %vm186_vm0, %v13416_v14  ;;  %14710 = vmatpush3.msk.msra.mxu1 %vm186_vm0, %v13463_v13 }
  0xa6   : > { %14711 = vmatprep.mubr.msk.f32.mxu1 %vm179_vm1, %v15858_v6  ;;  %14714 = vmatprep.subr.msk.mxu1 %vm186_vm0, %v13469_v15 }
  0xab   : > { %14667 = vmatmul.mubr.msk.f32.vlgmr.msra.gmra.mrb[4].mxu0 %vm179_vm1, %v15808_v61  ;;  %14712 = vmatmul.mubr.msk.f32.vlgmr.msra.gmra.mrb[4].mxu1 %vm179_vm1, %v15878_v9  ;;  %v16208_v61 = vld [vmem:[%s15520_s25 + $0xe0] sm:$0xff] }
  0xac   : > { %14670 = vmatpush3.msk.msra.mxu0 %vm186_vm0, %v13416_v14  ;;  %14671 = vmatprep.mubr.msk.f32.mxu0 %vm179_vm1, %v15818_v63  ;;  %v16218_v63 = vld [vmem:[%s15520_s25 + $0xd9] sm:$0xff] }
  0xad   : > { %14674 = vmatprep.subr.msk.mxu0 %vm186_vm0, %v13422_v16  ;;  %14715 = vmatpush3.msk.msra.mxu1 %vm186_vm0, %v13469_v15 }
  0xae   : > { %14716 = vmatprep.mubr.msk.f32.mxu1 %vm179_vm1, %v15940_v17  ;;  %14719 = vmatprep.subr.msk.mxu1 %vm186_vm0, %v13475_v18 }
  0xb3   : > { %14672 = vmatmul.mubr.msk.f32.vlgmr.msra.gmra.mrb[4].mxu0 %vm179_vm1, %v15832_v1  ;;  %14717 = vmatmul.mubr.msk.f32.vlgmr.msra.gmra.mrb[4].mxu1 %vm179_vm1, %v15954_v19  ;;  %v16231_v1 = vld [vmem:[%s15520_s25 + $0xe1] sm:$0xff] }
  0xb4   : > { %14675 = vmatpush3.msk.msra.mxu0 %vm186_vm0, %v13422_v16  ;;  %14676 = vmatprep.mubr.msk.f32.mxu0 %vm179_vm1, %v15842_v3  ;;  %v13615_v3 = vld [vmem:[%s17071_s1 + $0x4] sm:$0xf] }
  0xb5   : > { %14679 = vmatprep.subr.msk.mxu0 %vm186_vm0, %v13428_v20  ;;  %14720 = vmatpush3.msk.msra.mxu1 %vm186_vm0, %v13475_v18 }
  0xb6   : > { %14721 = vmatprep.mubr.msk.f32.mxu1 %vm179_vm1, %v13473_v21  ;;  %14724 = vmatprep.subr.msk.mxu1 %vm186_vm0, %v13481_v22 }
  0xbb   : > { %14677 = vmatmul.mubr.msk.f32.vlgmr.msra.gmra.mrb[4].mxu0 %vm179_vm1, %v15855_v5  ;;  %14722 = vmatmul.mubr.msk.f32.vlgmr.msra.gmra.mrb[4].mxu1 %vm179_vm1, %v13474_v23  ;;  %v16254_v5 = vld [vmem:[%s15520_s25 + $0xe2] sm:$0xff] }
  0xbc   : > { %14680 = vmatpush3.msk.msra.mxu0 %vm186_vm0, %v13428_v20  ;;  %14681 = vmatprep.mubr.msk.f32.mxu0 %vm179_vm1, %v15858_v6  ;;  %v6660_v6 = vld [vmem:[%s17071_s1] sm:$0xf]  ;;  %v13683_v20 = vld [vmem:[%s17071_s1 + $0xc] sm:$0xf] }
  0xbd   : > { %14684 = vmatprep.subr.msk.mxu0 %vm186_vm0, %v13434_v24  ;;  %14725 = vmatpush3.msk.msra.mxu1 %vm186_vm0, %v13481_v22 }
  0xbe   : > { %14726 = vmatprep.mubr.msk.f32.mxu1 %vm179_vm1, %v15982_v25  ;;  %14729 = vmatprep.subr.msk.mxu1 %vm186_vm0, %v13487_v26 }
  0xc3   : > { %14682 = vmatmul.mubr.msk.f32.vlgmr.msra.gmra.mrb[4].mxu0 %vm179_vm1, %v15878_v9  ;;  %14727 = vmatmul.mubr.msk.f32.vlgmr.msra.gmra.mrb[4].mxu1 %vm179_vm1, %v15996_v27  ;;  %v13677_v9 = vld [vmem:[%s17071_s1 + $0x8] sm:$0xf] }
  0xc4   : > { %14685 = vmatpush3.msk.msra.mxu0 %vm186_vm0, %v13434_v24  ;;  %14686 = vmatprep.mubr.msk.f32.mxu0 %vm179_vm1, %v15940_v17 }
  0xc5   : > { %14689 = vmatprep.subr.msk.mxu0 %vm186_vm0, %v13440_v28  ;;  %14730 = vmatpush3.msk.msra.mxu1 %vm186_vm0, %v13487_v26  ;;  %v16323_v26 = vld [vmem:[%s15520_s25 + $0xf0] sm:$0xff] }
  0xc6   : > { %14731 = vmatprep.mubr.msk.f32.mxu1 %vm179_vm1, %v16006_v29  ;;  %14734 = vmatprep.subr.msk.mxu1 %vm186_vm0, %v13493_v30 }
  0xcb   : > { %14687 = vmatmul.mubr.msk.f32.vlgmr.msra.gmra.mrb[4].mxu0 %vm179_vm1, %v15954_v19  ;;  %14732 = vmatmul.mubr.msk.f32.vlgmr.msra.gmra.mrb[4].mxu1 %vm179_vm1, %v16020_v31 }
  0xcc   : > { %14690 = vmatpush3.msk.msra.mxu0 %vm186_vm0, %v13440_v28  ;;  %14691 = vmatprep.mubr.msk.f32.mxu0 %vm179_vm1, %v13473_v21 }
  0xcd   : > { %14694 = vmatprep.subr.msk.mxu0 %vm186_vm0, %v13446_v32  ;;  %14735 = vmatpush3.msk.msra.mxu1 %vm186_vm0, %v13493_v30  ;;  %v16343_v30 = vld [vmem:[%s15520_s25 + $0xf8] sm:$0xff] }
  0xce   : > { %14736 = vmatprep.mubr.msk.f32.mxu1 %vm179_vm1, %v16030_v33  ;;  %14739 = vmatprep.subr.msk.mxu1 %vm186_vm0, %v13499_v34 }
  0xd3   : > { %14692 = vmatmul.mubr.msk.f32.vlgmr.msra.gmra.mrb[4].mxu0 %vm179_vm1, %v13474_v23  ;;  %14737 = vmatmul.mubr.msk.f32.vlgmr.msra.gmra.mrb[4].mxu1 %vm179_vm1, %v16043_v35 }
  0xd4   : > { %14695 = vmatpush3.msk.msra.mxu0 %vm186_vm0, %v13446_v32  ;;  %14696 = vmatprep.mubr.msk.f32.mxu0 %vm179_vm1, %v15982_v25  ;;  %v16349_v32 = vld [vmem:[%s15520_s25 + $0xf1] sm:$0xff] }
  0xd5   : > { %14740 = vmatpush3.msk.msra.mxu1 %vm186_vm0, %v13499_v34  ;;  %14741 = vmatprep.mubr.msk.f32.mxu1 %vm179_vm1, %v16046_v36 }
  0xd6   : > { %14744 = vmatprep.subr.msk.mxu0 %vm186_vm0, %v13508_v37  ;;  %14789 = vmatprep.subr.msk.mxu1 %vm186_vm0, %v13561_v38 }
  0xdb   : > { %14697 = vmatmul.mubr.msk.f32.vlgmr.msra.gmra.mrb[4].mxu0 %vm179_vm1, %v15996_v27  ;;  %14742 = vmatmul.mubr.msk.f32.vlgmr.msra.gmra.mrb[4].mxu1 %vm179_vm1, %v16066_v39 }
  0xdc   : > { %14745 = vmatpush3.msk.msra.mxu0 %vm186_vm0, %v13508_v37  ;;  %14746 = vmatprep.mubr.msk.f32.mxu0 %vm179_vm1, %v13473_v21 }
  0xdd   : > { %14749 = vmatprep.subr.msk.mxu0 %vm186_vm0, %v5043_v40  ;;  %14790 = vmatpush3.msk.msra.mxu1 %vm186_vm0, %v13561_v38 }
  0xde   : > { %14791 = vmatprep.mubr.msk.f32.mxu1 %vm179_vm1, %v16030_v33  ;;  %14794 = vmatprep.subr.msk.mxu1 %vm186_vm0, %v5850_v41 }
  0xdf   : > { %14747 = vmatmul.mubr.msk.f32.vlgmr.msra.gmra.mrb[6].mxu0 %vm179_vm1, %v13474_v23  ;;  %14792 = vmatmul.mubr.msk.f32.vlgmr.msra.gmra.mrb[6].mxu1 %vm179_vm1, %v16043_v35 }
  0xe0   : > { %14750 = vmatpush3.msk.msra.mxu0 %vm186_vm0, %v5043_v40  ;;  %14751 = vmatprep.mubr.msk.f32.mxu0 %vm179_vm1, %v15940_v17  ;;  %v13648_v40 = vld [vmem:[%s17071_s1 + $0x18] sm:$0xf] }
  0xe1   : > { %14754 = vmatprep.subr.msk.mxu0 %vm186_vm0, %v13517_v42  ;;  %14795 = vmatpush3.msk.msra.mxu1 %vm186_vm0, %v5850_v41  ;;  %v16382_v41 = vld [vmem:[%s15520_s25 + $0xf2] sm:$0xff] }
  0xe2   : > { %14796 = vmatprep.mubr.msk.f32.mxu1 %vm179_vm1, %v16006_v29  ;;  %14799 = vmatprep.subr.msk.mxu1 %vm186_vm0, %v13570_v43 }
  0xe7   : > { %14752 = vmatmul.mubr.msk.f32.vlgmr.msra.gmra.mrb[6].mxu0 %vm179_vm1, %v15954_v19  ;;  %14797 = vmatmul.mubr.msk.f32.vlgmr.msra.gmra.mrb[6].mxu1 %vm179_vm1, %v16020_v31  ;;  %v13630_v19 = vld [vmem:[%s17071_s1 + $0xc] sm:$0xf] }
  0xe8   : > { %14755 = vmatpush3.msk.msra.mxu0 %vm186_vm0, %v13517_v42  ;;  %14756 = vmatprep.mubr.msk.f32.mxu0 %vm179_vm1, %v15982_v25  ;;  %v13636_v25 = vld [vmem:[%s17071_s1 + $0x10] sm:$0xf]  ;;  %v13701_v42 = vld [vmem:[%s17071_s1 + $0x18] sm:$0xf] }
  0xe9   : > { %14759 = vmatprep.subr.msk.mxu0 %vm186_vm0, %v13523_v44  ;;  %14800 = vmatpush3.msk.msra.mxu1 %vm186_vm0, %v13570_v43  ;;  %v16396_v43 = vld [vmem:[%s15520_s25 + $0xfa] sm:$0xff] }
  0xea   : > { %14801 = vmatprep.mubr.msk.f32.mxu1 %vm179_vm1, %v16046_v36  ;;  %14804 = vmatprep.subr.msk.mxu1 %vm186_vm0, %v13576_v45 }
  0xef   : > { %14757 = vmatmul.mubr.msk.f32.vlgmr.msra.gmra.mrb[6].mxu0 %vm179_vm1, %v15996_v27  ;;  %14802 = vmatmul.mubr.msk.f32.vlgmr.msra.gmra.mrb[6].mxu1 %vm179_vm1, %v16066_v39 }
  0xf0   : > { %14760 = vmatpush3.msk.msra.mxu0 %vm186_vm0, %v13523_v44  ;;  %14761 = vmatprep.mubr.msk.f32.mxu0 %vm179_vm1, %v16006_v29  ;;  %v13689_v29 = vld [vmem:[%s17071_s1 + $0x10] sm:$0xf]  ;;  %v13654_v44 = vld [vmem:[%s17071_s1 + $0x1c] sm:$0xf] }
  0xf1   : > { %14764 = vmatprep.subr.msk.mxu0 %vm186_vm0, %v13529_v46  ;;  %14805 = vmatpush3.msk.msra.mxu1 %vm186_vm0, %v13576_v45  ;;  %v16406_v45 = vld [vmem:[%s15520_s25 + $0x108] sm:$0xff] }
  0xf2   : > { %14806 = vmatprep.mubr.msk.f32.mxu1 %vm179_vm1, %v16128_v47  ;;  %14809 = vmatprep.subr.msk.mxu1 %vm186_vm0, %v13582_v48 }
  0xf7   : > { %14762 = vmatmul.mubr.msk.f32.vlgmr.msra.gmra.mrb[6].mxu0 %vm179_vm1, %v16020_v31  ;;  %14807 = vmatmul.mubr.msk.f32.vlgmr.msra.gmra.mrb[6].mxu1 %vm179_vm1, %v16142_v49  ;;  %v13642_v31 = vld [vmem:[%s17071_s1 + $0x14] sm:$0xf] }
  0xf8   : > { %14765 = vmatpush3.msk.msra.mxu0 %vm186_vm0, %v13529_v46  ;;  %14766 = vmatprep.mubr.msk.f32.mxu0 %vm179_vm1, %v16030_v33  ;;  %v13695_v33 = vld [vmem:[%s17071_s1 + $0x14] sm:$0xf]  ;;  %v13707_v46 = vld [vmem:[%s17071_s1 + $0x1c] sm:$0xf] }
  0xf9   : > { %14769 = vmatprep.subr.msk.mxu0 %vm186_vm0, %v13535_v50  ;;  %14810 = vmatpush3.msk.msra.mxu1 %vm186_vm0, %v13582_v48  ;;  %v13660_v48 = vld [vmem:[%s17071_s1 + $0x20] sm:$0xf] }
  0xfa   : > { %14811 = vmatprep.mubr.msk.f32.mxu1 %vm179_vm1, %v13580_v51  ;;  %14814 = vmatprep.subr.msk.mxu1 %vm186_vm0, %v13588_v52 }
  0xff   : > { %14767 = vmatmul.mubr.msk.f32.vlgmr.msra.gmra.mrb[6].mxu0 %vm179_vm1, %v16043_v35  ;;  %14812 = vmatmul.mubr.msk.f32.vlgmr.msra.gmra.mrb[6].mxu1 %vm179_vm1, %v13581_v53 }
 0x100   : > { %14770 = vmatpush3.msk.msra.mxu0 %vm186_vm0, %v13535_v50  ;;  %14771 = vmatprep.mubr.msk.f32.mxu0 %vm179_vm1, %v16046_v36  ;;  %v13713_v50 = vld [vmem:[%s17071_s1 + $0x20] sm:$0xf] }
 0x101   : > { %14774 = vmatprep.subr.msk.mxu0 %vm186_vm0, %v13541_v54  ;;  %14815 = vmatpush3.msk.msra.mxu1 %vm186_vm0, %v13588_v52  ;;  %v16447_v52 = vld [vmem:[%s15520_s25 + $0x10a] sm:$0xff] }
 0x102   : > { %14816 = vmatprep.mubr.msk.f32.mxu1 %vm179_vm1, %v16170_v55  ;;  %14819 = vmatprep.subr.msk.mxu1 %vm186_vm0, %v13594_v56 }
 0x107   : > { %14772 = vmatmul.mubr.msk.f32.vlgmr.msra.gmra.mrb[6].mxu0 %vm179_vm1, %v16066_v39  ;;  %14817 = vmatmul.mubr.msk.f32.vlgmr.msra.gmra.mrb[6].mxu1 %vm179_vm1, %v16184_v57  ;;  %v13688_v39 = vld [vmem:[%s15520_s25 + $0xf9] sm:$0xff] }
 0x108   : > { %14775 = vmatpush3.msk.msra.mxu0 %vm186_vm0, %v13541_v54  ;;  %14776 = vmatprep.mubr.msk.f32.mxu0 %vm179_vm1, %v16128_v47  ;;  %v13775_v54 = vld [vmem:[%s17071_s1 + $0x4] sm:$0xf] }
 0x109   : > { %14779 = vmatprep.subr.msk.mxu0 %vm186_vm0, %v13547_v58  ;;  %14820 = vmatpush3.msk.msra.mxu1 %vm186_vm0, %v13594_v56  ;;  %v8277_v56 = vld [vmem:[%s17071_s1] sm:$0xf] }
 0x10a   : > { %14821 = vmatprep.mubr.msk.f32.mxu1 %vm179_vm1, %v16194_v59  ;;  %14824 = vmatprep.subr.msk.mxu1 %vm186_vm0, %v13600_v60 }
 0x10f   : > { %14777 = vmatmul.mubr.msk.f32.vlgmr.msra.gmra.mrb[6].mxu0 %vm179_vm1, %v16142_v49  ;;  %14822 = vmatmul.mubr.msk.f32.vlgmr.msra.gmra.mrb[6].mxu1 %vm179_vm1, %v16208_v61 }
 0x110   : > { %14780 = vmatpush3.msk.msra.mxu0 %vm186_vm0, %v13547_v58  ;;  %14781 = vmatprep.mubr.msk.f32.mxu0 %vm179_vm1, %v13580_v51  ;;  %v13731_v58 = vld [vmem:[%s17071_s1 + $0x8] sm:$0xf] }
 0x111   : > { %14784 = vmatprep.subr.msk.mxu0 %vm186_vm0, %v13553_v62  ;;  %14825 = vmatpush3.msk.msra.mxu1 %vm186_vm0, %v13600_v60 }
 0x112   : > { %14826 = vmatprep.mubr.msk.f32.mxu1 %vm179_vm1, %v16218_v63  ;;  %14829 = vmatprep.subr.msk.mxu1 %vm186_vm0, %v13606_v0 }
 0x117   : > { %14782 = vmatmul.mubr.msk.f32.vlgmr.msra.gmra.mrb[6].mxu0 %vm179_vm1, %v13581_v53  ;;  %14827 = vmatmul.mubr.msk.f32.vlgmr.msra.gmra.mrb[6].mxu1 %vm179_vm1, %v16231_v1 }
 0x118   : > { %14785 = vmatpush3.msk.msra.mxu0 %vm186_vm0, %v13553_v62  ;;  %14786 = vmatprep.mubr.msk.f32.mxu0 %vm179_vm1, %v16170_v55 }
 0x119   : > { %14830 = vmatpush3.msk.msra.mxu1 %vm186_vm0, %v13606_v0  ;;  %14831 = vmatprep.mubr.msk.f32.mxu1 %vm179_vm1, %v16234_v2 }
 0x11a   : > { %14834 = vmatprep.subr.msk.mxu0 %vm186_vm0, %v13615_v3  ;;  %14879 = vmatprep.subr.msk.mxu1 %vm186_vm0, %v13668_v4 }
 0x11f   : > { %14787 = vmatmul.mubr.msk.f32.vlgmr.msra.gmra.mrb[6].mxu0 %vm179_vm1, %v16184_v57  ;;  %14832 = vmatmul.mubr.msk.f32.vlgmr.msra.gmra.mrb[6].mxu1 %vm179_vm1, %v16254_v5 }
 0x120   : > { %14835 = vmatpush3.msk.msra.mxu0 %vm186_vm0, %v13615_v3  ;;  %14836 = vmatprep.mubr.msk.f32.mxu0 %vm179_vm1, %v13580_v51  ;;  %v16444_v51 = vld [vmem:[%s15520_s25 + $0x111] sm:$0xff] }
 0x121   : > { %14839 = vmatprep.subr.msk.mxu0 %vm186_vm0, %v6660_v6  ;;  %14880 = vmatpush3.msk.msra.mxu1 %vm186_vm0, %v13668_v4  ;;  %v13737_v4 = vld [vmem:[%s17071_s1 + $0xc] sm:$0xf] }
 0x122   : > { %14881 = vmatprep.mubr.msk.f32.mxu1 %vm179_vm1, %v16218_v63  ;;  %14884 = vmatprep.subr.msk.mxu1 %vm186_vm0, %v7467_v7 }
 0x123   : > { %14837 = vmatmul.mubr.msk.f32.vlgmr.msra.gmra.mrb[8].mxu0 %vm179_vm1, %v13581_v53  ;;  %14882 = vmatmul.mubr.msk.f32.vlgmr.msra.gmra.mrb[8].mxu1 %vm179_vm1, %v16231_v1  ;;  %v13722_v53 = vld [vmem:[%s17071_s1 + $0x4] sm:$0xf] }
 0x124   : > { %14840 = vmatpush3.msk.msra.mxu0 %vm186_vm0, %v6660_v6  ;;  %14841 = vmatprep.mubr.msk.f32.mxu0 %vm179_vm1, %v16128_v47  ;;  %v16420_v47 = vld [vmem:[%s15520_s25 + $0x110] sm:$0xff] }
 0x125   : > { %14844 = vmatprep.subr.msk.mxu0 %vm186_vm0, %v13624_v8  ;;  %14885 = vmatpush3.msk.msra.mxu1 %vm186_vm0, %v7467_v7 }
 0x126   : > { %v14518_v11 = vpop.f32.mrb[0].mxu0  ;;  %v14563_v12 = vpop.f32.mrb[0].mxu1  ;;  %14886 = vmatprep.mubr.msk.f32.mxu1 %vm179_vm1, %v16194_v59  ;;  %14889 = vmatprep.subr.msk.mxu1 %vm186_vm0, %v13677_v9 }
 0x127   : > { %v988_v13 = vadd.f32 %v14518_v11, %v16286_v10  ;;  %v970_v14 = vpop.f32.mrb[1].mxu0  ;;  %v1785_v15 = vpop.f32.mrb[1].mxu1  ;;  %v1797_v21 = vadd.f32 %v14563_v12, %v16286_v10  ;;  %v13743_v11 = vld [vmem:[%s17071_s1 + $0x10] sm:$0xf]  ;;  %v16532_v12 = vld [vmem:[%s15520_s25 + $0x120] sm:$0xff] }
 0x128   : > { %v987_v16 = vadd.f32 %v16286_v10, %v970_v14  ;;  %v1796_v22 = vadd.f32 %v16286_v10, %v1785_v15  ;;  %v13796_v15 = vld [vmem:[%s17071_s1 + $0x10] sm:$0xf] }
 0x129   : > { %v990_v17 = vmax.f32 %v988_v13, 0.0  ;;  %v1799_v23 = vmax.f32 %v1797_v21, 0.0  ;;  %v13802_v21 = vld [vmem:[%s17071_s1 + $0x14] sm:$0xf] }
 0x12a   : > { %v989_v18 = vmax.f32 %v987_v16, 0.0  ;;  %v1798_v24 = vmax.f32 %v1796_v22, 0.0  ;;  %v16552_v16 = vld [vmem:[%s15520_s25 + $0x128] sm:$0xff] }
 0x12b   : > { %993 = vst.msk [vmem:[#allocation2 + $0x8] sm:$0xff] %vm991_vm2, %v990_v17  ;;  %14842 = vmatmul.mubr.msk.f32.vlgmr.msra.gmra.mrb[8].mxu0 %vm179_vm1, %v16142_v49  ;;  %14887 = vmatmul.mubr.msk.f32.vlgmr.msra.gmra.mrb[8].mxu1 %vm179_vm1, %v16208_v61  ;;  %v16430_v49 = vld [vmem:[%s15520_s25 + $0x109] sm:$0xff]  ;;  %v13749_v17 = vld [vmem:[%s17071_s1 + $0x14] sm:$0xf] }
 0x12c   : > { %992 = vst.msk [vmem:[#allocation2] sm:$0xff] %vm991_vm2, %v989_v18  ;;  %14845 = vmatpush3.msk.msra.mxu0 %vm186_vm0, %v13624_v8  ;;  %14846 = vmatprep.mubr.msk.f32.mxu0 %vm179_vm1, %v16170_v55  ;;  %v16467_v55 = vld [vmem:[%s15520_s25 + $0x112] sm:$0xff]  ;;  %v16558_v18 = vld [vmem:[%s15520_s25 + $0x121] sm:$0xff] }
 0x12d   : > { %14849 = vmatprep.subr.msk.mxu0 %vm186_vm0, %v13630_v19  ;;  %14890 = vmatpush3.msk.msra.mxu1 %vm186_vm0, %v13677_v9 }
 0x12e   : > { %14891 = vmatprep.mubr.msk.f32.mxu1 %vm179_vm1, %v16234_v2  ;;  %14894 = vmatprep.subr.msk.mxu1 %vm186_vm0, %v13683_v20 }
 0x133   : > { %v994_v27 = vld [vmem:[#allocation2] ss:$2 sm:$0xff]  ;;  %v996_v28 = vld [vmem:[#allocation2 + $0x1] ss:$2 sm:$0xff]  ;;  %14847 = vmatmul.mubr.msk.f32.vlgmr.msra.gmra.mrb[8].mxu0 %vm179_vm1, %v16184_v57  ;;  %14892 = vmatmul.mubr.msk.f32.vlgmr.msra.gmra.mrb[8].mxu1 %vm179_vm1, %v16254_v5 }
 0x134   : > { %1801 = vst.msk [vmem:[#allocation2 + $0x8] sm:$0xff] %vm991_vm2, %v1799_v23  ;;  %1800 = vst.msk [vmem:[#allocation2] sm:$0xff] %vm991_vm2, %v1798_v24  ;;  %14850 = vmatpush3.msk.msra.mxu0 %vm186_vm0, %v13630_v19  ;;  %14851 = vmatprep.mubr.msk.f32.mxu0 %vm179_vm1, %v16194_v59  ;;  %v997_v36 = vmax.f32 %v994_v27, %v996_v28  ;;  %v9084_v57 = vld [vmem:[%s17071_s1] sm:$0xf]  ;;  %v13784_v59 = vld [vmem:[%s17071_s1 + $0x8] sm:$0xf] }
 0x135   : > { %14854 = vmatprep.subr.msk.mxu0 %vm186_vm0, %v13636_v25  ;;  %14895 = vmatpush3.msk.msra.mxu1 %vm186_vm0, %v13683_v20  ;;  %v16585_v27 = vld [vmem:[%s15520_s25 + $0x122] sm:$0xff]  ;;  %v13808_v28 = vld [vmem:[%s17071_s1 + $0x18] sm:$0xf] }
 0x136   : > { %14896 = vmatprep.mubr.msk.f32.mxu1 %vm179_vm1, %v16323_v26  ;;  %14899 = vmatprep.subr.msk.mxu1 %vm186_vm0, %v13689_v29 }
 0x13b   : > { %14852 = vmatmul.mubr.msk.f32.vlgmr.msra.gmra.mrb[8].mxu0 %vm179_vm1, %v16208_v61  ;;  %14897 = vmatmul.mubr.msk.f32.vlgmr.msra.gmra.mrb[8].mxu1 %vm179_vm1, %v16343_v30  ;;  %v1802_v34 = vld [vmem:[#allocation2] ss:$2 sm:$0xff]  ;;  %v1803_v35 = vld [vmem:[#allocation2 + $0x1] ss:$2 sm:$0xff] }
 0x13c   : > { %14855 = vmatpush3.msk.msra.mxu0 %vm186_vm0, %v13636_v25  ;;  %14856 = vmatprep.mubr.msk.f32.mxu0 %vm179_vm1, %v16218_v63  ;;  %v1804_v37 = vmax.f32 %v1802_v34, %v1803_v35  ;;  %v13795_v25 = vld [vmem:[%s15520_s25 + $0x129] sm:$0xff]  ;;  %v13767_v34 = vld [vmem:[%s17071_s1 + $0x20] sm:$0xf] }
 0x13d   : > { %14859 = vmatprep.subr.msk.mxu0 %vm186_vm0, %v13642_v31  ;;  %14900 = vmatpush3.msk.msra.mxu1 %vm186_vm0, %v13689_v29  ;;  %v16599_v29 = vld [vmem:[%s15520_s25 + $0x12a] sm:$0xff]  ;;  %v16633_v35 = vld [vmem:[%s15520_s25 + $0x139] sm:$0xff] }
 0x13e   : > { %14901 = vmatprep.mubr.msk.f32.mxu1 %vm179_vm1, %v16349_v32  ;;  %14904 = vmatprep.subr.msk.mxu1 %vm186_vm0, %v13695_v33  ;;  %v1805_v38 = vmax.f32 %v997_v36, %v1804_v37  ;;  %v13820_v36 = vld [vmem:[%s17071_s1 + $0x20] sm:$0xf] }
 0x13f   : > { %v16647_v37 = vld [vmem:[%s15520_s25 + $0x141] sm:$0xff] }
 0x140   : > { %1806 = vst.msk [vmem:[%s16367_s21] sm:$0xff] %vm991_vm2, %v1805_v38  ;;  %v16650_v38 = vld [vmem:[%s15520_s25 + $0x13a] sm:$0xff] }
 0x143   : > { %14857 = vmatmul.mubr.msk.f32.vlgmr.msra.gmra.mrb[8].mxu0 %vm179_vm1, %v16231_v1  ;;  %14902 = vmatmul.mubr.msk.f32.vlgmr.msra.gmra.mrb[8].mxu1 %vm179_vm1, %v13688_v39 }
 0x144   : > { %14860 = vmatpush3.msk.msra.mxu0 %vm186_vm0, %v13642_v31  ;;  %14861 = vmatprep.mubr.msk.f32.mxu0 %vm179_vm1, %v16234_v2  ;;  %v16609_v31 = vld [vmem:[%s15520_s25 + $0x138] sm:$0xff] }
 0x145   : > { %14864 = vmatprep.subr.msk.mxu0 %vm186_vm0, %v13648_v40  ;;  %14905 = vmatpush3.msk.msra.mxu1 %vm186_vm0, %v13695_v33  ;;  %v16623_v33 = vld [vmem:[%s15520_s25 + $0x140] sm:$0xff] }
 0x146   : > { %14906 = vmatprep.mubr.msk.f32.mxu1 %vm179_vm1, %v16382_v41  ;;  %14909 = vmatprep.subr.msk.mxu1 %vm186_vm0, %v13701_v42 }
 0x14b   : > { %14862 = vmatmul.mubr.msk.f32.vlgmr.msra.gmra.mrb[8].mxu0 %vm179_vm1, %v16254_v5  ;;  %14907 = vmatmul.mubr.msk.f32.vlgmr.msra.gmra.mrb[8].mxu1 %vm179_vm1, %v16396_v43  ;;  %v13790_v5 = vld [vmem:[%s17071_s1 + $0xc] sm:$0xf] }
 0x14c   : > { %14865 = vmatpush3.msk.msra.mxu0 %vm186_vm0, %v13648_v40  ;;  %14866 = vmatprep.mubr.msk.f32.mxu0 %vm179_vm1, %v16323_v26  ;;  %v13882_v40 = vld [vmem:[%s17071_s1 + $0x4] sm:$0xf] }
 0x14d   : > { %14869 = vmatprep.subr.msk.mxu0 %vm186_vm0, %v13654_v44  ;;  %14910 = vmatpush3.msk.msra.mxu1 %vm186_vm0, %v13701_v42  ;;  %v9894_v42 = vld [vmem:[%s17071_s1] sm:$0xf] }
 0x14e   : > { %14911 = vmatprep.mubr.msk.f32.mxu1 %vm179_vm1, %v16406_v45  ;;  %14914 = vmatprep.subr.msk.mxu1 %vm186_vm0, %v13707_v46 }
 0x153   : > { %14867 = vmatmul.mubr.msk.f32.vlgmr.msra.gmra.mrb[8].mxu0 %vm179_vm1, %v16343_v30  ;;  %14912 = vmatmul.mubr.msk.f32.vlgmr.msra.gmra.mrb[8].mxu1 %vm179_vm1, %v16420_v47 }
 0x154   : > { %14870 = vmatpush3.msk.msra.mxu0 %vm186_vm0, %v13654_v44  ;;  %14871 = vmatprep.mubr.msk.f32.mxu0 %vm179_vm1, %v16349_v32  ;;  %v13838_v44 = vld [vmem:[%s17071_s1 + $0x8] sm:$0xf] }
 0x155   : > { %14874 = vmatprep.subr.msk.mxu0 %vm186_vm0, %v13660_v48  ;;  %14915 = vmatpush3.msk.msra.mxu1 %vm186_vm0, %v13707_v46 }
 0x156   : > { %14916 = vmatprep.mubr.msk.f32.mxu1 %vm179_vm1, %v16430_v49  ;;  %14919 = vmatprep.subr.msk.mxu1 %vm186_vm0, %v13713_v50 }
 0x15b   : > { %14872 = vmatmul.mubr.msk.f32.vlgmr.msra.gmra.mrb[8].mxu0 %vm179_vm1, %v13688_v39  ;;  %14917 = vmatmul.mubr.msk.f32.vlgmr.msra.gmra.mrb[8].mxu1 %vm179_vm1, %v16444_v51 }
 0x15c   : > { %14875 = vmatpush3.msk.msra.mxu0 %vm186_vm0, %v13660_v48  ;;  %14876 = vmatprep.mubr.msk.f32.mxu0 %vm179_vm1, %v16382_v41 }
 0x15d   : > { %14920 = vmatpush3.msk.msra.mxu1 %vm186_vm0, %v13713_v50  ;;  %14921 = vmatprep.mubr.msk.f32.mxu1 %vm179_vm1, %v16447_v52 }
 0x15e   : > { %14924 = vmatprep.subr.msk.mxu0 %vm186_vm0, %v13722_v53  ;;  %14969 = vmatprep.subr.msk.mxu1 %vm186_vm0, %v13775_v54 }
 0x163   : > { %14877 = vmatmul.mubr.msk.f32.vlgmr.msra.gmra.mrb[8].mxu0 %vm179_vm1, %v16396_v43  ;;  %14922 = vmatmul.mubr.msk.f32.vlgmr.msra.gmra.mrb[8].mxu1 %vm179_vm1, %v16467_v55 }
 0x164   : > { %14925 = vmatpush3.msk.msra.mxu0 %vm186_vm0, %v13722_v53  ;;  %14926 = vmatprep.mubr.msk.f32.mxu0 %vm179_vm1, %v16349_v32  ;;  %v13814_v32 = vld [vmem:[%s17071_s1 + $0x1c] sm:$0xf] }
 0x165   : > { %14929 = vmatprep.subr.msk.mxu0 %vm186_vm0, %v8277_v56  ;;  %14970 = vmatpush3.msk.msra.mxu1 %vm186_vm0, %v13775_v54  ;;  %v13844_v54 = vld [vmem:[%s17071_s1 + $0xc] sm:$0xf] }
 0x166   : > { %14971 = vmatprep.mubr.msk.f32.mxu1 %vm179_vm1, %v16430_v49  ;;  %14974 = vmatprep.subr.msk.mxu1 %vm186_vm0, %v9084_v57 }
 0x167   : > { %14927 = vmatmul.mubr.msk.f32.vlgmr.msra.gmra.mrb[10].mxu0 %vm179_vm1, %v13688_v39  ;;  %14972 = vmatmul.mubr.msk.f32.vlgmr.msra.gmra.mrb[10].mxu1 %vm179_vm1, %v16444_v51  ;;  %v13829_v39 = vld [vmem:[%s17071_s1 + $0x4] sm:$0xf] }
 0x168   : > { %14930 = vmatpush3.msk.msra.mxu0 %vm186_vm0, %v8277_v56  ;;  %14931 = vmatprep.mubr.msk.f32.mxu0 %vm179_vm1, %v16323_v26  ;;  %v13755_v26 = vld [vmem:[%s17071_s1 + $0x18] sm:$0xf] }
 0x169   : > { %14934 = vmatprep.subr.msk.mxu0 %vm186_vm0, %v13731_v58  ;;  %14975 = vmatpush3.msk.msra.mxu1 %vm186_vm0, %v9084_v57 }
 0x16a   : > { %v14608_v60 = vpop.f32.mrb[2].mxu0  ;;  %v14653_v61 = vpop.f32.mrb[2].mxu1  ;;  %14976 = vmatprep.mubr.msk.f32.mxu1 %vm179_vm1, %v16406_v45  ;;  %14979 = vmatprep.subr.msk.mxu1 %vm186_vm0, %v13784_v59 }
 0x16b   : > { %v2606_v62 = vadd.f32 %v14608_v60, %v16286_v10  ;;  %v2594_v63 = vpop.f32.mrb[3].mxu0  ;;  %v3401_v0 = vpop.f32.mrb[3].mxu1  ;;  %v3413_v6 = vadd.f32 %v14653_v61, %v16286_v10  ;;  %v13850_v60 = vld [vmem:[%s17071_s1 + $0x10] sm:$0xf] }
 0x16c   : > { %v2605_v1 = vadd.f32 %v16286_v10, %v2594_v63  ;;  %v3412_v7 = vadd.f32 %v16286_v10, %v3401_v0  ;;  %v16735_v61 = vld [vmem:[%s15520_s25 + $0x150] sm:$0xff] }
 0x16d   : > { %v2608_v2 = vmax.f32 %v2606_v62, 0.0  ;;  %v3415_v8 = vmax.f32 %v3413_v6, 0.0  ;;  %v13903_v0 = vld [vmem:[%s17071_s1 + $0x10] sm:$0xf]  ;;  %v13909_v6 = vld [vmem:[%s17071_s1 + $0x14] sm:$0xf] }
 0x16e   : > { %v2607_v3 = vmax.f32 %v2605_v1, 0.0  ;;  %v3414_v9 = vmax.f32 %v3412_v7, 0.0  ;;  %v16755_v1 = vld [vmem:[%s15520_s25 + $0x158] sm:$0xff] }
 0x16f   : > { %2610 = vst.msk [vmem:[#allocation2 + $0x8] sm:$0xff] %vm991_vm2, %v2608_v2  ;;  %14932 = vmatmul.mubr.msk.f32.vlgmr.msra.gmra.mrb[10].mxu0 %vm179_vm1, %v16343_v30  ;;  %14977 = vmatmul.mubr.msk.f32.vlgmr.msra.gmra.mrb[10].mxu1 %vm179_vm1, %v16420_v47  ;;  %v13761_v30 = vld [vmem:[%s17071_s1 + $0x1c] sm:$0xf]  ;;  %v13856_v2 = vld [vmem:[%s17071_s1 + $0x14] sm:$0xf] }
 0x170   : > { %2609 = vst.msk [vmem:[#allocation2] sm:$0xff] %vm991_vm2, %v2607_v3  ;;  %14935 = vmatpush3.msk.msra.mxu0 %vm186_vm0, %v13731_v58  ;;  %14936 = vmatprep.mubr.msk.f32.mxu0 %vm179_vm1, %v16382_v41  ;;  %v16670_v41 = vld [vmem:[%s15520_s25 + $0x142] sm:$0xff]  ;;  %v16761_v3 = vld [vmem:[%s15520_s25 + $0x151] sm:$0xff] }
 0x171   : > { %14939 = vmatprep.subr.msk.mxu0 %vm186_vm0, %v13737_v4  ;;  %14980 = vmatpush3.msk.msra.mxu1 %vm186_vm0, %v13784_v59 }
 0x172   : > { %14981 = vmatprep.mubr.msk.f32.mxu1 %vm179_vm1, %v16447_v52  ;;  %14984 = vmatprep.subr.msk.mxu1 %vm186_vm0, %v13790_v5 }
 0x177   : > { %v2611_v13 = vld [vmem:[#allocation2] ss:$2 sm:$0xff]  ;;  %v2612_v14 = vld [vmem:[#allocation2 + $0x1] ss:$2 sm:$0xff]  ;;  %14937 = vmatmul.mubr.msk.f32.vlgmr.msra.gmra.mrb[10].mxu0 %vm179_vm1, %v16396_v43  ;;  %14982 = vmatmul.mubr.msk.f32.vlgmr.msra.gmra.mrb[10].mxu1 %vm179_vm1, %v16467_v55 }
 0x178   : > { %3417 = vst.msk [vmem:[#allocation2 + $0x8] sm:$0xff] %vm991_vm2, %v3415_v8  ;;  %3416 = vst.msk [vmem:[#allocation2] sm:$0xff] %vm991_vm2, %v3414_v9  ;;  %14940 = vmatpush3.msk.msra.mxu0 %vm186_vm0, %v13737_v4  ;;  %14941 = vmatprep.mubr.msk.f32.mxu0 %vm179_vm1, %v16406_v45  ;;  %v2613_v22 = vmax.f32 %v2611_v13, %v2612_v14  ;;  %v10701_v43 = vld [vmem:[%s17071_s1] sm:$0xf]  ;;  %v13891_v45 = vld [vmem:[%s17071_s1 + $0x8] sm:$0xf] }
 0x179   : > { %14944 = vmatprep.subr.msk.mxu0 %vm186_vm0, %v13743_v11  ;;  %14985 = vmatpush3.msk.msra.mxu1 %vm186_vm0, %v13790_v5  ;;  %v16788_v13 = vld [vmem:[%s15520_s25 + $0x152] sm:$0xff] }
 0x17a   : > { %14986 = vmatprep.mubr.msk.f32.mxu1 %vm179_vm1, %v16532_v12  ;;  %14989 = vmatprep.subr.msk.mxu1 %vm186_vm0, %v13796_v15  ;;  %v13915_v14 = vld [vmem:[%s17071_s1 + $0x18] sm:$0xf] }
 0x17f   : > { %v3418_v19 = vld [vmem:[#allocation2] ss:$2 sm:$0xff]  ;;  %v3419_v20 = vld [vmem:[#allocation2 + $0x1] ss:$2 sm:$0xff]  ;;  %14942 = vmatmul.mubr.msk.f32.vlgmr.msra.gmra.mrb[10].mxu0 %vm179_vm1, %v16420_v47  ;;  %14987 = vmatmul.mubr.msk.f32.vlgmr.msra.gmra.mrb[10].mxu1 %vm179_vm1, %v16552_v16 }
 0x180   : > { %v3420_v23 = vmax.f32 %v3418_v19, %v3419_v20  ;;  %14945 = vmatpush3.msk.msra.mxu0 %vm186_vm0, %v13743_v11  ;;  %14946 = vmatprep.mubr.msk.f32.mxu0 %vm179_vm1, %v16430_v49  ;;  %v13902_v11 = vld [vmem:[%s15520_s25 + $0x159] sm:$0xff]  ;;  %v16826_v19 = vld [vmem:[%s15520_s25 + $0x170] sm:$0xff] }
 0x181   : > { %14949 = vmatprep.subr.msk.mxu0 %vm186_vm0, %v13749_v17  ;;  %14990 = vmatpush3.msk.msra.mxu1 %vm186_vm0, %v13796_v15  ;;  %v16802_v15 = vld [vmem:[%s15520_s25 + $0x15a] sm:$0xff] }
 0x182   : > { %v3421_v24 = vmax.f32 %v2613_v22, %v3420_v23  ;;  %14991 = vmatprep.mubr.msk.f32.mxu1 %vm179_vm1, %v16558_v18  ;;  %14994 = vmatprep.subr.msk.mxu1 %vm186_vm0, %v13802_v21  ;;  %v13874_v20 = vld [vmem:[%s17071_s1 + $0x20] sm:$0xf]  ;;  %v16850_v23 = vld [vmem:[%s15520_s25 + $0x171] sm:$0xff] }
 0x183   : > { %v13927_v22 = vld [vmem:[%s17071_s1 + $0x20] sm:$0xf] }
 0x184   : > { %13396 = vst.msk [vmem:[%s16367_s21 + $0x8] sm:$0xff] %vm991_vm2, %v3421_v24  ;;  %v16853_v24 = vld [vmem:[%s15520_s25 + $0x16a] sm:$0xff] }
 0x187   : > { %14947 = vmatmul.mubr.msk.f32.vlgmr.msra.gmra.mrb[10].mxu0 %vm179_vm1, %v16444_v51  ;;  %14992 = vmatmul.mubr.msk.f32.vlgmr.msra.gmra.mrb[10].mxu1 %vm179_vm1, %v13795_v25 }
 0x188   : > { %14950 = vmatpush3.msk.msra.mxu0 %vm186_vm0, %v13749_v17  ;;  %14951 = vmatprep.mubr.msk.f32.mxu0 %vm179_vm1, %v16447_v52  ;;  %v16812_v17 = vld [vmem:[%s15520_s25 + $0x168] sm:$0xff] }
 0x189   : > { %14954 = vmatprep.subr.msk.mxu0 %vm186_vm0, %v13755_v26  ;;  %14995 = vmatpush3.msk.msra.mxu1 %vm186_vm0, %v13802_v21  ;;  %v16836_v21 = vld [vmem:[%s15520_s25 + $0x169] sm:$0xff] }
 0x18a   : > { %14996 = vmatprep.mubr.msk.f32.mxu1 %vm179_vm1, %v16585_v27  ;;  %14999 = vmatprep.subr.msk.mxu1 %vm186_vm0, %v13808_v28 }
 0x18f   : > { %14952 = vmatmul.mubr.msk.f32.vlgmr.msra.gmra.mrb[10].mxu0 %vm179_vm1, %v16467_v55  ;;  %14997 = vmatmul.mubr.msk.f32.vlgmr.msra.gmra.mrb[10].mxu1 %vm179_vm1, %v16599_v29  ;;  %v13897_v55 = vld [vmem:[%s17071_s1 + $0xc] sm:$0xf] }
 0x190   : > { %14955 = vmatpush3.msk.msra.mxu0 %vm186_vm0, %v13755_v26  ;;  %14956 = vmatprep.mubr.msk.f32.mxu0 %vm179_vm1, %v16532_v12  ;;  %v13989_v26 = vld [vmem:[%s17071_s1 + $0x4] sm:$0xf] }
 0x191   : > { %14959 = vmatprep.subr.msk.mxu0 %vm186_vm0, %v13761_v30  ;;  %15000 = vmatpush3.msk.msra.mxu1 %vm186_vm0, %v13808_v28  ;;  %v11511_v28 = vld [vmem:[%s17071_s1] sm:$0xf] }
 0x192   : > { %15001 = vmatprep.mubr.msk.f32.mxu1 %vm179_vm1, %v16609_v31  ;;  %15004 = vmatprep.subr.msk.mxu1 %vm186_vm0, %v13814_v32 }
 0x197   : > { %14957 = vmatmul.mubr.msk.f32.vlgmr.msra.gmra.mrb[10].mxu0 %vm179_vm1, %v16552_v16  ;;  %15002 = vmatmul.mubr.msk.f32.vlgmr.msra.gmra.mrb[10].mxu1 %vm179_vm1, %v16623_v33 }
 0x198   : > { %14960 = vmatpush3.msk.msra.mxu0 %vm186_vm0, %v13761_v30  ;;  %14961 = vmatprep.mubr.msk.f32.mxu0 %vm179_vm1, %v16558_v18  ;;  %v13945_v30 = vld [vmem:[%s17071_s1 + $0x8] sm:$0xf] }
 0x199   : > { %14964 = vmatprep.subr.msk.mxu0 %vm186_vm0, %v13767_v34  ;;  %15005 = vmatpush3.msk.msra.mxu1 %vm186_vm0, %v13814_v32 }
 0x19a   : > { %15006 = vmatprep.mubr.msk.f32.mxu1 %vm179_vm1, %v16633_v35  ;;  %15009 = vmatprep.subr.msk.mxu1 %vm186_vm0, %v13820_v36 }
 0x19f   : > { %14962 = vmatmul.mubr.msk.f32.vlgmr.msra.gmra.mrb[10].mxu0 %vm179_vm1, %v13795_v25  ;;  %15007 = vmatmul.mubr.msk.f32.vlgmr.msra.gmra.mrb[10].mxu1 %vm179_vm1, %v16647_v37 }
 0x1a0   : > { %14965 = vmatpush3.msk.msra.mxu0 %vm186_vm0, %v13767_v34  ;;  %14966 = vmatprep.mubr.msk.f32.mxu0 %vm179_vm1, %v16585_v27 }
 0x1a1   : > { %15010 = vmatpush3.msk.msra.mxu1 %vm186_vm0, %v13820_v36  ;;  %15011 = vmatprep.mubr.msk.f32.mxu1 %vm179_vm1, %v16650_v38 }
 0x1a2   : > { %15014 = vmatprep.subr.msk.mxu0 %vm186_vm0, %v13829_v39  ;;  %15059 = vmatprep.subr.msk.mxu1 %vm186_vm0, %v13882_v40 }
 0x1a7   : > { %14967 = vmatmul.mubr.msk.f32.vlgmr.msra.gmra.mrb[10].mxu0 %vm179_vm1, %v16599_v29  ;;  %15012 = vmatmul.mubr.msk.f32.vlgmr.msra.gmra.mrb[10].mxu1 %vm179_vm1, %v16670_v41 }
 0x1a8   : > { %15015 = vmatpush3.msk.msra.mxu0 %vm186_vm0, %v13829_v39  ;;  %15016 = vmatprep.mubr.msk.f32.mxu0 %vm179_vm1, %v16558_v18  ;;  %v13921_v18 = vld [vmem:[%s17071_s1 + $0x1c] sm:$0xf] }
 0x1a9   : > { %15019 = vmatprep.subr.msk.mxu0 %vm186_vm0, %v9894_v42  ;;  %15060 = vmatpush3.msk.msra.mxu1 %vm186_vm0, %v13882_v40  ;;  %v13951_v40 = vld [vmem:[%s17071_s1 + $0xc] sm:$0xf] }
 0x1aa   : > { %15061 = vmatprep.mubr.msk.f32.mxu1 %vm179_vm1, %v16633_v35  ;;  %15064 = vmatprep.subr.msk.mxu1 %vm186_vm0, %v10701_v43 }
 0x1ab   : > { %15017 = vmatmul.mubr.msk.f32.vlgmr.msra.gmra.mrb[12].mxu0 %vm179_vm1, %v13795_v25  ;;  %15062 = vmatmul.mubr.msk.f32.vlgmr.msra.gmra.mrb[12].mxu1 %vm179_vm1, %v16647_v37  ;;  %v13936_v25 = vld [vmem:[%s17071_s1 + $0x4] sm:$0xf] }
 0x1ac   : > { %15020 = vmatpush3.msk.msra.mxu0 %vm186_vm0, %v9894_v42  ;;  %15021 = vmatprep.mubr.msk.f32.mxu0 %vm179_vm1, %v16532_v12  ;;  %v13862_v12 = vld [vmem:[%s17071_s1 + $0x18] sm:$0xf] }
 0x1ad   : > { %15024 = vmatprep.subr.msk.mxu0 %vm186_vm0, %v13838_v44  ;;  %15065 = vmatpush3.msk.msra.mxu1 %vm186_vm0, %v10701_v43 }
 0x1ae   : > { %v14698_v46 = vpop.f32.mrb[4].mxu0  ;;  %v14743_v47 = vpop.f32.mrb[4].mxu1  ;;  %15066 = vmatprep.mubr.msk.f32.mxu1 %vm179_vm1, %v16609_v31  ;;  %15069 = vmatprep.subr.msk.mxu1 %vm186_vm0, %v13891_v45 }
 0x1af   : > { %v4223_v48 = vadd.f32 %v14698_v46, %v16286_v10  ;;  %v4211_v49 = vpop.f32.mrb[5].mxu0  ;;  %v5018_v50 = vpop.f32.mrb[5].mxu1  ;;  %v5030_v56 = vadd.f32 %v14743_v47, %v16286_v10  ;;  %v13957_v46 = vld [vmem:[%s17071_s1 + $0x10] sm:$0xf]  ;;  %v14002_v47 = vld [vmem:[%s15520_s25 + $0x180] sm:$0xff] }
 0x1b0   : > { %v4222_v51 = vadd.f32 %v16286_v10, %v4211_v49  ;;  %v5029_v57 = vadd.f32 %v16286_v10, %v5018_v50  ;;  %v14010_v50 = vld [vmem:[%s17071_s1 + $0x10] sm:$0xf] }
 0x1b1   : > { %v4225_v52 = vmax.f32 %v4223_v48, 0.0  ;;  %v5032_v58 = vmax.f32 %v5030_v56, 0.0  ;;  %v14016_v56 = vld [vmem:[%s17071_s1 + $0x14] sm:$0xf] }
 0x1b2   : > { %v4224_v53 = vmax.f32 %v4222_v51, 0.0  ;;  %v5031_v59 = vmax.f32 %v5029_v57, 0.0  ;;  %v14003_v51 = vld [vmem:[%s15520_s25 + $0x188] sm:$0xff] }
 0x1b3   : > { %4227 = vst.msk [vmem:[#allocation2 + $0x8] sm:$0xff] %vm991_vm2, %v4225_v52  ;;  %15022 = vmatmul.mubr.msk.f32.vlgmr.msra.gmra.mrb[12].mxu0 %vm179_vm1, %v16552_v16  ;;  %15067 = vmatmul.mubr.msk.f32.vlgmr.msra.gmra.mrb[12].mxu1 %vm179_vm1, %v16623_v33  ;;  %v13868_v16 = vld [vmem:[%s17071_s1 + $0x1c] sm:$0xf]  ;;  %v13963_v52 = vld [vmem:[%s17071_s1 + $0x14] sm:$0xf] }
 0x1b4   : > { %4226 = vst.msk [vmem:[#allocation2] sm:$0xff] %vm991_vm2, %v4224_v53  ;;  %15025 = vmatpush3.msk.msra.mxu0 %vm186_vm0, %v13838_v44  ;;  %15026 = vmatprep.mubr.msk.f32.mxu0 %vm179_vm1, %v16585_v27  ;;  %v16873_v27 = vld [vmem:[%s15520_s25 + $0x172] sm:$0xff]  ;;  %v14008_v53 = vld [vmem:[%s15520_s25 + $0x181] sm:$0xff] }
 0x1b5   : > { %15029 = vmatprep.subr.msk.mxu0 %vm186_vm0, %v13844_v54  ;;  %15070 = vmatpush3.msk.msra.mxu1 %vm186_vm0, %v13891_v45 }
 0x1b6   : > { %15071 = vmatprep.mubr.msk.f32.mxu1 %vm179_vm1, %v16650_v38  ;;  %15074 = vmatprep.subr.msk.mxu1 %vm186_vm0, %v13897_v55 }
 0x1bb   : > { %v4228_v62 = vld [vmem:[#allocation2] ss:$2 sm:$0xff]  ;;  %v4229_v63 = vld [vmem:[#allocation2 + $0x1] ss:$2 sm:$0xff]  ;;  %15027 = vmatmul.mubr.msk.f32.vlgmr.msra.gmra.mrb[12].mxu0 %vm179_vm1, %v16599_v29  ;;  %15072 = vmatmul.mubr.msk.f32.vlgmr.msra.gmra.mrb[12].mxu1 %vm179_vm1, %v16670_v41 }
 0x1bc   : > { %5034 = vst.msk [vmem:[#allocation2 + $0x8] sm:$0xff] %vm991_vm2, %v5032_v58  ;;  %5033 = vst.msk [vmem:[#allocation2] sm:$0xff] %vm991_vm2, %v5031_v59  ;;  %15030 = vmatpush3.msk.msra.mxu0 %vm186_vm0, %v13844_v54  ;;  %15031 = vmatprep.mubr.msk.f32.mxu0 %vm179_vm1, %v16609_v31  ;;  %v4230_v7 = vmax.f32 %v4228_v62, %v4229_v63  ;;  %v12318_v29 = vld [vmem:[%s17071_s1] sm:$0xf]  ;;  %v13998_v31 = vld [vmem:[%s17071_s1 + $0x8] sm:$0xf] }
 0x1bd   : > { %15034 = vmatprep.subr.msk.mxu0 %vm186_vm0, %v13850_v60  ;;  %15075 = vmatpush3.msk.msra.mxu1 %vm186_vm0, %v13897_v55  ;;  %v14014_v62 = vld [vmem:[%s15520_s25 + $0x182] sm:$0xff]  ;;  %v14022_v63 = vld [vmem:[%s17071_s1 + $0x18] sm:$0xf] }
 0x1be   : > { %15076 = vmatprep.mubr.msk.f32.mxu1 %vm179_vm1, %v16735_v61  ;;  %15079 = vmatprep.subr.msk.mxu1 %vm186_vm0, %v13903_v0 }
 0x1c3   : > { %v5035_v4 = vld [vmem:[#allocation2] ss:$2 sm:$0xff]  ;;  %v5036_v5 = vld [vmem:[#allocation2 + $0x1] ss:$2 sm:$0xff]  ;;  %15032 = vmatmul.mubr.msk.f32.vlgmr.msra.gmra.mrb[12].mxu0 %vm179_vm1, %v16623_v33  ;;  %15077 = vmatmul.mubr.msk.f32.vlgmr.msra.gmra.mrb[12].mxu1 %vm179_vm1, %v16755_v1 }
 0x1c4   : > { %v5037_v8 = vmax.f32 %v5035_v4, %v5036_v5  ;;  %15035 = vmatpush3.msk.msra.mxu0 %vm186_vm0, %v13850_v60  ;;  %15036 = vmatprep.mubr.msk.f32.mxu0 %vm179_vm1, %v16633_v35  ;;  %v14009_v60 = vld [vmem:[%s15520_s25 + $0x189] sm:$0xff]  ;;  %v14021_v4 = vld [vmem:[%s15520_s25 + $0x1a0] sm:$0xff] }
 0x1c5   : > { %15039 = vmatprep.subr.msk.mxu0 %vm186_vm0, %v13856_v2  ;;  %15080 = vmatpush3.msk.msra.mxu1 %vm186_vm0, %v13903_v0  ;;  %v14015_v0 = vld [vmem:[%s15520_s25 + $0x18a] sm:$0xff]  ;;  %v13981_v5 = vld [vmem:[%s17071_s1 + $0x20] sm:$0xf] }
 0x1c6   : > { %v5038_v9 = vmax.f32 %v4230_v7, %v5037_v8  ;;  %15081 = vmatprep.mubr.msk.f32.mxu1 %vm179_vm1, %v16761_v3  ;;  %15084 = vmatprep.subr.msk.mxu1 %vm186_vm0, %v13909_v6  ;;  %v14034_v7 = vld [vmem:[%s17071_s1 + $0x20] sm:$0xf] }
 0x1c7   : > { %v14027_v8 = vld [vmem:[%s15520_s25 + $0x1a1] sm:$0xff] }
 0x1c8   : > { %13503 = vst.msk [vmem:[%s16367_s21 + $0x10] sm:$0xff] %vm991_vm2, %v5038_v9  ;;  %v14032_v9 = vld [vmem:[%s15520_s25 + $0x19a] sm:$0xff] }
 0x1cb   : > { %15037 = vmatmul.mubr.msk.f32.vlgmr.msra.gmra.mrb[12].mxu0 %vm179_vm1, %v16647_v37  ;;  %15082 = vmatmul.mubr.msk.f32.vlgmr.msra.gmra.mrb[12].mxu1 %vm179_vm1, %v13902_v11 }
 0x1cc   : > { %15040 = vmatpush3.msk.msra.mxu0 %vm186_vm0, %v13856_v2  ;;  %15041 = vmatprep.mubr.msk.f32.mxu0 %vm179_vm1, %v16650_v38  ;;  %v14020_v2 = vld [vmem:[%s15520_s25 + $0x198] sm:$0xff] }
 0x1cd   : > { %15044 = vmatprep.subr.msk.mxu0 %vm186_vm0, %v13862_v12  ;;  %15085 = vmatpush3.msk.msra.mxu1 %vm186_vm0, %v13909_v6  ;;  %v14026_v6 = vld [vmem:[%s15520_s25 + $0x199] sm:$0xff] }
 0x1ce   : > { %15086 = vmatprep.mubr.msk.f32.mxu1 %vm179_vm1, %v16788_v13  ;;  %15089 = vmatprep.subr.msk.mxu1 %vm186_vm0, %v13915_v14 }
 0x1d3   : > { %15042 = vmatmul.mubr.msk.f32.vlgmr.msra.gmra.mrb[12].mxu0 %vm179_vm1, %v16670_v41  ;;  %15087 = vmatmul.mubr.msk.f32.vlgmr.msra.gmra.mrb[12].mxu1 %vm179_vm1, %v16802_v15  ;;  %v14004_v41 = vld [vmem:[%s17071_s1 + $0xc] sm:$0xf] }
 0x1d4   : > { %15045 = vmatpush3.msk.msra.mxu0 %vm186_vm0, %v13862_v12  ;;  %15046 = vmatprep.mubr.msk.f32.mxu0 %vm179_vm1, %v16735_v61 }
 0x1d5   : > { %15049 = vmatprep.subr.msk.mxu0 %vm186_vm0, %v13868_v16  ;;  %15090 = vmatpush3.msk.msra.mxu1 %vm186_vm0, %v13915_v14 }
 0x1d6   : > { %15091 = vmatprep.mubr.msk.f32.mxu1 %vm179_vm1, %v16812_v17  ;;  %15094 = vmatprep.subr.msk.mxu1 %vm186_vm0, %v13921_v18 }
 0x1db   : > { %15047 = vmatmul.mubr.msk.f32.vlgmr.msra.gmra.mrb[12].mxu0 %vm179_vm1, %v16755_v1  ;;  %15092 = vmatmul.mubr.msk.f32.vlgmr.msra.gmra.mrb[12].mxu1 %vm179_vm1, %v16826_v19 }
 0x1dc   : > { %15050 = vmatpush3.msk.msra.mxu0 %vm186_vm0, %v13868_v16  ;;  %15051 = vmatprep.mubr.msk.f32.mxu0 %vm179_vm1, %v16761_v3 }
 0x1dd   : > { %15054 = vmatprep.subr.msk.mxu0 %vm186_vm0, %v13874_v20  ;;  %15095 = vmatpush3.msk.msra.mxu1 %vm186_vm0, %v13921_v18 }
 0x1de   : > { %15096 = vmatprep.mubr.msk.f32.mxu1 %vm179_vm1, %v16836_v21  ;;  %15099 = vmatprep.subr.msk.mxu1 %vm186_vm0, %v13927_v22 }
 0x1e3   : > { %15052 = vmatmul.mubr.msk.f32.vlgmr.msra.gmra.mrb[12].mxu0 %vm179_vm1, %v13902_v11  ;;  %15097 = vmatmul.mubr.msk.f32.vlgmr.msra.gmra.mrb[12].mxu1 %vm179_vm1, %v16850_v23 }
 0x1e4   : > { %15055 = vmatpush3.msk.msra.mxu0 %vm186_vm0, %v13874_v20  ;;  %15056 = vmatprep.mubr.msk.f32.mxu0 %vm179_vm1, %v16788_v13 }
 0x1e5   : > { %15100 = vmatpush3.msk.msra.mxu1 %vm186_vm0, %v13927_v22  ;;  %15101 = vmatprep.mubr.msk.f32.mxu1 %vm179_vm1, %v16853_v24 }
 0x1e6   : > { %15104 = vmatprep.subr.msk.mxu0 %vm186_vm0, %v13936_v25  ;;  %15149 = vmatprep.subr.msk.mxu1 %vm186_vm0, %v13989_v26 }
 0x1eb   : > { %15057 = vmatmul.mubr.msk.f32.vlgmr.msra.gmra.mrb[12].mxu0 %vm179_vm1, %v16802_v15  ;;  %15102 = vmatmul.mubr.msk.f32.vlgmr.msra.gmra.mrb[12].mxu1 %vm179_vm1, %v16873_v27 }
 0x1ec   : > { %15105 = vmatpush3.msk.msra.mxu0 %vm186_vm0, %v13936_v25  ;;  %15106 = vmatprep.mubr.msk.f32.mxu0 %vm179_vm1, %v16761_v3  ;;  %v14028_v3 = vld [vmem:[%s17071_s1 + $0x1c] sm:$0xf] }
 0x1ed   : > { %15109 = vmatprep.subr.msk.mxu0 %vm186_vm0, %v11511_v28  ;;  %15150 = vmatpush3.msk.msra.mxu1 %vm186_vm0, %v13989_v26 }
 0x1ee   : > { %15151 = vmatprep.mubr.msk.f32.mxu1 %vm179_vm1, %v16836_v21  ;;  %15154 = vmatprep.subr.msk.mxu1 %vm186_vm0, %v12318_v29 }
 0x1ef   : > { %15107 = vmatmul.mubr.msk.f32.vlgmr.msra.gmra.mrb[14].mxu0 %vm179_vm1, %v13902_v11  ;;  %15152 = vmatmul.mubr.msk.f32.vlgmr.msra.gmra.mrb[14].mxu1 %vm179_vm1, %v16850_v23  ;;  %v14033_v11 = vld [vmem:[%s15520_s25 + $0x1a2] sm:$0xff] }
 0x1f0   : > { %15110 = vmatpush3.msk.msra.mxu0 %vm186_vm0, %v11511_v28  ;;  %15111 = vmatprep.mubr.msk.f32.mxu0 %vm179_vm1, %v16735_v61  ;;  %v13969_v61 = vld [vmem:[%s17071_s1 + $0x18] sm:$0xf] }
 0x1f1   : > { %15114 = vmatprep.subr.msk.mxu0 %vm186_vm0, %v13945_v30  ;;  %15155 = vmatpush3.msk.msra.mxu1 %vm186_vm0, %v12318_v29 }
 0x1f2   : > { %v14788_v32 = vpop.f32.mrb[6].mxu0  ;;  %v14833_v33 = vpop.f32.mrb[6].mxu1  ;;  %15156 = vmatprep.mubr.msk.f32.mxu1 %vm179_vm1, %v16812_v17  ;;  %15159 = vmatprep.subr.msk.mxu1 %vm186_vm0, %v13998_v31 }
 0x1f3   : > { %v5840_v34 = vadd.f32 %v14788_v32, %v16286_v10  ;;  %v5828_v35 = vpop.f32.mrb[7].mxu0  ;;  %v6635_v36 = vpop.f32.mrb[7].mxu1  ;;  %v6647_v42 = vadd.f32 %v14833_v33, %v16286_v10 }
 0x1f4   : > { %v5839_v37 = vadd.f32 %v16286_v10, %v5828_v35  ;;  %v6646_v43 = vadd.f32 %v16286_v10, %v6635_v36 }
 0x1f5   : > { %v5842_v38 = vmax.f32 %v5840_v34, 0.0  ;;  %v6649_v44 = vmax.f32 %v6647_v42, 0.0 }
 0x1f6   : > { %v5841_v39 = vmax.f32 %v5839_v37, 0.0  ;;  %v6648_v45 = vmax.f32 %v6646_v43, 0.0 }
 0x1f7   : > { %5844 = vst.msk [vmem:[#allocation2 + $0x8] sm:$0xff] %vm991_vm2, %v5842_v38  ;;  %15112 = vmatmul.mubr.msk.f32.vlgmr.msra.gmra.mrb[14].mxu0 %vm179_vm1, %v16755_v1  ;;  %15157 = vmatmul.mubr.msk.f32.vlgmr.msra.gmra.mrb[14].mxu1 %vm179_vm1, %v16826_v19  ;;  %v13975_v1 = vld [vmem:[%s17071_s1 + $0x1c] sm:$0xf] }
 0x1f8   : > { %5843 = vst.msk [vmem:[#allocation2] sm:$0xff] %vm991_vm2, %v5841_v39  ;;  %15115 = vmatpush3.msk.msra.mxu0 %vm186_vm0, %v13945_v30  ;;  %15116 = vmatprep.mubr.msk.f32.mxu0 %vm179_vm1, %v16788_v13 }
 0x1f9   : > { %15119 = vmatprep.subr.msk.mxu0 %vm186_vm0, %v13951_v40  ;;  %15160 = vmatpush3.msk.msra.mxu1 %vm186_vm0, %v13998_v31 }
 0x1fa   : > { %15161 = vmatprep.mubr.msk.f32.mxu1 %vm179_vm1, %v16853_v24  ;;  %15164 = vmatprep.subr.msk.mxu1 %vm186_vm0, %v14004_v41 }
 0x1ff   : > { %v5845_v48 = vld [vmem:[#allocation2] ss:$2 sm:$0xff]  ;;  %v5846_v49 = vld [vmem:[#allocation2 + $0x1] ss:$2 sm:$0xff]  ;;  %15117 = vmatmul.mubr.msk.f32.vlgmr.msra.gmra.mrb[14].mxu0 %vm179_vm1, %v16802_v15  ;;  %15162 = vmatmul.mubr.msk.f32.vlgmr.msra.gmra.mrb[14].mxu1 %vm179_vm1, %v16873_v27 }
 0x200   : > { %6651 = vst.msk [vmem:[#allocation2 + $0x8] sm:$0xff] %vm991_vm2, %v6649_v44  ;;  %6650 = vst.msk [vmem:[#allocation2] sm:$0xff] %vm991_vm2, %v6648_v45  ;;  %15120 = vmatpush3.msk.msra.mxu0 %vm186_vm0, %v13951_v40  ;;  %15121 = vmatprep.mubr.msk.f32.mxu0 %vm179_vm1, %v16812_v17  ;;  %v5847_v57 = vmax.f32 %v5845_v48, %v5846_v49 }
 0x201   : > { %15124 = vmatprep.subr.msk.mxu0 %vm186_vm0, %v13957_v46  ;;  %15165 = vmatpush3.msk.msra.mxu1 %vm186_vm0, %v14004_v41 }
 0x202   : > { %15166 = vmatprep.mubr.msk.f32.mxu1 %vm179_vm1, %v14002_v47  ;;  %15169 = vmatprep.subr.msk.mxu1 %vm186_vm0, %v14010_v50 }
 0x207   : > { %v6652_v54 = vld [vmem:[#allocation2] ss:$2 sm:$0xff]  ;;  %v6653_v55 = vld [vmem:[#allocation2 + $0x1] ss:$2 sm:$0xff]  ;;  %15122 = vmatmul.mubr.msk.f32.vlgmr.msra.gmra.mrb[14].mxu0 %vm179_vm1, %v16826_v19  ;;  %15167 = vmatmul.mubr.msk.f32.vlgmr.msra.gmra.mrb[14].mxu1 %vm179_vm1, %v14003_v51 }
 0x208   : > { %v6654_v58 = vmax.f32 %v6652_v54, %v6653_v55  ;;  %15125 = vmatpush3.msk.msra.mxu0 %vm186_vm0, %v13957_v46  ;;  %15126 = vmatprep.mubr.msk.f32.mxu0 %vm179_vm1, %v16836_v21 }
 0x209   : > { %15129 = vmatprep.subr.msk.mxu0 %vm186_vm0, %v13963_v52  ;;  %15170 = vmatpush3.msk.msra.mxu1 %vm186_vm0, %v14010_v50 }
 0x20a   : > { %v6655_v59 = vmax.f32 %v5847_v57, %v6654_v58  ;;  %15171 = vmatprep.mubr.msk.f32.mxu1 %vm179_vm1, %v14008_v53  ;;  %15174 = vmatprep.subr.msk.mxu1 %vm186_vm0, %v14016_v56 }
 0x20c   : > { %13610 = vst.msk [vmem:[%s16367_s21 + $0x18] sm:$0xff] %vm991_vm2, %v6655_v59 }
 0x20f   : > { %15127 = vmatmul.mubr.msk.f32.vlgmr.msra.gmra.mrb[14].mxu0 %vm179_vm1, %v16850_v23  ;;  %15172 = vmatmul.mubr.msk.f32.vlgmr.msra.gmra.mrb[14].mxu1 %vm179_vm1, %v14009_v60 }
 0x210   : > { %15130 = vmatpush3.msk.msra.mxu0 %vm186_vm0, %v13963_v52  ;;  %15131 = vmatprep.mubr.msk.f32.mxu0 %vm179_vm1, %v16853_v24 }
 0x211   : > { %15134 = vmatprep.subr.msk.mxu0 %vm186_vm0, %v13969_v61  ;;  %15175 = vmatpush3.msk.msra.mxu1 %vm186_vm0, %v14016_v56 }
 0x212   : > { %15176 = vmatprep.mubr.msk.f32.mxu1 %vm179_vm1, %v14014_v62  ;;  %15179 = vmatprep.subr.msk.mxu1 %vm186_vm0, %v14022_v63 }
 0x217   : > { %15132 = vmatmul.mubr.msk.f32.vlgmr.msra.gmra.mrb[14].mxu0 %vm179_vm1, %v16873_v27  ;;  %15177 = vmatmul.mubr.msk.f32.vlgmr.msra.gmra.mrb[14].mxu1 %vm179_vm1, %v14015_v0 }
 0x218   : > { %15135 = vmatpush3.msk.msra.mxu0 %vm186_vm0, %v13969_v61  ;;  %15136 = vmatprep.mubr.msk.f32.mxu0 %vm179_vm1, %v14002_v47 }
 0x219   : > { %15139 = vmatprep.subr.msk.mxu0 %vm186_vm0, %v13975_v1  ;;  %15180 = vmatpush3.msk.msra.mxu1 %vm186_vm0, %v14022_v63 }
 0x21a   : > { %15181 = vmatprep.mubr.msk.f32.mxu1 %vm179_vm1, %v14020_v2  ;;  %15184 = vmatprep.subr.msk.mxu1 %vm186_vm0, %v14028_v3 }
 0x21f   : > { %15137 = vmatmul.mubr.msk.f32.vlgmr.msra.gmra.mrb[14].mxu0 %vm179_vm1, %v14003_v51  ;;  %15182 = vmatmul.mubr.msk.f32.vlgmr.msra.gmra.mrb[14].mxu1 %vm179_vm1, %v14021_v4 }
 0x220   : > { %15140 = vmatpush3.msk.msra.mxu0 %vm186_vm0, %v13975_v1  ;;  %15141 = vmatprep.mubr.msk.f32.mxu0 %vm179_vm1, %v14008_v53 }
 0x221   : > { %15144 = vmatprep.subr.msk.mxu0 %vm186_vm0, %v13981_v5  ;;  %15185 = vmatpush3.msk.msra.mxu1 %vm186_vm0, %v14028_v3 }
 0x222   : > { %15186 = vmatprep.mubr.msk.f32.mxu1 %vm179_vm1, %v14026_v6  ;;  %15189 = vmatprep.subr.msk.mxu1 %vm186_vm0, %v14034_v7 }
 0x227   : > { %15142 = vmatmul.mubr.msk.f32.vlgmr.msra.gmra.mrb[14].mxu0 %vm179_vm1, %v14009_v60  ;;  %15187 = vmatmul.mubr.msk.f32.vlgmr.msra.gmra.mrb[14].mxu1 %vm179_vm1, %v14027_v8 }
 0x228   : > { %15145 = vmatpush3.msk.msra.mxu0 %vm186_vm0, %v13981_v5  ;;  %15146 = vmatprep.mubr.msk.f32.mxu0 %vm179_vm1, %v14014_v62 }
 0x229   : > { %15190 = vmatpush3.msk.msra.mxu1 %vm186_vm0, %v14034_v7  ;;  %15191 = vmatprep.mubr.msk.f32.mxu1 %vm179_vm1, %v14032_v9 }
 0x22f   : > { %15147 = vmatmul.mubr.msk.f32.vlgmr.msra.gmra.mrb[14].mxu0 %vm179_vm1, %v14015_v0  ;;  %15192 = vmatmul.mubr.msk.f32.vlgmr.msra.gmra.mrb[14].mxu1 %vm179_vm1, %v14033_v11 }
 0x236   : > { %v14878_v12 = vpop.f32.mrb[8].mxu0  ;;  %v14923_v13 = vpop.f32.mrb[8].mxu1 }
 0x237   : > { %v7457_v14 = vadd.f32 %v14878_v12, %v16286_v10  ;;  %v7445_v15 = vpop.f32.mrb[9].mxu0  ;;  %v8252_v16 = vpop.f32.mrb[9].mxu1  ;;  %v8264_v20 = vadd.f32 %v14923_v13, %v16286_v10 }
 0x238   : > { %v7456_v17 = vadd.f32 %v16286_v10, %v7445_v15  ;;  %v8263_v21 = vadd.f32 %v16286_v10, %v8252_v16  ;;  %v15459_v10 = vld [vmem:[%s17072_s2] ss:$0 sm:$0xff] }
 0x239   : > { %v7459_v18 = vmax.f32 %v7457_v14, 0.0  ;;  %v8266_v22 = vmax.f32 %v8264_v20, 0.0 }
 0x23a   : > { %v7458_v19 = vmax.f32 %v7456_v17, 0.0  ;;  %v8265_v23 = vmax.f32 %v8263_v21, 0.0 }
 0x23b   : > { %7461 = vst.msk [vmem:[#allocation2 + $0x8] sm:$0xff] %vm991_vm2, %v7459_v18 }
 0x23c   : > { %7460 = vst.msk [vmem:[#allocation2] sm:$0xff] %vm991_vm2, %v7458_v19 }
 0x243   : > { %v7462_v24 = vld [vmem:[#allocation2] ss:$2 sm:$0xff]  ;;  %v7463_v25 = vld [vmem:[#allocation2 + $0x1] ss:$2 sm:$0xff] }
 0x244   : > { %8268 = vst.msk [vmem:[#allocation2 + $0x8] sm:$0xff] %vm991_vm2, %v8266_v22  ;;  %8267 = vst.msk [vmem:[#allocation2] sm:$0xff] %vm991_vm2, %v8265_v23  ;;  %v7464_v28 = vmax.f32 %v7462_v24, %v7463_v25 }
 0x24b   : > { %v8269_v26 = vld [vmem:[#allocation2] ss:$2 sm:$0xff]  ;;  %v8270_v27 = vld [vmem:[#allocation2 + $0x1] ss:$2 sm:$0xff] }
 0x24c   : > { %v8271_v29 = vmax.f32 %v8269_v26, %v8270_v27 }
 0x24e   : > { %v8272_v30 = vmax.f32 %v7464_v28, %v8271_v29 }
 0x250   : > { %13717 = vst.msk [vmem:[%s16367_s21 + $0x20] sm:$0xff] %vm991_vm2, %v8272_v30 }
 0x27a   : > { %v14968_v31 = vpop.f32.mrb[10].mxu0  ;;  %v15013_v32 = vpop.f32.mrb[10].mxu1 }
 0x27b   : > { %v9074_v33 = vadd.f32 %v15459_v10, %v14968_v31  ;;  %v9062_v34 = vpop.f32.mrb[11].mxu0  ;;  %v9869_v35 = vpop.f32.mrb[11].mxu1  ;;  %v9881_v39 = vadd.f32 %v15459_v10, %v15013_v32 }
 0x27c   : > { %v9073_v36 = vadd.f32 %v15459_v10, %v9062_v34  ;;  %v9880_v40 = vadd.f32 %v15459_v10, %v9869_v35 }
 0x27d   : > { %v9076_v37 = vmax.f32 %v9074_v33, 0.0  ;;  %v9883_v41 = vmax.f32 %v9881_v39, 0.0 }
 0x27e   : > { %v9075_v38 = vmax.f32 %v9073_v36, 0.0  ;;  %v9882_v42 = vmax.f32 %v9880_v40, 0.0 }
 0x27f   : > { %9078 = vst.msk [vmem:[#allocation2 + $0x8] sm:$0xff] %vm991_vm2, %v9076_v37 }
 0x280   : > { %9077 = vst.msk [vmem:[#allocation2] sm:$0xff] %vm991_vm2, %v9075_v38 }
 0x287   : > { %v9079_v43 = vld [vmem:[#allocation2] ss:$2 sm:$0xff]  ;;  %v9080_v44 = vld [vmem:[#allocation2 + $0x1] ss:$2 sm:$0xff] }
 0x288   : > { %9885 = vst.msk [vmem:[#allocation2 + $0x8] sm:$0xff] %vm991_vm2, %v9883_v41  ;;  %9884 = vst.msk [vmem:[#allocation2] sm:$0xff] %vm991_vm2, %v9882_v42  ;;  %v9081_v47 = vmax.f32 %v9079_v43, %v9080_v44 }
 0x28f   : > { %v9886_v45 = vld [vmem:[#allocation2] ss:$2 sm:$0xff]  ;;  %v9887_v46 = vld [vmem:[#allocation2 + $0x1] ss:$2 sm:$0xff] }
 0x290   : > { %v9888_v48 = vmax.f32 %v9886_v45, %v9887_v46 }
 0x292   : > { %v9889_v49 = vmax.f32 %v9081_v47, %v9888_v48 }
 0x294   : > { %13824 = vst.msk [vmem:[%s16367_s21 + $0x28] sm:$0xff] %vm991_vm2, %v9889_v49 }
 0x2be   : > { %v15058_v50 = vpop.f32.mrb[12].mxu0  ;;  %v15103_v51 = vpop.f32.mrb[12].mxu1 }
 0x2bf   : > { %v10691_v52 = vadd.f32 %v15459_v10, %v15058_v50  ;;  %v10679_v53 = vpop.f32.mrb[13].mxu0  ;;  %v11486_v54 = vpop.f32.mrb[13].mxu1  ;;  %v11498_v58 = vadd.f32 %v15459_v10, %v15103_v51 }
 0x2c0   : > { %v10690_v55 = vadd.f32 %v15459_v10, %v10679_v53  ;;  %v11497_v59 = vadd.f32 %v15459_v10, %v11486_v54 }
 0x2c1   : > { %v10693_v56 = vmax.f32 %v10691_v52, 0.0  ;;  %v11500_v60 = vmax.f32 %v11498_v58, 0.0 }
 0x2c2   : > { %v10692_v57 = vmax.f32 %v10690_v55, 0.0  ;;  %v11499_v61 = vmax.f32 %v11497_v59, 0.0 }
 0x2c3   : > { %10695 = vst.msk [vmem:[#allocation2 + $0x8] sm:$0xff] %vm991_vm2, %v10693_v56 }
 0x2c4   : > { %10694 = vst.msk [vmem:[#allocation2] sm:$0xff] %vm991_vm2, %v10692_v57 }
 0x2cb   : > { %v10696_v62 = vld [vmem:[#allocation2] ss:$2 sm:$0xff]  ;;  %v10697_v63 = vld [vmem:[#allocation2 + $0x1] ss:$2 sm:$0xff] }
 0x2cc   : > { %11502 = vst.msk [vmem:[#allocation2 + $0x8] sm:$0xff] %vm991_vm2, %v11500_v60  ;;  %11501 = vst.msk [vmem:[#allocation2] sm:$0xff] %vm991_vm2, %v11499_v61  ;;  %v10698_v2 = vmax.f32 %v10696_v62, %v10697_v63 }
 0x2d3   : > { %v11503_v0 = vld [vmem:[#allocation2] ss:$2 sm:$0xff]  ;;  %v11504_v1 = vld [vmem:[#allocation2 + $0x1] ss:$2 sm:$0xff] }
 0x2d4   : > { %v11505_v3 = vmax.f32 %v11503_v0, %v11504_v1 }
 0x2d6   : > { %v11506_v4 = vmax.f32 %v10698_v2, %v11505_v3 }
 0x2d8   : > { %13931 = vst.msk [vmem:[%s16367_s21 + $0x30] sm:$0xff] %vm991_vm2, %v11506_v4 }
 0x302   : > { %v15148_v5 = vpop.f32.mrb[14].mxu0  ;;  %v15193_v6 = vpop.f32.mrb[14].mxu1 }
 0x303   : > { %v12308_v7 = vadd.f32 %v15459_v10, %v15148_v5  ;;  %v12296_v8 = vpop.f32.mrb[15].mxu0  ;;  %v13103_v9 = vpop.f32.mrb[15].mxu1  ;;  %v13115_v14 = vadd.f32 %v15459_v10, %v15193_v6 }
 0x304   : > { %v12307_v11 = vadd.f32 %v15459_v10, %v12296_v8  ;;  %v13114_v15 = vadd.f32 %v15459_v10, %v13103_v9 }
 0x305   : > { %v12310_v12 = vmax.f32 %v12308_v7, 0.0  ;;  %v13117_v16 = vmax.f32 %v13115_v14, 0.0 }
 0x306   : > { %v12309_v13 = vmax.f32 %v12307_v11, 0.0  ;;  %v13116_v17 = vmax.f32 %v13114_v15, 0.0 }
 0x307   : > { %12312 = vst.msk [vmem:[#allocation2 + $0x8] sm:$0xff] %vm991_vm2, %v12310_v12 }
 0x308   : > { %12311 = vst.msk [vmem:[#allocation2] sm:$0xff] %vm991_vm2, %v12309_v13 }
 0x30f   : > { %v12313_v18 = vld [vmem:[#allocation2] ss:$2 sm:$0xff]  ;;  %v12314_v19 = vld [vmem:[#allocation2 + $0x1] ss:$2 sm:$0xff] }
 0x310   : > { %13119 = vst.msk [vmem:[#allocation2 + $0x8] sm:$0xff] %vm991_vm2, %v13117_v16  ;;  %13118 = vst.msk [vmem:[#allocation2] sm:$0xff] %vm991_vm2, %v13116_v17  ;;  %v12315_v22 = vmax.f32 %v12313_v18, %v12314_v19 }
 0x317   : > { %v13120_v20 = vld [vmem:[#allocation2] ss:$2 sm:$0xff]  ;;  %v13121_v21 = vld [vmem:[#allocation2 + $0x1] ss:$2 sm:$0xff] }
 0x318   : > { %v13122_v23 = vmax.f32 %v13120_v20, %v13121_v21 }
 0x31a   : > { %v13123_v24 = vmax.f32 %v12315_v22, %v13122_v23 }
 0x31c   : > { %14038 = vst.msk [vmem:[%s16367_s21 + $0x38] sm:$0xff] %vm991_vm2, %v13123_v24 }
 0x31d PF: > { %s13_s12 = sadd.s32 1, %s15466_s12  }
 0x31e   : > { %p10_p4 = scmp.ge.s32.totalorder %s13_s12, 4  }
 0x320   :  { %12 = sbr.rel (!%p10_p4) target bundleno = 1 (0x1), region = 95 }

</bundles_post_ra>
